<compile_context>
chip_gen: v7x
topology: tpu7x:2x2x1
jax: 0.10.0
libtpu: 0.0.40
codegen_flags: <defaults>
</compile_context>

<pallas_src>
import functools

import jax
import jax.numpy as jnp
from jax.experimental import pallas as pl
from jax.experimental.pallas import tpu as pltpu

# ----------------------------- model config (small, synthetic) ---------------
B = 2            # batch
S_NEW = 8        # new tokens this step
P_LEN = 8        # past (cached) tokens
T_MAX = 32       # preallocated cache length (multiple of 8)
D = 128          # hidden size
H = 4            # attention heads
DH = D // H      # head dim = 32
I_FF = 256       # MLP intermediate size
V = 256          # vocab size
L = 2            # decoder layers
EPS = 1e-6
DTYPE = jnp.float32


# ----------------------------- fused decoder-step kernel ---------------------
def _rmsnorm(x, w):
    var = jnp.mean(x * x, axis=-1, keepdims=True)
    return x * jax.lax.rsqrt(var + EPS) * w


def _decoder_step_kernel(
    # inputs
    h_ref, cos_ref, sin_ref,
    ln_in_ref, wqkv_ref, wo_ref, ln_post_ref, wg_ref, wu_ref, wd_ref,
    ln_f_ref, lm_head_ref,
    k_hbm_in, v_hbm_in,
    # outputs
    logits_ref, k_hbm_out, v_hbm_out,
    # scratch
    k_scr, v_scr, sem,
    *, past_len: int,
):
    s_new = S_NEW
    t_tot = past_len + s_new
    scale = 1.0 / (DH ** 0.5)

    h = h_ref[...]                                            # (B*S, D) f32
    cos = jnp.concatenate([cos_ref[...]] * B, axis=0)         # (B*S, DH)
    sin = jnp.concatenate([sin_ref[...]] * B, axis=0)

    # causal visibility: key position j visible to query i iff j <= past_len + i
    q_pos = past_len + jax.lax.broadcasted_iota(jnp.int32, (s_new, t_tot), 0)
    k_pos = jax.lax.broadcasted_iota(jnp.int32, (s_new, t_tot), 1)
    visible = k_pos <= q_pos

    def rope(x):  # x: (B*S, D), heads concatenated along the lane dim
        half = DH // 2
        outs = []
        for hd in range(H):
            xh = x[:, hd * DH:(hd + 1) * DH]
            x1 = xh[:, :half]
            x2 = xh[:, half:]
            rot = jnp.concatenate([-x2, x1], axis=-1)
            outs.append(xh * cos + rot * sin)
        return jnp.concatenate(outs, axis=-1)

    for l in range(L):
        # ---- prefetch cached K/V rows for this layer (overlaps the QKV matmul) ----
        if past_len > 0:
            rd_k = pltpu.make_async_copy(
                k_hbm_in.at[l, :, pl.ds(0, past_len), :],
                k_scr.at[:, pl.ds(0, past_len), :], sem.at[0])
            rd_v = pltpu.make_async_copy(
                v_hbm_in.at[l, :, pl.ds(0, past_len), :],
                v_scr.at[:, pl.ds(0, past_len), :], sem.at[1])
            rd_k.start()
            rd_v.start()

        # ---- RMSNorm + fused QKV projection: (B*S,128) @ (128,384) ----
        xn = _rmsnorm(h, ln_in_ref[l])
        qkv = jnp.dot(xn, wqkv_ref[l], preferred_element_type=jnp.float32)
        q = rope(qkv[:, 0:D])
        k_new = rope(qkv[:, D:2 * D])
        v_new = qkv[:, 2 * D:3 * D]

        if past_len > 0:
            rd_k.wait()
            rd_v.wait()

        # ---- place new K/V next to the cached rows; write back ONLY the new rows ----
        k_scr[:, pl.ds(past_len, s_new), :] = k_new.reshape(B, s_new, D)
        v_scr[:, pl.ds(past_len, s_new), :] = v_new.reshape(B, s_new, D)

        wr_k = pltpu.make_async_copy(
            k_scr.at[:, pl.ds(past_len, s_new), :],
            k_hbm_out.at[l, :, pl.ds(past_len, s_new), :], sem.at[2])
        wr_v = pltpu.make_async_copy(
            v_scr.at[:, pl.ds(past_len, s_new), :],
            v_hbm_out.at[l, :, pl.ds(past_len, s_new), :], sem.at[3])
        wr_k.start()
        wr_v.start()

        # ---- attention: all heads of a batch element, output (S, H*Dh=128) lane-dense ----
        rows = []
        for b in range(B):
            q_b = q[b * s_new:(b + 1) * s_new, :]            # (S, D)
            k_b = k_scr[b]                                   # (T, D)
            v_b = v_scr[b]
            head_outs = []
            for hd in range(H):
                sl = slice(hd * DH, (hd + 1) * DH)
                s = jnp.dot(q_b[:, sl], k_b[:, sl].T,
                            preferred_element_type=jnp.float32) * scale   # (S, T)
                s = jnp.where(visible, s, -1e30)
                m = jnp.max(s, axis=-1, keepdims=True)
                p = jnp.exp(s - m)
                p = p * pl.reciprocal(jnp.sum(p, axis=-1, keepdims=True), approx=True)
                head_outs.append(jnp.dot(p, v_b[:, sl],
                                         preferred_element_type=jnp.float32))
            rows.append(jnp.concatenate(head_outs, axis=-1))               # (S, D)
        attn = jnp.concatenate(rows, axis=0)                               # (B*S, D)

        # ---- output projection + residual ----
        h = h + jnp.dot(attn, wo_ref[l], preferred_element_type=jnp.float32)

        # ---- post-attention RMSNorm + SwiGLU MLP + residual ----
        xn2 = _rmsnorm(h, ln_post_ref[l])
        g = jnp.dot(xn2, wg_ref[l], preferred_element_type=jnp.float32)
        u = jnp.dot(xn2, wu_ref[l], preferred_element_type=jnp.float32)
        mlp = jnp.dot(g * jax.nn.sigmoid(g) * u, wd_ref[l],
                      preferred_element_type=jnp.float32)
        h = h + mlp

        wr_k.wait()
        wr_v.wait()

    # ---- final RMSNorm + lm_head ----
    hn = _rmsnorm(h, ln_f_ref[...])
    logits_ref[...] = jnp.dot(hn, lm_head_ref[...],
                              preferred_element_type=jnp.float32).astype(logits_ref.dtype)


# ----------------------------- wrapper ----------------------------------------
def _rope_tables(past_len, s_new):
    pos = past_len + jnp.arange(s_new, dtype=jnp.float32)
    inv_freq = 1.0 / (10000.0 ** (jnp.arange(0, DH, 2, dtype=jnp.float32) / DH))
    freqs = pos[:, None] * inv_freq[None, :]               # (S, DH/2)
    emb = jnp.concatenate([freqs, freqs], axis=-1)         # (S, DH)
    return jnp.cos(emb).astype(DTYPE), jnp.sin(emb).astype(DTYPE)


def model_with_past_forward(params, inputs_embeds, k_cache, v_cache, past_len):
    """One fused Pallas call: all decoder layers + final norm + lm_head.

    Returns (logits (B,S,V), k_cache, v_cache, new_length). The caches are the
    preallocated (L, B, T_MAX, D) buffers, updated in place via aliasing.
    """
    b, s_new, d = inputs_embeds.shape
    assert (b, s_new, d) == (B, S_NEW, D)
    cos, sin = _rope_tables(past_len, s_new)
    h2d = inputs_embeds.reshape(b * s_new, d)

    kernel = functools.partial(_decoder_step_kernel, past_len=past_len)
    vmem = pl.BlockSpec(memory_space=pltpu.MemorySpace.VMEM)
    anyspace = pl.BlockSpec(memory_space=pl.ANY)

    logits2d, k_cache_new, v_cache_new = pl.pallas_call(
        kernel,
        out_shape=(
            jax.ShapeDtypeStruct((b * s_new, V), DTYPE),
            jax.ShapeDtypeStruct(k_cache.shape, k_cache.dtype),
            jax.ShapeDtypeStruct(v_cache.shape, v_cache.dtype),
        ),
        in_specs=[vmem] * 12 + [anyspace, anyspace],
        out_specs=(vmem, anyspace, anyspace),
        scratch_shapes=[
            pltpu.VMEM((B, past_len + s_new, D), jnp.float32),   # K (past + new) per batch
            pltpu.VMEM((B, past_len + s_new, D), jnp.float32),   # V (past + new) per batch
            pltpu.SemaphoreType.DMA((4,)),
        ],
        input_output_aliases={12: 1, 13: 2},   # k_cache, v_cache updated in place
    )(h2d, cos, sin,
      params["ln_in"], params["wqkv"], params["wo"], params["ln_post"],
      params["wg"], params["wu"], params["wd"],
      params["ln_f"], params["lm_head"],
      k_cache, v_cache)

    logits = logits2d.reshape(b, s_new, V)
    return logits, k_cache_new, v_cache_new, past_len + s_new


def init_params(key):
    def nrm(k, shape, scale=0.02):
        return (scale * jax.random.normal(k, shape, jnp.float32)).astype(DTYPE)

    keys = jax.random.split(key, 8 * L + 1)
    wqkv, wo, wg, wu, wd = [], [], [], [], []
    for l in range(L):
        ks = keys[8 * l: 8 * (l + 1)]
        wq = nrm(ks[0], (D, D))
        wk = nrm(ks[1], (D, D))
        wv = nrm(ks[2], (D, D))
        wqkv.append(jnp.concatenate([wq, wk, wv], axis=1))   # fused (D, 3D)
        wo.append(nrm(ks[3], (D, D)))
        wg.append(nrm(ks[4], (D, I_FF)))
        wu.append(nrm(ks[5], (D, I_FF)))
        wd.append(nrm(ks[6], (I_FF, D)))
    return {
        "ln_in": jnp.ones((L, 1, D), DTYPE),
        "ln_post": jnp.ones((L, 1, D), DTYPE),
        "wqkv": jnp.stack(wqkv),       # (L, D, 3D)
        "wo": jnp.stack(wo),           # (L, D, D)
        "wg": jnp.stack(wg),           # (L, D, I)
        "wu": jnp.stack(wu),           # (L, D, I)
        "wd": jnp.stack(wd),           # (L, I, D)
        "ln_f": jnp.ones((1, D), DTYPE),
        "lm_head": nrm(keys[-1], (D, V)),
    }


# ----------------------------- main -------------------------------------------
if __name__ == "__main__":
    key = jax.random.PRNGKey(0)
    key, k_emb, k_past = jax.random.split(key, 3)

    params = init_params(key)
    inputs_embeds = jax.random.normal(k_emb, (B, S_NEW, D), DTYPE)

    # Preallocated KV cache (L, B, T_MAX, D): heads concatenated along the lane dim,
    # first P_LEN rows hold the (already-RoPEd) past K/V.
    k_cache = jnp.zeros((L, B, T_MAX, D), DTYPE)
    v_cache = jnp.zeros((L, B, T_MAX, D), DTYPE)
    for l in range(L):
        k_past, ka, kb = jax.random.split(k_past, 3)
        pk = 0.02 * jax.random.normal(ka, (B, H, P_LEN, DH), DTYPE)   # HF (B,H,P,Dh) layout
        pv = 0.02 * jax.random.normal(kb, (B, H, P_LEN, DH), DTYPE)
        k_cache = k_cache.at[l, :, :P_LEN, :].set(
            pk.transpose(0, 2, 1, 3).reshape(B, P_LEN, D))
        v_cache = v_cache.at[l, :, :P_LEN, :].set(
            pv.transpose(0, 2, 1, 3).reshape(B, P_LEN, D))

    logits, k_cache, v_cache, new_len = model_with_past_forward(
        params, inputs_embeds, k_cache, v_cache, P_LEN)
    jax.block_until_ready(logits)
    jax.block_until_ready(k_cache)
    jax.block_until_ready(v_cache)

    # HF-style view of the updated cache: tuple of per-layer (k, v) in (B, H, T, Dh).
    new_past = tuple(
        (k_cache[l, :, :new_len, :].reshape(B, new_len, H, DH).transpose(0, 2, 1, 3),
         v_cache[l, :, :new_len, :].reshape(B, new_len, H, DH).transpose(0, 2, 1, 3))
        for l in range(L))

    assert logits.shape == (B, S_NEW, V)
    assert new_past[0][0].shape == (B, H, P_LEN + S_NEW, DH)
    assert bool(jnp.isfinite(logits).all())
    print("KERNEL_OK")
</pallas_src>

<mosaic_0001>
module attributes {stable_mosaic.version = 11 : i64} {
  func.func @_decoder_step_kernel(%arg0: memref<16x128xf32, #tpu.memory_space<vmem>>, %arg1: memref<8x32xf32, #tpu.memory_space<vmem>>, %arg2: memref<8x32xf32, #tpu.memory_space<vmem>>, %arg3: memref<2x1x128xf32, #tpu.memory_space<vmem>>, %arg4: memref<2x128x384xf32, #tpu.memory_space<vmem>>, %arg5: memref<2x128x128xf32, #tpu.memory_space<vmem>>, %arg6: memref<2x1x128xf32, #tpu.memory_space<vmem>>, %arg7: memref<2x128x256xf32, #tpu.memory_space<vmem>>, %arg8: memref<2x128x256xf32, #tpu.memory_space<vmem>>, %arg9: memref<2x256x128xf32, #tpu.memory_space<vmem>>, %arg10: memref<1x128xf32, #tpu.memory_space<vmem>>, %arg11: memref<128x256xf32, #tpu.memory_space<vmem>>, %arg12: memref<2x2x32x128xf32, #tpu.memory_space<any>>, %arg13: memref<2x2x32x128xf32, #tpu.memory_space<any>>, %arg14: memref<16x256xf32, #tpu.memory_space<vmem>>, %arg15: memref<2x2x32x128xf32, #tpu.memory_space<any>>, %arg16: memref<2x2x32x128xf32, #tpu.memory_space<any>>, %arg17: memref<2x16x128xf32, #tpu.memory_space<vmem>>, %arg18: memref<2x16x128xf32, #tpu.memory_space<vmem>>, %arg19: memref<4x!tpu.dma_semaphore, #tpu.memory_space<semaphore_mem>>) attributes {dimension_semantics = [], scalar_prefetch = 0 : i64, scratch_operands = 3 : i64, tpu.core_type = #tpu.core_type<tc>} {
    %c0 = arith.constant 0 : index
    %c0_0 = arith.constant 0 : index
    %0 = vector.load %arg0[%c0, %c0_0] : memref<16x128xf32, #tpu.memory_space<vmem>>, vector<16x128xf32>
    %c0_1 = arith.constant 0 : index
    %c0_2 = arith.constant 0 : index
    %1 = vector.load %arg1[%c0_1, %c0_2] : memref<8x32xf32, #tpu.memory_space<vmem>>, vector<8x32xf32>
    %2 = tpu.concatenate %1, %1 in 0 : vector<8x32xf32>, vector<8x32xf32> -> vector<16x32xf32>
    %c0_3 = arith.constant 0 : index
    %c0_4 = arith.constant 0 : index
    %3 = vector.load %arg2[%c0_3, %c0_4] : memref<8x32xf32, #tpu.memory_space<vmem>>, vector<8x32xf32>
    %4 = tpu.concatenate %3, %3 in 0 : vector<8x32xf32>, vector<8x32xf32> -> vector<16x32xf32>
    %5 = tpu.iota {dimensions = array<i32: 0>} : vector<8x16xi32>
    %c8_i32 = arith.constant 8 : i32
    %6 = vector.broadcast %c8_i32 : i32 to vector<8x16xi32>
    %7 = arith.addi %6, %5 : vector<8x16xi32>
    %8 = tpu.iota {dimensions = array<i32: 1>} : vector<8x16xi32>
    %9 = arith.cmpi sle, %8, %7 : vector<8x16xi32>
    %c0_i32 = arith.constant 0 : i32
    %c0_i32_5 = arith.constant 0 : i32
    %c0_i32_6 = arith.constant 0 : i32
    %c0_i32_7 = arith.constant 0 : i32
    %c0_i32_8 = arith.constant 0 : i32
    %10 = tpu.memref_slice %arg12[%c0_i32, %c0_i32_6, %c0_i32_7, %c0_i32_8] : memref<2x2x32x128xf32, #tpu.memory_space<any>> -> memref<1x2x8x128xf32, #tpu.memory_space<any>>
    %11 = tpu.memref_squeeze %10 : memref<1x2x8x128xf32, #tpu.memory_space<any>> -> memref<2x8x128xf32, #tpu.memory_space<any>>
    %c0_i32_9 = arith.constant 0 : i32
    %c0_i32_10 = arith.constant 0 : i32
    %c0_i32_11 = arith.constant 0 : i32
    %12 = tpu.memref_slice %arg17[%c0_i32_9, %c0_i32_10, %c0_i32_11] : memref<2x16x128xf32, #tpu.memory_space<vmem>> -> memref<2x8x128xf32, #tpu.memory_space<vmem>>
    %13 = tpu.memref_slice %arg19[%c0_i32_5] : memref<4x!tpu.dma_semaphore, #tpu.memory_space<semaphore_mem>> -> memref<1x!tpu.dma_semaphore, #tpu.memory_space<semaphore_mem>>
    %14 = tpu.memref_squeeze %13 : memref<1x!tpu.dma_semaphore, #tpu.memory_space<semaphore_mem>> -> memref<!tpu.dma_semaphore, #tpu.memory_space<semaphore_mem>>
    tpu.enqueue_dma source(%11 : memref<2x8x128xf32, #tpu.memory_space<any>>) target(%12 : memref<2x8x128xf32, #tpu.memory_space<vmem>>) target_semaphore(%14 : memref<!tpu.dma_semaphore, #tpu.memory_space<semaphore_mem>>)
    %c0_i32_12 = arith.constant 0 : i32
    %c1_i32 = arith.constant 1 : i32
    %c0_i32_13 = arith.constant 0 : i32
    %c0_i32_14 = arith.constant 0 : i32
    %c0_i32_15 = arith.constant 0 : i32
    %15 = tpu.memref_slice %arg13[%c0_i32_12, %c0_i32_13, %c0_i32_14, %c0_i32_15] : memref<2x2x32x128xf32, #tpu.memory_space<any>> -> memref<1x2x8x128xf32, #tpu.memory_space<any>>
    %16 = tpu.memref_squeeze %15 : memref<1x2x8x128xf32, #tpu.memory_space<any>> -> memref<2x8x128xf32, #tpu.memory_space<any>>
    %c0_i32_16 = arith.constant 0 : i32
    %c0_i32_17 = arith.constant 0 : i32
    %c0_i32_18 = arith.constant 0 : i32
    %17 = tpu.memref_slice %arg18[%c0_i32_16, %c0_i32_17, %c0_i32_18] : memref<2x16x128xf32, #tpu.memory_space<vmem>> -> memref<2x8x128xf32, #tpu.memory_space<vmem>>
    %18 = tpu.memref_slice %arg19[%c1_i32] : memref<4x!tpu.dma_semaphore, #tpu.memory_space<semaphore_mem>> -> memref<1x!tpu.dma_semaphore, #tpu.memory_space<semaphore_mem>>
    %19 = tpu.memref_squeeze %18 : memref<1x!tpu.dma_semaphore, #tpu.memory_space<semaphore_mem>> -> memref<!tpu.dma_semaphore, #tpu.memory_space<semaphore_mem>>
    tpu.enqueue_dma source(%16 : memref<2x8x128xf32, #tpu.memory_space<any>>) target(%17 : memref<2x8x128xf32, #tpu.memory_space<vmem>>) target_semaphore(%19 : memref<!tpu.dma_semaphore, #tpu.memory_space<semaphore_mem>>)
    %c0_19 = arith.constant 0 : index
    %c0_20 = arith.constant 0 : index
    %c0_21 = arith.constant 0 : index
    %20 = vector.load %arg3[%c0_19, %c0_20, %c0_21] : memref<2x1x128xf32, #tpu.memory_space<vmem>>, vector<1x1x128xf32>
    %21 = vector.shape_cast %20 : vector<1x1x128xf32> to vector<1x128xf32>
    %22 = arith.mulf %0, %0 : vector<16x128xf32>
    %cst = arith.constant dense<0.000000e+00> : vector<16xf32>
    %23 = vector.multi_reduction <add>, %22, %cst [1] : vector<16x128xf32> to vector<16xf32>
    %24 = vector.shape_cast %23 : vector<16xf32> to vector<16x1xf32>
    %cst_22 = arith.constant 1.280000e+02 : f32
    %25 = vector.broadcast %cst_22 : f32 to vector<16x1xf32>
    %26 = arith.divf %24, %25 : vector<16x1xf32>
    %cst_23 = arith.constant 9.99999997E-7 : f32
    %27 = vector.broadcast %cst_23 : f32 to vector<16x1xf32>
    %28 = arith.addf %26, %27 : vector<16x1xf32>
    %29 = math.rsqrt %28 : vector<16x1xf32>
    %30 = vector.broadcast %29 : vector<16x1xf32> to vector<16x128xf32>
    %31 = arith.mulf %0, %30 : vector<16x128xf32>
    %32 = vector.broadcast %21 : vector<1x128xf32> to vector<16x128xf32>
    %33 = arith.mulf %31, %32 : vector<16x128xf32>
    %c0_24 = arith.constant 0 : index
    %c0_25 = arith.constant 0 : index
    %c0_26 = arith.constant 0 : index
    %34 = vector.load %arg4[%c0_24, %c0_25, %c0_26] : memref<2x128x384xf32, #tpu.memory_space<vmem>>, vector<1x128x384xf32>
    %35 = vector.shape_cast %34 : vector<1x128x384xf32> to vector<128x384xf32>
    %cst_27 = arith.constant dense<0.000000e+00> : vector<16x384xf32>
    %36 = tpu.matmul %33, %35, %cst_27 {dimension_numbers = #tpu.dot_dimension_numbers<[1], [0], [0], [1], [0, 0, 1, 1], [], []>} : vector<16x128xf32>, vector<128x384xf32>, vector<16x384xf32> -> vector<16x384xf32>
    %37 = vector.extract_strided_slice %36 {offsets = [0, 0], sizes = [16, 128], strides = [1, 1]} : vector<16x384xf32> to vector<16x128xf32>
    %38 = vector.extract_strided_slice %37 {offsets = [0, 0], sizes = [16, 32], strides = [1, 1]} : vector<16x128xf32> to vector<16x32xf32>
    %39 = vector.extract_strided_slice %38 {offsets = [0, 0], sizes = [16, 16], strides = [1, 1]} : vector<16x32xf32> to vector<16x16xf32>
    %40 = vector.extract_strided_slice %38 {offsets = [0, 16], sizes = [16, 16], strides = [1, 1]} : vector<16x32xf32> to vector<16x16xf32>
    %cst_28 = arith.constant 0.000000e+00 : f32
    %41 = vector.broadcast %cst_28 : f32 to vector<16x16xf32>
    %42 = arith.subf %41, %40 : vector<16x16xf32>
    %43 = tpu.concatenate %42, %39 in 1 : vector<16x16xf32>, vector<16x16xf32> -> vector<16x32xf32>
    %44 = arith.mulf %38, %2 : vector<16x32xf32>
    %45 = arith.mulf %43, %4 : vector<16x32xf32>
    %46 = arith.addf %44, %45 : vector<16x32xf32>
    %47 = vector.extract_strided_slice %37 {offsets = [0, 32], sizes = [16, 32], strides = [1, 1]} : vector<16x128xf32> to vector<16x32xf32>
    %48 = vector.extract_strided_slice %47 {offsets = [0, 0], sizes = [16, 16], strides = [1, 1]} : vector<16x32xf32> to vector<16x16xf32>
    %49 = vector.extract_strided_slice %47 {offsets = [0, 16], sizes = [16, 16], strides = [1, 1]} : vector<16x32xf32> to vector<16x16xf32>
    %cst_29 = arith.constant 0.000000e+00 : f32
    %50 = vector.broadcast %cst_29 : f32 to vector<16x16xf32>
    %51 = arith.subf %50, %49 : vector<16x16xf32>
    %52 = tpu.concatenate %51, %48 in 1 : vector<16x16xf32>, vector<16x16xf32> -> vector<16x32xf32>
    %53 = arith.mulf %47, %2 : vector<16x32xf32>
    %54 = arith.mulf %52, %4 : vector<16x32xf32>
    %55 = arith.addf %53, %54 : vector<16x32xf32>
    %56 = vector.extract_strided_slice %37 {offsets = [0, 64], sizes = [16, 32], strides = [1, 1]} : vector<16x128xf32> to vector<16x32xf32>
    %57 = vector.extract_strided_slice %56 {offsets = [0, 0], sizes = [16, 16], strides = [1, 1]} : vector<16x32xf32> to vector<16x16xf32>
    %58 = vector.extract_strided_slice %56 {offsets = [0, 16], sizes = [16, 16], strides = [1, 1]} : vector<16x32xf32> to vector<16x16xf32>
    %cst_30 = arith.constant 0.000000e+00 : f32
    %59 = vector.broadcast %cst_30 : f32 to vector<16x16xf32>
    %60 = arith.subf %59, %58 : vector<16x16xf32>
    %61 = tpu.concatenate %60, %57 in 1 : vector<16x16xf32>, vector<16x16xf32> -> vector<16x32xf32>
    %62 = arith.mulf %56, %2 : vector<16x32xf32>
    %63 = arith.mulf %61, %4 : vector<16x32xf32>
    %64 = arith.addf %62, %63 : vector<16x32xf32>
    %65 = vector.extract_strided_slice %37 {offsets = [0, 96], sizes = [16, 32], strides = [1, 1]} : vector<16x128xf32> to vector<16x32xf32>
    %66 = vector.extract_strided_slice %65 {offsets = [0, 0], sizes = [16, 16], strides = [1, 1]} : vector<16x32xf32> to vector<16x16xf32>
    %67 = vector.extract_strided_slice %65 {offsets = [0, 16], sizes = [16, 16], strides = [1, 1]} : vector<16x32xf32> to vector<16x16xf32>
    %cst_31 = arith.constant 0.000000e+00 : f32
    %68 = vector.broadcast %cst_31 : f32 to vector<16x16xf32>
    %69 = arith.subf %68, %67 : vector<16x16xf32>
    %70 = tpu.concatenate %69, %66 in 1 : vector<16x16xf32>, vector<16x16xf32> -> vector<16x32xf32>
    %71 = arith.mulf %65, %2 : vector<16x32xf32>
    %72 = arith.mulf %70, %4 : vector<16x32xf32>
    %73 = arith.addf %71, %72 : vector<16x32xf32>
    %74 = tpu.concatenate %46, %55, %64, %73 in 1 : vector<16x32xf32>, vector<16x32xf32>, vector<16x32xf32>, vector<16x32xf32> -> vector<16x128xf32>
    %75 = vector.extract_strided_slice %36 {offsets = [0, 128], sizes = [16, 128], strides = [1, 1]} : vector<16x384xf32> to vector<16x128xf32>
    %76 = vector.extract_strided_slice %75 {offsets = [0, 0], sizes = [16, 32], strides = [1, 1]} : vector<16x128xf32> to vector<16x32xf32>
    %77 = vector.extract_strided_slice %76 {offsets = [0, 0], sizes = [16, 16], strides = [1, 1]} : vector<16x32xf32> to vector<16x16xf32>
    %78 = vector.extract_strided_slice %76 {offsets = [0, 16], sizes = [16, 16], strides = [1, 1]} : vector<16x32xf32> to vector<16x16xf32>
    %cst_32 = arith.constant 0.000000e+00 : f32
    %79 = vector.broadcast %cst_32 : f32 to vector<16x16xf32>
    %80 = arith.subf %79, %78 : vector<16x16xf32>
    %81 = tpu.concatenate %80, %77 in 1 : vector<16x16xf32>, vector<16x16xf32> -> vector<16x32xf32>
    %82 = arith.mulf %76, %2 : vector<16x32xf32>
    %83 = arith.mulf %81, %4 : vector<16x32xf32>
    %84 = arith.addf %82, %83 : vector<16x32xf32>
    %85 = vector.extract_strided_slice %75 {offsets = [0, 32], sizes = [16, 32], strides = [1, 1]} : vector<16x128xf32> to vector<16x32xf32>
    %86 = vector.extract_strided_slice %85 {offsets = [0, 0], sizes = [16, 16], strides = [1, 1]} : vector<16x32xf32> to vector<16x16xf32>
    %87 = vector.extract_strided_slice %85 {offsets = [0, 16], sizes = [16, 16], strides = [1, 1]} : vector<16x32xf32> to vector<16x16xf32>
    %cst_33 = arith.constant 0.000000e+00 : f32
    %88 = vector.broadcast %cst_33 : f32 to vector<16x16xf32>
    %89 = arith.subf %88, %87 : vector<16x16xf32>
    %90 = tpu.concatenate %89, %86 in 1 : vector<16x16xf32>, vector<16x16xf32> -> vector<16x32xf32>
    %91 = arith.mulf %85, %2 : vector<16x32xf32>
    %92 = arith.mulf %90, %4 : vector<16x32xf32>
    %93 = arith.addf %91, %92 : vector<16x32xf32>
    %94 = vector.extract_strided_slice %75 {offsets = [0, 64], sizes = [16, 32], strides = [1, 1]} : vector<16x128xf32> to vector<16x32xf32>
    %95 = vector.extract_strided_slice %94 {offsets = [0, 0], sizes = [16, 16], strides = [1, 1]} : vector<16x32xf32> to vector<16x16xf32>
    %96 = vector.extract_strided_slice %94 {offsets = [0, 16], sizes = [16, 16], strides = [1, 1]} : vector<16x32xf32> to vector<16x16xf32>
    %cst_34 = arith.constant 0.000000e+00 : f32
    %97 = vector.broadcast %cst_34 : f32 to vector<16x16xf32>
    %98 = arith.subf %97, %96 : vector<16x16xf32>
    %99 = tpu.concatenate %98, %95 in 1 : vector<16x16xf32>, vector<16x16xf32> -> vector<16x32xf32>
    %100 = arith.mulf %94, %2 : vector<16x32xf32>
    %101 = arith.mulf %99, %4 : vector<16x32xf32>
    %102 = arith.addf %100, %101 : vector<16x32xf32>
    %103 = vector.extract_strided_slice %75 {offsets = [0, 96], sizes = [16, 32], strides = [1, 1]} : vector<16x128xf32> to vector<16x32xf32>
    %104 = vector.extract_strided_slice %103 {offsets = [0, 0], sizes = [16, 16], strides = [1, 1]} : vector<16x32xf32> to vector<16x16xf32>
    %105 = vector.extract_strided_slice %103 {offsets = [0, 16], sizes = [16, 16], strides = [1, 1]} : vector<16x32xf32> to vector<16x16xf32>
    %cst_35 = arith.constant 0.000000e+00 : f32
    %106 = vector.broadcast %cst_35 : f32 to vector<16x16xf32>
    %107 = arith.subf %106, %105 : vector<16x16xf32>
    %108 = tpu.concatenate %107, %104 in 1 : vector<16x16xf32>, vector<16x16xf32> -> vector<16x32xf32>
    %109 = arith.mulf %103, %2 : vector<16x32xf32>
    %110 = arith.mulf %108, %4 : vector<16x32xf32>
    %111 = arith.addf %109, %110 : vector<16x32xf32>
    %112 = tpu.concatenate %84, %93, %102, %111 in 1 : vector<16x32xf32>, vector<16x32xf32>, vector<16x32xf32>, vector<16x32xf32> -> vector<16x128xf32>
    %113 = vector.extract_strided_slice %36 {offsets = [0, 256], sizes = [16, 128], strides = [1, 1]} : vector<16x384xf32> to vector<16x128xf32>
    %c0_i32_36 = arith.constant 0 : i32
    %c0_i32_37 = arith.constant 0 : i32
    %c0_i32_38 = arith.constant 0 : i32
    %c0_i32_39 = arith.constant 0 : i32
    %c0_i32_40 = arith.constant 0 : i32
    %114 = tpu.memref_slice %arg12[%c0_i32_36, %c0_i32_38, %c0_i32_39, %c0_i32_40] : memref<2x2x32x128xf32, #tpu.memory_space<any>> -> memref<1x2x8x128xf32, #tpu.memory_space<any>>
    %115 = tpu.memref_squeeze %114 : memref<1x2x8x128xf32, #tpu.memory_space<any>> -> memref<2x8x128xf32, #tpu.memory_space<any>>
    %c0_i32_41 = arith.constant 0 : i32
    %c0_i32_42 = arith.constant 0 : i32
    %c0_i32_43 = arith.constant 0 : i32
    %116 = tpu.memref_slice %arg17[%c0_i32_41, %c0_i32_42, %c0_i32_43] : memref<2x16x128xf32, #tpu.memory_space<vmem>> -> memref<2x8x128xf32, #tpu.memory_space<vmem>>
    %117 = tpu.memref_slice %arg19[%c0_i32_37] : memref<4x!tpu.dma_semaphore, #tpu.memory_space<semaphore_mem>> -> memref<1x!tpu.dma_semaphore, #tpu.memory_space<semaphore_mem>>
    %118 = tpu.memref_squeeze %117 : memref<1x!tpu.dma_semaphore, #tpu.memory_space<semaphore_mem>> -> memref<!tpu.dma_semaphore, #tpu.memory_space<semaphore_mem>>
    tpu.wait_dma2 semaphore(%118 : memref<!tpu.dma_semaphore, #tpu.memory_space<semaphore_mem>>) src(%115 : memref<2x8x128xf32, #tpu.memory_space<any>>) dst(%116 : memref<2x8x128xf32, #tpu.memory_space<vmem>>)
    %c0_i32_44 = arith.constant 0 : i32
    %c1_i32_45 = arith.constant 1 : i32
    %c0_i32_46 = arith.constant 0 : i32
    %c0_i32_47 = arith.constant 0 : i32
    %c0_i32_48 = arith.constant 0 : i32
    %119 = tpu.memref_slice %arg13[%c0_i32_44, %c0_i32_46, %c0_i32_47, %c0_i32_48] : memref<2x2x32x128xf32, #tpu.memory_space<any>> -> memref<1x2x8x128xf32, #tpu.memory_space<any>>
    %120 = tpu.memref_squeeze %119 : memref<1x2x8x128xf32, #tpu.memory_space<any>> -> memref<2x8x128xf32, #tpu.memory_space<any>>
    %c0_i32_49 = arith.constant 0 : i32
    %c0_i32_50 = arith.constant 0 : i32
    %c0_i32_51 = arith.constant 0 : i32
    %121 = tpu.memref_slice %arg18[%c0_i32_49, %c0_i32_50, %c0_i32_51] : memref<2x16x128xf32, #tpu.memory_space<vmem>> -> memref<2x8x128xf32, #tpu.memory_space<vmem>>
    %122 = tpu.memref_slice %arg19[%c1_i32_45] : memref<4x!tpu.dma_semaphore, #tpu.memory_space<semaphore_mem>> -> memref<1x!tpu.dma_semaphore, #tpu.memory_space<semaphore_mem>>
    %123 = tpu.memref_squeeze %122 : memref<1x!tpu.dma_semaphore, #tpu.memory_space<semaphore_mem>> -> memref<!tpu.dma_semaphore, #tpu.memory_space<semaphore_mem>>
    tpu.wait_dma2 semaphore(%123 : memref<!tpu.dma_semaphore, #tpu.memory_space<semaphore_mem>>) src(%120 : memref<2x8x128xf32, #tpu.memory_space<any>>) dst(%121 : memref<2x8x128xf32, #tpu.memory_space<vmem>>)
    %124 = vector.shape_cast %112 : vector<16x128xf32> to vector<2x8x128xf32>
    %c0_52 = arith.constant 0 : index
    %c8 = arith.constant 8 : index
    %c0_53 = arith.constant 0 : index
    %125 = vector.load %arg17[%c0_52, %c8, %c0_53] : memref<2x16x128xf32, #tpu.memory_space<vmem>>, vector<2x8x128xf32>
    tpu.vector_store %arg17[%c0_52, %c8, %c0_53], %124 {strides = array<i32>} : memref<2x16x128xf32, #tpu.memory_space<vmem>>, vector<2x8x128xf32>,
    %126 = vector.shape_cast %113 : vector<16x128xf32> to vector<2x8x128xf32>
    %c0_54 = arith.constant 0 : index
    %c8_55 = arith.constant 8 : index
    %c0_56 = arith.constant 0 : index
    %127 = vector.load %arg18[%c0_54, %c8_55, %c0_56] : memref<2x16x128xf32, #tpu.memory_space<vmem>>, vector<2x8x128xf32>
    tpu.vector_store %arg18[%c0_54, %c8_55, %c0_56], %126 {strides = array<i32>} : memref<2x16x128xf32, #tpu.memory_space<vmem>>, vector<2x8x128xf32>,
    %c0_i32_57 = arith.constant 0 : i32
    %c2_i32 = arith.constant 2 : i32
    %c0_i32_58 = arith.constant 0 : i32
    %c8_i32_59 = arith.constant 8 : i32
    %c0_i32_60 = arith.constant 0 : i32
    %128 = tpu.memref_slice %arg17[%c0_i32_58, %c8_i32_59, %c0_i32_60] : memref<2x16x128xf32, #tpu.memory_space<vmem>> -> memref<2x8x128xf32, #tpu.memory_space<vmem>>
    %c0_i32_61 = arith.constant 0 : i32
    %c8_i32_62 = arith.constant 8 : i32
    %c0_i32_63 = arith.constant 0 : i32
    %129 = tpu.memref_slice %arg15[%c0_i32_57, %c0_i32_61, %c8_i32_62, %c0_i32_63] : memref<2x2x32x128xf32, #tpu.memory_space<any>> -> memref<1x2x8x128xf32, #tpu.memory_space<any>>
    %130 = tpu.memref_squeeze %129 : memref<1x2x8x128xf32, #tpu.memory_space<any>> -> memref<2x8x128xf32, #tpu.memory_space<any>>
    %131 = tpu.memref_slice %arg19[%c2_i32] : memref<4x!tpu.dma_semaphore, #tpu.memory_space<semaphore_mem>> -> memref<1x!tpu.dma_semaphore, #tpu.memory_space<semaphore_mem>>
    %132 = tpu.memref_squeeze %131 : memref<1x!tpu.dma_semaphore, #tpu.memory_space<semaphore_mem>> -> memref<!tpu.dma_semaphore, #tpu.memory_space<semaphore_mem>>
    tpu.enqueue_dma source(%128 : memref<2x8x128xf32, #tpu.memory_space<vmem>>) target(%130 : memref<2x8x128xf32, #tpu.memory_space<any>>) target_semaphore(%132 : memref<!tpu.dma_semaphore, #tpu.memory_space<semaphore_mem>>)
    %c0_i32_64 = arith.constant 0 : i32
    %c3_i32 = arith.constant 3 : i32
    %c0_i32_65 = arith.constant 0 : i32
    %c8_i32_66 = arith.constant 8 : i32
    %c0_i32_67 = arith.constant 0 : i32
    %133 = tpu.memref_slice %arg18[%c0_i32_65, %c8_i32_66, %c0_i32_67] : memref<2x16x128xf32, #tpu.memory_space<vmem>> -> memref<2x8x128xf32, #tpu.memory_space<vmem>>
    %c0_i32_68 = arith.constant 0 : i32
    %c8_i32_69 = arith.constant 8 : i32
    %c0_i32_70 = arith.constant 0 : i32
    %134 = tpu.memref_slice %arg16[%c0_i32_64, %c0_i32_68, %c8_i32_69, %c0_i32_70] : memref<2x2x32x128xf32, #tpu.memory_space<any>> -> memref<1x2x8x128xf32, #tpu.memory_space<any>>
    %135 = tpu.memref_squeeze %134 : memref<1x2x8x128xf32, #tpu.memory_space<any>> -> memref<2x8x128xf32, #tpu.memory_space<any>>
    %136 = tpu.memref_slice %arg19[%c3_i32] : memref<4x!tpu.dma_semaphore, #tpu.memory_space<semaphore_mem>> -> memref<1x!tpu.dma_semaphore, #tpu.memory_space<semaphore_mem>>
    %137 = tpu.memref_squeeze %136 : memref<1x!tpu.dma_semaphore, #tpu.memory_space<semaphore_mem>> -> memref<!tpu.dma_semaphore, #tpu.memory_space<semaphore_mem>>
    tpu.enqueue_dma source(%133 : memref<2x8x128xf32, #tpu.memory_space<vmem>>) target(%135 : memref<2x8x128xf32, #tpu.memory_space<any>>) target_semaphore(%137 : memref<!tpu.dma_semaphore, #tpu.memory_space<semaphore_mem>>)
    %138 = vector.extract_strided_slice %74 {offsets = [0, 0], sizes = [8, 128], strides = [1, 1]} : vector<16x128xf32> to vector<8x128xf32>
    %c0_71 = arith.constant 0 : index
    %c0_72 = arith.constant 0 : index
    %c0_73 = arith.constant 0 : index
    %139 = vector.load %arg17[%c0_71, %c0_72, %c0_73] : memref<2x16x128xf32, #tpu.memory_space<vmem>>, vector<1x16x128xf32>
    %140 = vector.shape_cast %139 : vector<1x16x128xf32> to vector<16x128xf32>
    %c0_74 = arith.constant 0 : index
    %c0_75 = arith.constant 0 : index
    %c0_76 = arith.constant 0 : index
    %141 = vector.load %arg18[%c0_74, %c0_75, %c0_76] : memref<2x16x128xf32, #tpu.memory_space<vmem>>, vector<1x16x128xf32>
    %142 = vector.shape_cast %141 : vector<1x16x128xf32> to vector<16x128xf32>
    %143 = vector.extract_strided_slice %138 {offsets = [0, 0], sizes = [8, 32], strides = [1, 1]} : vector<8x128xf32> to vector<8x32xf32>
    %144 = vector.extract_strided_slice %140 {offsets = [0, 0], sizes = [16, 32], strides = [1, 1]} : vector<16x128xf32> to vector<16x32xf32>
    %145 = tpu.transpose %144, [1, 0] : vector<16x32xf32> -> vector<32x16xf32>
    %cst_77 = arith.constant dense<0.000000e+00> : vector<8x16xf32>
    %146 = tpu.matmul %143, %145, %cst_77 {dimension_numbers = #tpu.dot_dimension_numbers<[1], [0], [0], [1], [0, 0, 1, 1], [], []>} : vector<8x32xf32>, vector<32x16xf32>, vector<8x16xf32> -> vector<8x16xf32>
    %cst_78 = arith.constant 0.176776692 : f32
    %147 = vector.broadcast %cst_78 : f32 to vector<8x16xf32>
    %148 = arith.mulf %146, %147 : vector<8x16xf32>
    %cst_79 = arith.constant -1.000000e+30 : f32
    %149 = vector.broadcast %cst_79 : f32 to vector<8x16xf32>
    %150 = arith.select %9, %148, %149 : vector<8x16xi1>, vector<8x16xf32>
    %cst_80 = arith.constant dense<0xFF800000> : vector<8xf32>
    %151 = vector.multi_reduction <maximumf>, %150, %cst_80 [1] : vector<8x16xf32> to vector<8xf32>
    %152 = vector.shape_cast %151 : vector<8xf32> to vector<8x1xf32>
    %153 = vector.broadcast %152 : vector<8x1xf32> to vector<8x16xf32>
    %154 = arith.subf %150, %153 : vector<8x16xf32>
    %155 = math.exp %154 : vector<8x16xf32>
    %cst_81 = arith.constant dense<0.000000e+00> : vector<8xf32>
    %156 = vector.multi_reduction <add>, %155, %cst_81 [1] : vector<8x16xf32> to vector<8xf32>
    %157 = vector.shape_cast %156 : vector<8xf32> to vector<8x1xf32>
    %158 = tpu.reciprocal %157 {approx = true} : vector<8x1xf32> -> vector<8x1xf32>
    %159 = vector.broadcast %158 : vector<8x1xf32> to vector<8x16xf32>
    %160 = arith.mulf %155, %159 : vector<8x16xf32>
    %161 = vector.extract_strided_slice %142 {offsets = [0, 0], sizes = [16, 32], strides = [1, 1]} : vector<16x128xf32> to vector<16x32xf32>
    %cst_82 = arith.constant dense<0.000000e+00> : vector<8x32xf32>
    %162 = tpu.matmul %160, %161, %cst_82 {dimension_numbers = #tpu.dot_dimension_numbers<[1], [0], [0], [1], [0, 0, 1, 1], [], []>} : vector<8x16xf32>, vector<16x32xf32>, vector<8x32xf32> -> vector<8x32xf32>
    %163 = vector.extract_strided_slice %138 {offsets = [0, 32], sizes = [8, 32], strides = [1, 1]} : vector<8x128xf32> to vector<8x32xf32>
    %164 = vector.extract_strided_slice %140 {offsets = [0, 32], sizes = [16, 32], strides = [1, 1]} : vector<16x128xf32> to vector<16x32xf32>
    %165 = tpu.transpose %164, [1, 0] : vector<16x32xf32> -> vector<32x16xf32>
    %cst_83 = arith.constant dense<0.000000e+00> : vector<8x16xf32>
    %166 = tpu.matmul %163, %165, %cst_83 {dimension_numbers = #tpu.dot_dimension_numbers<[1], [0], [0], [1], [0, 0, 1, 1], [], []>} : vector<8x32xf32>, vector<32x16xf32>, vector<8x16xf32> -> vector<8x16xf32>
    %cst_84 = arith.constant 0.176776692 : f32
    %167 = vector.broadcast %cst_84 : f32 to vector<8x16xf32>
    %168 = arith.mulf %166, %167 : vector<8x16xf32>
    %cst_85 = arith.constant -1.000000e+30 : f32
    %169 = vector.broadcast %cst_85 : f32 to vector<8x16xf32>
    %170 = arith.select %9, %168, %169 : vector<8x16xi1>, vector<8x16xf32>
    %cst_86 = arith.constant dense<0xFF800000> : vector<8xf32>
    %171 = vector.multi_reduction <maximumf>, %170, %cst_86 [1] : vector<8x16xf32> to vector<8xf32>
    %172 = vector.shape_cast %171 : vector<8xf32> to vector<8x1xf32>
    %173 = vector.broadcast %172 : vector<8x1xf32> to vector<8x16xf32>
    %174 = arith.subf %170, %173 : vector<8x16xf32>
    %175 = math.exp %174 : vector<8x16xf32>
    %cst_87 = arith.constant dense<0.000000e+00> : vector<8xf32>
    %176 = vector.multi_reduction <add>, %175, %cst_87 [1] : vector<8x16xf32> to vector<8xf32>
    %177 = vector.shape_cast %176 : vector<8xf32> to vector<8x1xf32>
    %178 = tpu.reciprocal %177 {approx = true} : vector<8x1xf32> -> vector<8x1xf32>
    %179 = vector.broadcast %178 : vector<8x1xf32> to vector<8x16xf32>
    %180 = arith.mulf %175, %179 : vector<8x16xf32>
    %181 = vector.extract_strided_slice %142 {offsets = [0, 32], sizes = [16, 32], strides = [1, 1]} : vector<16x128xf32> to vector<16x32xf32>
    %cst_88 = arith.constant dense<0.000000e+00> : vector<8x32xf32>
    %182 = tpu.matmul %180, %181, %cst_88 {dimension_numbers = #tpu.dot_dimension_numbers<[1], [0], [0], [1], [0, 0, 1, 1], [], []>} : vector<8x16xf32>, vector<16x32xf32>, vector<8x32xf32> -> vector<8x32xf32>
    %183 = vector.extract_strided_slice %138 {offsets = [0, 64], sizes = [8, 32], strides = [1, 1]} : vector<8x128xf32> to vector<8x32xf32>
    %184 = vector.extract_strided_slice %140 {offsets = [0, 64], sizes = [16, 32], strides = [1, 1]} : vector<16x128xf32> to vector<16x32xf32>
    %185 = tpu.transpose %184, [1, 0] : vector<16x32xf32> -> vector<32x16xf32>
    %cst_89 = arith.constant dense<0.000000e+00> : vector<8x16xf32>
    %186 = tpu.matmul %183, %185, %cst_89 {dimension_numbers = #tpu.dot_dimension_numbers<[1], [0], [0], [1], [0, 0, 1, 1], [], []>} : vector<8x32xf32>, vector<32x16xf32>, vector<8x16xf32> -> vector<8x16xf32>
    %cst_90 = arith.constant 0.176776692 : f32
    %187 = vector.broadcast %cst_90 : f32 to vector<8x16xf32>
    %188 = arith.mulf %186, %187 : vector<8x16xf32>
    %cst_91 = arith.constant -1.000000e+30 : f32
    %189 = vector.broadcast %cst_91 : f32 to vector<8x16xf32>
    %190 = arith.select %9, %188, %189 : vector<8x16xi1>, vector<8x16xf32>
    %cst_92 = arith.constant dense<0xFF800000> : vector<8xf32>
    %191 = vector.multi_reduction <maximumf>, %190, %cst_92 [1] : vector<8x16xf32> to vector<8xf32>
    %192 = vector.shape_cast %191 : vector<8xf32> to vector<8x1xf32>
    %193 = vector.broadcast %192 : vector<8x1xf32> to vector<8x16xf32>
    %194 = arith.subf %190, %193 : vector<8x16xf32>
    %195 = math.exp %194 : vector<8x16xf32>
    %cst_93 = arith.constant dense<0.000000e+00> : vector<8xf32>
    %196 = vector.multi_reduction <add>, %195, %cst_93 [1] : vector<8x16xf32> to vector<8xf32>
    %197 = vector.shape_cast %196 : vector<8xf32> to vector<8x1xf32>
    %198 = tpu.reciprocal %197 {approx = true} : vector<8x1xf32> -> vector<8x1xf32>
    %199 = vector.broadcast %198 : vector<8x1xf32> to vector<8x16xf32>
    %200 = arith.mulf %195, %199 : vector<8x16xf32>
    %201 = vector.extract_strided_slice %142 {offsets = [0, 64], sizes = [16, 32], strides = [1, 1]} : vector<16x128xf32> to vector<16x32xf32>
    %cst_94 = arith.constant dense<0.000000e+00> : vector<8x32xf32>
    %202 = tpu.matmul %200, %201, %cst_94 {dimension_numbers = #tpu.dot_dimension_numbers<[1], [0], [0], [1], [0, 0, 1, 1], [], []>} : vector<8x16xf32>, vector<16x32xf32>, vector<8x32xf32> -> vector<8x32xf32>
    %203 = vector.extract_strided_slice %138 {offsets = [0, 96], sizes = [8, 32], strides = [1, 1]} : vector<8x128xf32> to vector<8x32xf32>
    %204 = vector.extract_strided_slice %140 {offsets = [0, 96], sizes = [16, 32], strides = [1, 1]} : vector<16x128xf32> to vector<16x32xf32>
    %205 = tpu.transpose %204, [1, 0] : vector<16x32xf32> -> vector<32x16xf32>
    %cst_95 = arith.constant dense<0.000000e+00> : vector<8x16xf32>
    %206 = tpu.matmul %203, %205, %cst_95 {dimension_numbers = #tpu.dot_dimension_numbers<[1], [0], [0], [1], [0, 0, 1, 1], [], []>} : vector<8x32xf32>, vector<32x16xf32>, vector<8x16xf32> -> vector<8x16xf32>
    %cst_96 = arith.constant 0.176776692 : f32
    %207 = vector.broadcast %cst_96 : f32 to vector<8x16xf32>
    %208 = arith.mulf %206, %207 : vector<8x16xf32>
    %cst_97 = arith.constant -1.000000e+30 : f32
    %209 = vector.broadcast %cst_97 : f32 to vector<8x16xf32>
    %210 = arith.select %9, %208, %209 : vector<8x16xi1>, vector<8x16xf32>
    %cst_98 = arith.constant dense<0xFF800000> : vector<8xf32>
    %211 = vector.multi_reduction <maximumf>, %210, %cst_98 [1] : vector<8x16xf32> to vector<8xf32>
    %212 = vector.shape_cast %211 : vector<8xf32> to vector<8x1xf32>
    %213 = vector.broadcast %212 : vector<8x1xf32> to vector<8x16xf32>
    %214 = arith.subf %210, %213 : vector<8x16xf32>
    %215 = math.exp %214 : vector<8x16xf32>
    %cst_99 = arith.constant dense<0.000000e+00> : vector<8xf32>
    %216 = vector.multi_reduction <add>, %215, %cst_99 [1] : vector<8x16xf32> to vector<8xf32>
    %217 = vector.shape_cast %216 : vector<8xf32> to vector<8x1xf32>
    %218 = tpu.reciprocal %217 {approx = true} : vector<8x1xf32> -> vector<8x1xf32>
    %219 = vector.broadcast %218 : vector<8x1xf32> to vector<8x16xf32>
    %220 = arith.mulf %215, %219 : vector<8x16xf32>
    %221 = vector.extract_strided_slice %142 {offsets = [0, 96], sizes = [16, 32], strides = [1, 1]} : vector<16x128xf32> to vector<16x32xf32>
    %cst_100 = arith.constant dense<0.000000e+00> : vector<8x32xf32>
    %222 = tpu.matmul %220, %221, %cst_100 {dimension_numbers = #tpu.dot_dimension_numbers<[1], [0], [0], [1], [0, 0, 1, 1], [], []>} : vector<8x16xf32>, vector<16x32xf32>, vector<8x32xf32> -> vector<8x32xf32>
    %223 = tpu.concatenate %162, %182, %202, %222 in 1 : vector<8x32xf32>, vector<8x32xf32>, vector<8x32xf32>, vector<8x32xf32> -> vector<8x128xf32>
    %224 = vector.extract_strided_slice %74 {offsets = [8, 0], sizes = [8, 128], strides = [1, 1]} : vector<16x128xf32> to vector<8x128xf32>
    %c1 = arith.constant 1 : index
    %c0_101 = arith.constant 0 : index
    %c0_102 = arith.constant 0 : index
    %225 = vector.load %arg17[%c1, %c0_101, %c0_102] : memref<2x16x128xf32, #tpu.memory_space<vmem>>, vector<1x16x128xf32>
    %226 = vector.shape_cast %225 : vector<1x16x128xf32> to vector<16x128xf32>
    %c1_103 = arith.constant 1 : index
    %c0_104 = arith.constant 0 : index
    %c0_105 = arith.constant 0 : index
    %227 = vector.load %arg18[%c1_103, %c0_104, %c0_105] : memref<2x16x128xf32, #tpu.memory_space<vmem>>, vector<1x16x128xf32>
    %228 = vector.shape_cast %227 : vector<1x16x128xf32> to vector<16x128xf32>
    %229 = vector.extract_strided_slice %224 {offsets = [0, 0], sizes = [8, 32], strides = [1, 1]} : vector<8x128xf32> to vector<8x32xf32>
    %230 = vector.extract_strided_slice %226 {offsets = [0, 0], sizes = [16, 32], strides = [1, 1]} : vector<16x128xf32> to vector<16x32xf32>
    %231 = tpu.transpose %230, [1, 0] : vector<16x32xf32> -> vector<32x16xf32>
    %cst_106 = arith.constant dense<0.000000e+00> : vector<8x16xf32>
    %232 = tpu.matmul %229, %231, %cst_106 {dimension_numbers = #tpu.dot_dimension_numbers<[1], [0], [0], [1], [0, 0, 1, 1], [], []>} : vector<8x32xf32>, vector<32x16xf32>, vector<8x16xf32> -> vector<8x16xf32>
    %cst_107 = arith.constant 0.176776692 : f32
    %233 = vector.broadcast %cst_107 : f32 to vector<8x16xf32>
    %234 = arith.mulf %232, %233 : vector<8x16xf32>
    %cst_108 = arith.constant -1.000000e+30 : f32
    %235 = vector.broadcast %cst_108 : f32 to vector<8x16xf32>
    %236 = arith.select %9, %234, %235 : vector<8x16xi1>, vector<8x16xf32>
    %cst_109 = arith.constant dense<0xFF800000> : vector<8xf32>
    %237 = vector.multi_reduction <maximumf>, %236, %cst_109 [1] : vector<8x16xf32> to vector<8xf32>
    %238 = vector.shape_cast %237 : vector<8xf32> to vector<8x1xf32>
    %239 = vector.broadcast %238 : vector<8x1xf32> to vector<8x16xf32>
    %240 = arith.subf %236, %239 : vector<8x16xf32>
    %241 = math.exp %240 : vector<8x16xf32>
    %cst_110 = arith.constant dense<0.000000e+00> : vector<8xf32>
    %242 = vector.multi_reduction <add>, %241, %cst_110 [1] : vector<8x16xf32> to vector<8xf32>
    %243 = vector.shape_cast %242 : vector<8xf32> to vector<8x1xf32>
    %244 = tpu.reciprocal %243 {approx = true} : vector<8x1xf32> -> vector<8x1xf32>
    %245 = vector.broadcast %244 : vector<8x1xf32> to vector<8x16xf32>
    %246 = arith.mulf %241, %245 : vector<8x16xf32>
    %247 = vector.extract_strided_slice %228 {offsets = [0, 0], sizes = [16, 32], strides = [1, 1]} : vector<16x128xf32> to vector<16x32xf32>
    %cst_111 = arith.constant dense<0.000000e+00> : vector<8x32xf32>
    %248 = tpu.matmul %246, %247, %cst_111 {dimension_numbers = #tpu.dot_dimension_numbers<[1], [0], [0], [1], [0, 0, 1, 1], [], []>} : vector<8x16xf32>, vector<16x32xf32>, vector<8x32xf32> -> vector<8x32xf32>
    %249 = vector.extract_strided_slice %224 {offsets = [0, 32], sizes = [8, 32], strides = [1, 1]} : vector<8x128xf32> to vector<8x32xf32>
    %250 = vector.extract_strided_slice %226 {offsets = [0, 32], sizes = [16, 32], strides = [1, 1]} : vector<16x128xf32> to vector<16x32xf32>
    %251 = tpu.transpose %250, [1, 0] : vector<16x32xf32> -> vector<32x16xf32>
    %cst_112 = arith.constant dense<0.000000e+00> : vector<8x16xf32>
    %252 = tpu.matmul %249, %251, %cst_112 {dimension_numbers = #tpu.dot_dimension_numbers<[1], [0], [0], [1], [0, 0, 1, 1], [], []>} : vector<8x32xf32>, vector<32x16xf32>, vector<8x16xf32> -> vector<8x16xf32>
    %cst_113 = arith.constant 0.176776692 : f32
    %253 = vector.broadcast %cst_113 : f32 to vector<8x16xf32>
    %254 = arith.mulf %252, %253 : vector<8x16xf32>
    %cst_114 = arith.constant -1.000000e+30 : f32
    %255 = vector.broadcast %cst_114 : f32 to vector<8x16xf32>
    %256 = arith.select %9, %254, %255 : vector<8x16xi1>, vector<8x16xf32>
    %cst_115 = arith.constant dense<0xFF800000> : vector<8xf32>
    %257 = vector.multi_reduction <maximumf>, %256, %cst_115 [1] : vector<8x16xf32> to vector<8xf32>
    %258 = vector.shape_cast %257 : vector<8xf32> to vector<8x1xf32>
    %259 = vector.broadcast %258 : vector<8x1xf32> to vector<8x16xf32>
    %260 = arith.subf %256, %259 : vector<8x16xf32>
    %261 = math.exp %260 : vector<8x16xf32>
    %cst_116 = arith.constant dense<0.000000e+00> : vector<8xf32>
    %262 = vector.multi_reduction <add>, %261, %cst_116 [1] : vector<8x16xf32> to vector<8xf32>
    %263 = vector.shape_cast %262 : vector<8xf32> to vector<8x1xf32>
    %264 = tpu.reciprocal %263 {approx = true} : vector<8x1xf32> -> vector<8x1xf32>
    %265 = vector.broadcast %264 : vector<8x1xf32> to vector<8x16xf32>
    %266 = arith.mulf %261, %265 : vector<8x16xf32>
    %267 = vector.extract_strided_slice %228 {offsets = [0, 32], sizes = [16, 32], strides = [1, 1]} : vector<16x128xf32> to vector<16x32xf32>
    %cst_117 = arith.constant dense<0.000000e+00> : vector<8x32xf32>
    %268 = tpu.matmul %266, %267, %cst_117 {dimension_numbers = #tpu.dot_dimension_numbers<[1], [0], [0], [1], [0, 0, 1, 1], [], []>} : vector<8x16xf32>, vector<16x32xf32>, vector<8x32xf32> -> vector<8x32xf32>
    %269 = vector.extract_strided_slice %224 {offsets = [0, 64], sizes = [8, 32], strides = [1, 1]} : vector<8x128xf32> to vector<8x32xf32>
    %270 = vector.extract_strided_slice %226 {offsets = [0, 64], sizes = [16, 32], strides = [1, 1]} : vector<16x128xf32> to vector<16x32xf32>
    %271 = tpu.transpose %270, [1, 0] : vector<16x32xf32> -> vector<32x16xf32>
    %cst_118 = arith.constant dense<0.000000e+00> : vector<8x16xf32>
    %272 = tpu.matmul %269, %271, %cst_118 {dimension_numbers = #tpu.dot_dimension_numbers<[1], [0], [0], [1], [0, 0, 1, 1], [], []>} : vector<8x32xf32>, vector<32x16xf32>, vector<8x16xf32> -> vector<8x16xf32>
    %cst_119 = arith.constant 0.176776692 : f32
    %273 = vector.broadcast %cst_119 : f32 to vector<8x16xf32>
    %274 = arith.mulf %272, %273 : vector<8x16xf32>
    %cst_120 = arith.constant -1.000000e+30 : f32
    %275 = vector.broadcast %cst_120 : f32 to vector<8x16xf32>
    %276 = arith.select %9, %274, %275 : vector<8x16xi1>, vector<8x16xf32>
    %cst_121 = arith.constant dense<0xFF800000> : vector<8xf32>
    %277 = vector.multi_reduction <maximumf>, %276, %cst_121 [1] : vector<8x16xf32> to vector<8xf32>
    %278 = vector.shape_cast %277 : vector<8xf32> to vector<8x1xf32>
    %279 = vector.broadcast %278 : vector<8x1xf32> to vector<8x16xf32>
    %280 = arith.subf %276, %279 : vector<8x16xf32>
    %281 = math.exp %280 : vector<8x16xf32>
    %cst_122 = arith.constant dense<0.000000e+00> : vector<8xf32>
    %282 = vector.multi_reduction <add>, %281, %cst_122 [1] : vector<8x16xf32> to vector<8xf32>
    %283 = vector.shape_cast %282 : vector<8xf32> to vector<8x1xf32>
    %284 = tpu.reciprocal %283 {approx = true} : vector<8x1xf32> -> vector<8x1xf32>
    %285 = vector.broadcast %284 : vector<8x1xf32> to vector<8x16xf32>
    %286 = arith.mulf %281, %285 : vector<8x16xf32>
    %287 = vector.extract_strided_slice %228 {offsets = [0, 64], sizes = [16, 32], strides = [1, 1]} : vector<16x128xf32> to vector<16x32xf32>
    %cst_123 = arith.constant dense<0.000000e+00> : vector<8x32xf32>
    %288 = tpu.matmul %286, %287, %cst_123 {dimension_numbers = #tpu.dot_dimension_numbers<[1], [0], [0], [1], [0, 0, 1, 1], [], []>} : vector<8x16xf32>, vector<16x32xf32>, vector<8x32xf32> -> vector<8x32xf32>
    %289 = vector.extract_strided_slice %224 {offsets = [0, 96], sizes = [8, 32], strides = [1, 1]} : vector<8x128xf32> to vector<8x32xf32>
    %290 = vector.extract_strided_slice %226 {offsets = [0, 96], sizes = [16, 32], strides = [1, 1]} : vector<16x128xf32> to vector<16x32xf32>
    %291 = tpu.transpose %290, [1, 0] : vector<16x32xf32> -> vector<32x16xf32>
    %cst_124 = arith.constant dense<0.000000e+00> : vector<8x16xf32>
    %292 = tpu.matmul %289, %291, %cst_124 {dimension_numbers = #tpu.dot_dimension_numbers<[1], [0], [0], [1], [0, 0, 1, 1], [], []>} : vector<8x32xf32>, vector<32x16xf32>, vector<8x16xf32> -> vector<8x16xf32>
    %cst_125 = arith.constant 0.176776692 : f32
    %293 = vector.broadcast %cst_125 : f32 to vector<8x16xf32>
    %294 = arith.mulf %292, %293 : vector<8x16xf32>
    %cst_126 = arith.constant -1.000000e+30 : f32
    %295 = vector.broadcast %cst_126 : f32 to vector<8x16xf32>
    %296 = arith.select %9, %294, %295 : vector<8x16xi1>, vector<8x16xf32>
    %cst_127 = arith.constant dense<0xFF800000> : vector<8xf32>
    %297 = vector.multi_reduction <maximumf>, %296, %cst_127 [1] : vector<8x16xf32> to vector<8xf32>
    %298 = vector.shape_cast %297 : vector<8xf32> to vector<8x1xf32>
    %299 = vector.broadcast %298 : vector<8x1xf32> to vector<8x16xf32>
    %300 = arith.subf %296, %299 : vector<8x16xf32>
    %301 = math.exp %300 : vector<8x16xf32>
    %cst_128 = arith.constant dense<0.000000e+00> : vector<8xf32>
    %302 = vector.multi_reduction <add>, %301, %cst_128 [1] : vector<8x16xf32> to vector<8xf32>
    %303 = vector.shape_cast %302 : vector<8xf32> to vector<8x1xf32>
    %304 = tpu.reciprocal %303 {approx = true} : vector<8x1xf32> -> vector<8x1xf32>
    %305 = vector.broadcast %304 : vector<8x1xf32> to vector<8x16xf32>
    %306 = arith.mulf %301, %305 : vector<8x16xf32>
    %307 = vector.extract_strided_slice %228 {offsets = [0, 96], sizes = [16, 32], strides = [1, 1]} : vector<16x128xf32> to vector<16x32xf32>
    %cst_129 = arith.constant dense<0.000000e+00> : vector<8x32xf32>
    %308 = tpu.matmul %306, %307, %cst_129 {dimension_numbers = #tpu.dot_dimension_numbers<[1], [0], [0], [1], [0, 0, 1, 1], [], []>} : vector<8x16xf32>, vector<16x32xf32>, vector<8x32xf32> -> vector<8x32xf32>
    %309 = tpu.concatenate %248, %268, %288, %308 in 1 : vector<8x32xf32>, vector<8x32xf32>, vector<8x32xf32>, vector<8x32xf32> -> vector<8x128xf32>
    %310 = tpu.concatenate %223, %309 in 0 : vector<8x128xf32>, vector<8x128xf32> -> vector<16x128xf32>
    %c0_130 = arith.constant 0 : index
    %c0_131 = arith.constant 0 : index
    %c0_132 = arith.constant 0 : index
    %311 = vector.load %arg5[%c0_130, %c0_131, %c0_132] : memref<2x128x128xf32, #tpu.memory_space<vmem>>, vector<1x128x128xf32>
    %312 = vector.shape_cast %311 : vector<1x128x128xf32> to vector<128x128xf32>
    %cst_133 = arith.constant dense<0.000000e+00> : vector<16x128xf32>
    %313 = tpu.matmul %310, %312, %cst_133 {dimension_numbers = #tpu.dot_dimension_numbers<[1], [0], [0], [1], [0, 0, 1, 1], [], []>} : vector<16x128xf32>, vector<128x128xf32>, vector<16x128xf32> -> vector<16x128xf32>
    %314 = arith.addf %0, %313 : vector<16x128xf32>
    %c0_134 = arith.constant 0 : index
    %c0_135 = arith.constant 0 : index
    %c0_136 = arith.constant 0 : index
    %315 = vector.load %arg6[%c0_134, %c0_135, %c0_136] : memref<2x1x128xf32, #tpu.memory_space<vmem>>, vector<1x1x128xf32>
    %316 = vector.shape_cast %315 : vector<1x1x128xf32> to vector<1x128xf32>
    %317 = arith.mulf %314, %314 : vector<16x128xf32>
    %cst_137 = arith.constant dense<0.000000e+00> : vector<16xf32>
    %318 = vector.multi_reduction <add>, %317, %cst_137 [1] : vector<16x128xf32> to vector<16xf32>
    %319 = vector.shape_cast %318 : vector<16xf32> to vector<16x1xf32>
    %cst_138 = arith.constant 1.280000e+02 : f32
    %320 = vector.broadcast %cst_138 : f32 to vector<16x1xf32>
    %321 = arith.divf %319, %320 : vector<16x1xf32>
    %cst_139 = arith.constant 9.99999997E-7 : f32
    %322 = vector.broadcast %cst_139 : f32 to vector<16x1xf32>
    %323 = arith.addf %321, %322 : vector<16x1xf32>
    %324 = math.rsqrt %323 : vector<16x1xf32>
    %325 = vector.broadcast %324 : vector<16x1xf32> to vector<16x128xf32>
    %326 = arith.mulf %314, %325 : vector<16x128xf32>
    %327 = vector.broadcast %316 : vector<1x128xf32> to vector<16x128xf32>
    %328 = arith.mulf %326, %327 : vector<16x128xf32>
    %c0_140 = arith.constant 0 : index
    %c0_141 = arith.constant 0 : index
    %c0_142 = arith.constant 0 : index
    %329 = vector.load %arg7[%c0_140, %c0_141, %c0_142] : memref<2x128x256xf32, #tpu.memory_space<vmem>>, vector<1x128x256xf32>
    %330 = vector.shape_cast %329 : vector<1x128x256xf32> to vector<128x256xf32>
    %cst_143 = arith.constant dense<0.000000e+00> : vector<16x256xf32>
    %331 = tpu.matmul %328, %330, %cst_143 {dimension_numbers = #tpu.dot_dimension_numbers<[1], [0], [0], [1], [0, 0, 1, 1], [], []>} : vector<16x128xf32>, vector<128x256xf32>, vector<16x256xf32> -> vector<16x256xf32>
    %c0_144 = arith.constant 0 : index
    %c0_145 = arith.constant 0 : index
    %c0_146 = arith.constant 0 : index
    %332 = vector.load %arg8[%c0_144, %c0_145, %c0_146] : memref<2x128x256xf32, #tpu.memory_space<vmem>>, vector<1x128x256xf32>
    %333 = vector.shape_cast %332 : vector<1x128x256xf32> to vector<128x256xf32>
    %cst_147 = arith.constant dense<0.000000e+00> : vector<16x256xf32>
    %334 = tpu.matmul %328, %333, %cst_147 {dimension_numbers = #tpu.dot_dimension_numbers<[1], [0], [0], [1], [0, 0, 1, 1], [], []>} : vector<16x128xf32>, vector<128x256xf32>, vector<16x256xf32> -> vector<16x256xf32>
    %335 = arith.negf %331 : vector<16x256xf32>
    %336 = math.exp %335 : vector<16x256xf32>
    %cst_148 = arith.constant 1.000000e+00 : f32
    %337 = vector.broadcast %cst_148 : f32 to vector<16x256xf32>
    %338 = arith.addf %337, %336 : vector<16x256xf32>
    %339 = arith.divf %337, %338 : vector<16x256xf32>
    %340 = arith.mulf %331, %339 : vector<16x256xf32>
    %341 = arith.mulf %340, %334 : vector<16x256xf32>
    %c0_149 = arith.constant 0 : index
    %c0_150 = arith.constant 0 : index
    %c0_151 = arith.constant 0 : index
    %342 = vector.load %arg9[%c0_149, %c0_150, %c0_151] : memref<2x256x128xf32, #tpu.memory_space<vmem>>, vector<1x256x128xf32>
    %343 = vector.shape_cast %342 : vector<1x256x128xf32> to vector<256x128xf32>
    %cst_152 = arith.constant dense<0.000000e+00> : vector<16x128xf32>
    %344 = tpu.matmul %341, %343, %cst_152 {dimension_numbers = #tpu.dot_dimension_numbers<[1], [0], [0], [1], [0, 0, 1, 1], [], []>} : vector<16x256xf32>, vector<256x128xf32>, vector<16x128xf32> -> vector<16x128xf32>
    %345 = arith.addf %314, %344 : vector<16x128xf32>
    %c0_i32_153 = arith.constant 0 : i32
    %c2_i32_154 = arith.constant 2 : i32
    %c0_i32_155 = arith.constant 0 : i32
    %c8_i32_156 = arith.constant 8 : i32
    %c0_i32_157 = arith.constant 0 : i32
    %346 = tpu.memref_slice %arg17[%c0_i32_155, %c8_i32_156, %c0_i32_157] : memref<2x16x128xf32, #tpu.memory_space<vmem>> -> memref<2x8x128xf32, #tpu.memory_space<vmem>>
    %c0_i32_158 = arith.constant 0 : i32
    %c8_i32_159 = arith.constant 8 : i32
    %c0_i32_160 = arith.constant 0 : i32
    %347 = tpu.memref_slice %arg15[%c0_i32_153, %c0_i32_158, %c8_i32_159, %c0_i32_160] : memref<2x2x32x128xf32, #tpu.memory_space<any>> -> memref<1x2x8x128xf32, #tpu.memory_space<any>>
    %348 = tpu.memref_squeeze %347 : memref<1x2x8x128xf32, #tpu.memory_space<any>> -> memref<2x8x128xf32, #tpu.memory_space<any>>
    %349 = tpu.memref_slice %arg19[%c2_i32_154] : memref<4x!tpu.dma_semaphore, #tpu.memory_space<semaphore_mem>> -> memref<1x!tpu.dma_semaphore, #tpu.memory_space<semaphore_mem>>
    %350 = tpu.memref_squeeze %349 : memref<1x!tpu.dma_semaphore, #tpu.memory_space<semaphore_mem>> -> memref<!tpu.dma_semaphore, #tpu.memory_space<semaphore_mem>>
    tpu.wait_dma2 semaphore(%350 : memref<!tpu.dma_semaphore, #tpu.memory_space<semaphore_mem>>) src(%346 : memref<2x8x128xf32, #tpu.memory_space<vmem>>) dst(%348 : memref<2x8x128xf32, #tpu.memory_space<any>>)
    %c0_i32_161 = arith.constant 0 : i32
    %c3_i32_162 = arith.constant 3 : i32
    %c0_i32_163 = arith.constant 0 : i32
    %c8_i32_164 = arith.constant 8 : i32
    %c0_i32_165 = arith.constant 0 : i32
    %351 = tpu.memref_slice %arg18[%c0_i32_163, %c8_i32_164, %c0_i32_165] : memref<2x16x128xf32, #tpu.memory_space<vmem>> -> memref<2x8x128xf32, #tpu.memory_space<vmem>>
    %c0_i32_166 = arith.constant 0 : i32
    %c8_i32_167 = arith.constant 8 : i32
    %c0_i32_168 = arith.constant 0 : i32
    %352 = tpu.memref_slice %arg16[%c0_i32_161, %c0_i32_166, %c8_i32_167, %c0_i32_168] : memref<2x2x32x128xf32, #tpu.memory_space<any>> -> memref<1x2x8x128xf32, #tpu.memory_space<any>>
    %353 = tpu.memref_squeeze %352 : memref<1x2x8x128xf32, #tpu.memory_space<any>> -> memref<2x8x128xf32, #tpu.memory_space<any>>
    %354 = tpu.memref_slice %arg19[%c3_i32_162] : memref<4x!tpu.dma_semaphore, #tpu.memory_space<semaphore_mem>> -> memref<1x!tpu.dma_semaphore, #tpu.memory_space<semaphore_mem>>
    %355 = tpu.memref_squeeze %354 : memref<1x!tpu.dma_semaphore, #tpu.memory_space<semaphore_mem>> -> memref<!tpu.dma_semaphore, #tpu.memory_space<semaphore_mem>>
    tpu.wait_dma2 semaphore(%355 : memref<!tpu.dma_semaphore, #tpu.memory_space<semaphore_mem>>) src(%351 : memref<2x8x128xf32, #tpu.memory_space<vmem>>) dst(%353 : memref<2x8x128xf32, #tpu.memory_space<any>>)
    %c1_i32_169 = arith.constant 1 : i32
    %c0_i32_170 = arith.constant 0 : i32
    %c0_i32_171 = arith.constant 0 : i32
    %c0_i32_172 = arith.constant 0 : i32
    %c0_i32_173 = arith.constant 0 : i32
    %356 = tpu.memref_slice %arg12[%c1_i32_169, %c0_i32_171, %c0_i32_172, %c0_i32_173] : memref<2x2x32x128xf32, #tpu.memory_space<any>> -> memref<1x2x8x128xf32, #tpu.memory_space<any>>
    %357 = tpu.memref_squeeze %356 : memref<1x2x8x128xf32, #tpu.memory_space<any>> -> memref<2x8x128xf32, #tpu.memory_space<any>>
    %c0_i32_174 = arith.constant 0 : i32
    %c0_i32_175 = arith.constant 0 : i32
    %c0_i32_176 = arith.constant 0 : i32
    %358 = tpu.memref_slice %arg17[%c0_i32_174, %c0_i32_175, %c0_i32_176] : memref<2x16x128xf32, #tpu.memory_space<vmem>> -> memref<2x8x128xf32, #tpu.memory_space<vmem>>
    %359 = tpu.memref_slice %arg19[%c0_i32_170] : memref<4x!tpu.dma_semaphore, #tpu.memory_space<semaphore_mem>> -> memref<1x!tpu.dma_semaphore, #tpu.memory_space<semaphore_mem>>
    %360 = tpu.memref_squeeze %359 : memref<1x!tpu.dma_semaphore, #tpu.memory_space<semaphore_mem>> -> memref<!tpu.dma_semaphore, #tpu.memory_space<semaphore_mem>>
    tpu.enqueue_dma source(%357 : memref<2x8x128xf32, #tpu.memory_space<any>>) target(%358 : memref<2x8x128xf32, #tpu.memory_space<vmem>>) target_semaphore(%360 : memref<!tpu.dma_semaphore, #tpu.memory_space<semaphore_mem>>)
    %c1_i32_177 = arith.constant 1 : i32
    %c1_i32_178 = arith.constant 1 : i32
    %c0_i32_179 = arith.constant 0 : i32
    %c0_i32_180 = arith.constant 0 : i32
    %c0_i32_181 = arith.constant 0 : i32
    %361 = tpu.memref_slice %arg13[%c1_i32_177, %c0_i32_179, %c0_i32_180, %c0_i32_181] : memref<2x2x32x128xf32, #tpu.memory_space<any>> -> memref<1x2x8x128xf32, #tpu.memory_space<any>>
    %362 = tpu.memref_squeeze %361 : memref<1x2x8x128xf32, #tpu.memory_space<any>> -> memref<2x8x128xf32, #tpu.memory_space<any>>
    %c0_i32_182 = arith.constant 0 : i32
    %c0_i32_183 = arith.constant 0 : i32
    %c0_i32_184 = arith.constant 0 : i32
    %363 = tpu.memref_slice %arg18[%c0_i32_182, %c0_i32_183, %c0_i32_184] : memref<2x16x128xf32, #tpu.memory_space<vmem>> -> memref<2x8x128xf32, #tpu.memory_space<vmem>>
    %364 = tpu.memref_slice %arg19[%c1_i32_178] : memref<4x!tpu.dma_semaphore, #tpu.memory_space<semaphore_mem>> -> memref<1x!tpu.dma_semaphore, #tpu.memory_space<semaphore_mem>>
    %365 = tpu.memref_squeeze %364 : memref<1x!tpu.dma_semaphore, #tpu.memory_space<semaphore_mem>> -> memref<!tpu.dma_semaphore, #tpu.memory_space<semaphore_mem>>
    tpu.enqueue_dma source(%362 : memref<2x8x128xf32, #tpu.memory_space<any>>) target(%363 : memref<2x8x128xf32, #tpu.memory_space<vmem>>) target_semaphore(%365 : memref<!tpu.dma_semaphore, #tpu.memory_space<semaphore_mem>>)
    %c1_185 = arith.constant 1 : index
    %c0_186 = arith.constant 0 : index
    %c0_187 = arith.constant 0 : index
    %366 = vector.load %arg3[%c1_185, %c0_186, %c0_187] : memref<2x1x128xf32, #tpu.memory_space<vmem>>, vector<1x1x128xf32>
    %367 = vector.shape_cast %366 : vector<1x1x128xf32> to vector<1x128xf32>
    %368 = arith.mulf %345, %345 : vector<16x128xf32>
    %cst_188 = arith.constant dense<0.000000e+00> : vector<16xf32>
    %369 = vector.multi_reduction <add>, %368, %cst_188 [1] : vector<16x128xf32> to vector<16xf32>
    %370 = vector.shape_cast %369 : vector<16xf32> to vector<16x1xf32>
    %cst_189 = arith.constant 1.280000e+02 : f32
    %371 = vector.broadcast %cst_189 : f32 to vector<16x1xf32>
    %372 = arith.divf %370, %371 : vector<16x1xf32>
    %cst_190 = arith.constant 9.99999997E-7 : f32
    %373 = vector.broadcast %cst_190 : f32 to vector<16x1xf32>
    %374 = arith.addf %372, %373 : vector<16x1xf32>
    %375 = math.rsqrt %374 : vector<16x1xf32>
    %376 = vector.broadcast %375 : vector<16x1xf32> to vector<16x128xf32>
    %377 = arith.mulf %345, %376 : vector<16x128xf32>
    %378 = vector.broadcast %367 : vector<1x128xf32> to vector<16x128xf32>
    %379 = arith.mulf %377, %378 : vector<16x128xf32>
    %c1_191 = arith.constant 1 : index
    %c0_192 = arith.constant 0 : index
    %c0_193 = arith.constant 0 : index
    %380 = vector.load %arg4[%c1_191, %c0_192, %c0_193] : memref<2x128x384xf32, #tpu.memory_space<vmem>>, vector<1x128x384xf32>
    %381 = vector.shape_cast %380 : vector<1x128x384xf32> to vector<128x384xf32>
    %cst_194 = arith.constant dense<0.000000e+00> : vector<16x384xf32>
    %382 = tpu.matmul %379, %381, %cst_194 {dimension_numbers = #tpu.dot_dimension_numbers<[1], [0], [0], [1], [0, 0, 1, 1], [], []>} : vector<16x128xf32>, vector<128x384xf32>, vector<16x384xf32> -> vector<16x384xf32>
    %383 = vector.extract_strided_slice %382 {offsets = [0, 0], sizes = [16, 128], strides = [1, 1]} : vector<16x384xf32> to vector<16x128xf32>
    %384 = vector.extract_strided_slice %383 {offsets = [0, 0], sizes = [16, 32], strides = [1, 1]} : vector<16x128xf32> to vector<16x32xf32>
    %385 = vector.extract_strided_slice %384 {offsets = [0, 0], sizes = [16, 16], strides = [1, 1]} : vector<16x32xf32> to vector<16x16xf32>
    %386 = vector.extract_strided_slice %384 {offsets = [0, 16], sizes = [16, 16], strides = [1, 1]} : vector<16x32xf32> to vector<16x16xf32>
    %cst_195 = arith.constant 0.000000e+00 : f32
    %387 = vector.broadcast %cst_195 : f32 to vector<16x16xf32>
    %388 = arith.subf %387, %386 : vector<16x16xf32>
    %389 = tpu.concatenate %388, %385 in 1 : vector<16x16xf32>, vector<16x16xf32> -> vector<16x32xf32>
    %390 = arith.mulf %384, %2 : vector<16x32xf32>
    %391 = arith.mulf %389, %4 : vector<16x32xf32>
    %392 = arith.addf %390, %391 : vector<16x32xf32>
    %393 = vector.extract_strided_slice %383 {offsets = [0, 32], sizes = [16, 32], strides = [1, 1]} : vector<16x128xf32> to vector<16x32xf32>
    %394 = vector.extract_strided_slice %393 {offsets = [0, 0], sizes = [16, 16], strides = [1, 1]} : vector<16x32xf32> to vector<16x16xf32>
    %395 = vector.extract_strided_slice %393 {offsets = [0, 16], sizes = [16, 16], strides = [1, 1]} : vector<16x32xf32> to vector<16x16xf32>
    %cst_196 = arith.constant 0.000000e+00 : f32
    %396 = vector.broadcast %cst_196 : f32 to vector<16x16xf32>
    %397 = arith.subf %396, %395 : vector<16x16xf32>
    %398 = tpu.concatenate %397, %394 in 1 : vector<16x16xf32>, vector<16x16xf32> -> vector<16x32xf32>
    %399 = arith.mulf %393, %2 : vector<16x32xf32>
    %400 = arith.mulf %398, %4 : vector<16x32xf32>
    %401 = arith.addf %399, %400 : vector<16x32xf32>
    %402 = vector.extract_strided_slice %383 {offsets = [0, 64], sizes = [16, 32], strides = [1, 1]} : vector<16x128xf32> to vector<16x32xf32>
    %403 = vector.extract_strided_slice %402 {offsets = [0, 0], sizes = [16, 16], strides = [1, 1]} : vector<16x32xf32> to vector<16x16xf32>
    %404 = vector.extract_strided_slice %402 {offsets = [0, 16], sizes = [16, 16], strides = [1, 1]} : vector<16x32xf32> to vector<16x16xf32>
    %cst_197 = arith.constant 0.000000e+00 : f32
    %405 = vector.broadcast %cst_197 : f32 to vector<16x16xf32>
    %406 = arith.subf %405, %404 : vector<16x16xf32>
    %407 = tpu.concatenate %406, %403 in 1 : vector<16x16xf32>, vector<16x16xf32> -> vector<16x32xf32>
    %408 = arith.mulf %402, %2 : vector<16x32xf32>
    %409 = arith.mulf %407, %4 : vector<16x32xf32>
    %410 = arith.addf %408, %409 : vector<16x32xf32>
    %411 = vector.extract_strided_slice %383 {offsets = [0, 96], sizes = [16, 32], strides = [1, 1]} : vector<16x128xf32> to vector<16x32xf32>
    %412 = vector.extract_strided_slice %411 {offsets = [0, 0], sizes = [16, 16], strides = [1, 1]} : vector<16x32xf32> to vector<16x16xf32>
    %413 = vector.extract_strided_slice %411 {offsets = [0, 16], sizes = [16, 16], strides = [1, 1]} : vector<16x32xf32> to vector<16x16xf32>
    %cst_198 = arith.constant 0.000000e+00 : f32
    %414 = vector.broadcast %cst_198 : f32 to vector<16x16xf32>
    %415 = arith.subf %414, %413 : vector<16x16xf32>
    %416 = tpu.concatenate %415, %412 in 1 : vector<16x16xf32>, vector<16x16xf32> -> vector<16x32xf32>
    %417 = arith.mulf %411, %2 : vector<16x32xf32>
    %418 = arith.mulf %416, %4 : vector<16x32xf32>
    %419 = arith.addf %417, %418 : vector<16x32xf32>
    %420 = tpu.concatenate %392, %401, %410, %419 in 1 : vector<16x32xf32>, vector<16x32xf32>, vector<16x32xf32>, vector<16x32xf32> -> vector<16x128xf32>
    %421 = vector.extract_strided_slice %382 {offsets = [0, 128], sizes = [16, 128], strides = [1, 1]} : vector<16x384xf32> to vector<16x128xf32>
    %422 = vector.extract_strided_slice %421 {offsets = [0, 0], sizes = [16, 32], strides = [1, 1]} : vector<16x128xf32> to vector<16x32xf32>
    %423 = vector.extract_strided_slice %422 {offsets = [0, 0], sizes = [16, 16], strides = [1, 1]} : vector<16x32xf32> to vector<16x16xf32>
    %424 = vector.extract_strided_slice %422 {offsets = [0, 16], sizes = [16, 16], strides = [1, 1]} : vector<16x32xf32> to vector<16x16xf32>
    %cst_199 = arith.constant 0.000000e+00 : f32
    %425 = vector.broadcast %cst_199 : f32 to vector<16x16xf32>
    %426 = arith.subf %425, %424 : vector<16x16xf32>
    %427 = tpu.concatenate %426, %423 in 1 : vector<16x16xf32>, vector<16x16xf32> -> vector<16x32xf32>
    %428 = arith.mulf %422, %2 : vector<16x32xf32>
    %429 = arith.mulf %427, %4 : vector<16x32xf32>
    %430 = arith.addf %428, %429 : vector<16x32xf32>
    %431 = vector.extract_strided_slice %421 {offsets = [0, 32], sizes = [16, 32], strides = [1, 1]} : vector<16x128xf32> to vector<16x32xf32>
    %432 = vector.extract_strided_slice %431 {offsets = [0, 0], sizes = [16, 16], strides = [1, 1]} : vector<16x32xf32> to vector<16x16xf32>
    %433 = vector.extract_strided_slice %431 {offsets = [0, 16], sizes = [16, 16], strides = [1, 1]} : vector<16x32xf32> to vector<16x16xf32>
    %cst_200 = arith.constant 0.000000e+00 : f32
    %434 = vector.broadcast %cst_200 : f32 to vector<16x16xf32>
    %435 = arith.subf %434, %433 : vector<16x16xf32>
    %436 = tpu.concatenate %435, %432 in 1 : vector<16x16xf32>, vector<16x16xf32> -> vector<16x32xf32>
    %437 = arith.mulf %431, %2 : vector<16x32xf32>
    %438 = arith.mulf %436, %4 : vector<16x32xf32>
    %439 = arith.addf %437, %438 : vector<16x32xf32>
    %440 = vector.extract_strided_slice %421 {offsets = [0, 64], sizes = [16, 32], strides = [1, 1]} : vector<16x128xf32> to vector<16x32xf32>
    %441 = vector.extract_strided_slice %440 {offsets = [0, 0], sizes = [16, 16], strides = [1, 1]} : vector<16x32xf32> to vector<16x16xf32>
    %442 = vector.extract_strided_slice %440 {offsets = [0, 16], sizes = [16, 16], strides = [1, 1]} : vector<16x32xf32> to vector<16x16xf32>
    %cst_201 = arith.constant 0.000000e+00 : f32
    %443 = vector.broadcast %cst_201 : f32 to vector<16x16xf32>
    %444 = arith.subf %443, %442 : vector<16x16xf32>
    %445 = tpu.concatenate %444, %441 in 1 : vector<16x16xf32>, vector<16x16xf32> -> vector<16x32xf32>
    %446 = arith.mulf %440, %2 : vector<16x32xf32>
    %447 = arith.mulf %445, %4 : vector<16x32xf32>
    %448 = arith.addf %446, %447 : vector<16x32xf32>
    %449 = vector.extract_strided_slice %421 {offsets = [0, 96], sizes = [16, 32], strides = [1, 1]} : vector<16x128xf32> to vector<16x32xf32>
    %450 = vector.extract_strided_slice %449 {offsets = [0, 0], sizes = [16, 16], strides = [1, 1]} : vector<16x32xf32> to vector<16x16xf32>
    %451 = vector.extract_strided_slice %449 {offsets = [0, 16], sizes = [16, 16], strides = [1, 1]} : vector<16x32xf32> to vector<16x16xf32>
    %cst_202 = arith.constant 0.000000e+00 : f32
    %452 = vector.broadcast %cst_202 : f32 to vector<16x16xf32>
    %453 = arith.subf %452, %451 : vector<16x16xf32>
    %454 = tpu.concatenate %453, %450 in 1 : vector<16x16xf32>, vector<16x16xf32> -> vector<16x32xf32>
    %455 = arith.mulf %449, %2 : vector<16x32xf32>
    %456 = arith.mulf %454, %4 : vector<16x32xf32>
    %457 = arith.addf %455, %456 : vector<16x32xf32>
    %458 = tpu.concatenate %430, %439, %448, %457 in 1 : vector<16x32xf32>, vector<16x32xf32>, vector<16x32xf32>, vector<16x32xf32> -> vector<16x128xf32>
    %459 = vector.extract_strided_slice %382 {offsets = [0, 256], sizes = [16, 128], strides = [1, 1]} : vector<16x384xf32> to vector<16x128xf32>
    %c1_i32_203 = arith.constant 1 : i32
    %c0_i32_204 = arith.constant 0 : i32
    %c0_i32_205 = arith.constant 0 : i32
    %c0_i32_206 = arith.constant 0 : i32
    %c0_i32_207 = arith.constant 0 : i32
    %460 = tpu.memref_slice %arg12[%c1_i32_203, %c0_i32_205, %c0_i32_206, %c0_i32_207] : memref<2x2x32x128xf32, #tpu.memory_space<any>> -> memref<1x2x8x128xf32, #tpu.memory_space<any>>
    %461 = tpu.memref_squeeze %460 : memref<1x2x8x128xf32, #tpu.memory_space<any>> -> memref<2x8x128xf32, #tpu.memory_space<any>>
    %c0_i32_208 = arith.constant 0 : i32
    %c0_i32_209 = arith.constant 0 : i32
    %c0_i32_210 = arith.constant 0 : i32
    %462 = tpu.memref_slice %arg17[%c0_i32_208, %c0_i32_209, %c0_i32_210] : memref<2x16x128xf32, #tpu.memory_space<vmem>> -> memref<2x8x128xf32, #tpu.memory_space<vmem>>
    %463 = tpu.memref_slice %arg19[%c0_i32_204] : memref<4x!tpu.dma_semaphore, #tpu.memory_space<semaphore_mem>> -> memref<1x!tpu.dma_semaphore, #tpu.memory_space<semaphore_mem>>
    %464 = tpu.memref_squeeze %463 : memref<1x!tpu.dma_semaphore, #tpu.memory_space<semaphore_mem>> -> memref<!tpu.dma_semaphore, #tpu.memory_space<semaphore_mem>>
    tpu.wait_dma2 semaphore(%464 : memref<!tpu.dma_semaphore, #tpu.memory_space<semaphore_mem>>) src(%461 : memref<2x8x128xf32, #tpu.memory_space<any>>) dst(%462 : memref<2x8x128xf32, #tpu.memory_space<vmem>>)
    %c1_i32_211 = arith.constant 1 : i32
    %c1_i32_212 = arith.constant 1 : i32
    %c0_i32_213 = arith.constant 0 : i32
    %c0_i32_214 = arith.constant 0 : i32
    %c0_i32_215 = arith.constant 0 : i32
    %465 = tpu.memref_slice %arg13[%c1_i32_211, %c0_i32_213, %c0_i32_214, %c0_i32_215] : memref<2x2x32x128xf32, #tpu.memory_space<any>> -> memref<1x2x8x128xf32, #tpu.memory_space<any>>
    %466 = tpu.memref_squeeze %465 : memref<1x2x8x128xf32, #tpu.memory_space<any>> -> memref<2x8x128xf32, #tpu.memory_space<any>>
    %c0_i32_216 = arith.constant 0 : i32
    %c0_i32_217 = arith.constant 0 : i32
    %c0_i32_218 = arith.constant 0 : i32
    %467 = tpu.memref_slice %arg18[%c0_i32_216, %c0_i32_217, %c0_i32_218] : memref<2x16x128xf32, #tpu.memory_space<vmem>> -> memref<2x8x128xf32, #tpu.memory_space<vmem>>
    %468 = tpu.memref_slice %arg19[%c1_i32_212] : memref<4x!tpu.dma_semaphore, #tpu.memory_space<semaphore_mem>> -> memref<1x!tpu.dma_semaphore, #tpu.memory_space<semaphore_mem>>
    %469 = tpu.memref_squeeze %468 : memref<1x!tpu.dma_semaphore, #tpu.memory_space<semaphore_mem>> -> memref<!tpu.dma_semaphore, #tpu.memory_space<semaphore_mem>>
    tpu.wait_dma2 semaphore(%469 : memref<!tpu.dma_semaphore, #tpu.memory_space<semaphore_mem>>) src(%466 : memref<2x8x128xf32, #tpu.memory_space<any>>) dst(%467 : memref<2x8x128xf32, #tpu.memory_space<vmem>>)
    %470 = vector.shape_cast %458 : vector<16x128xf32> to vector<2x8x128xf32>
    %c0_219 = arith.constant 0 : index
    %c8_220 = arith.constant 8 : index
    %c0_221 = arith.constant 0 : index
    %471 = vector.load %arg17[%c0_219, %c8_220, %c0_221] : memref<2x16x128xf32, #tpu.memory_space<vmem>>, vector<2x8x128xf32>
    tpu.vector_store %arg17[%c0_219, %c8_220, %c0_221], %470 {strides = array<i32>} : memref<2x16x128xf32, #tpu.memory_space<vmem>>, vector<2x8x128xf32>,
    %472 = vector.shape_cast %459 : vector<16x128xf32> to vector<2x8x128xf32>
    %c0_222 = arith.constant 0 : index
    %c8_223 = arith.constant 8 : index
    %c0_224 = arith.constant 0 : index
    %473 = vector.load %arg18[%c0_222, %c8_223, %c0_224] : memref<2x16x128xf32, #tpu.memory_space<vmem>>, vector<2x8x128xf32>
    tpu.vector_store %arg18[%c0_222, %c8_223, %c0_224], %472 {strides = array<i32>} : memref<2x16x128xf32, #tpu.memory_space<vmem>>, vector<2x8x128xf32>,
    %c1_i32_225 = arith.constant 1 : i32
    %c2_i32_226 = arith.constant 2 : i32
    %c0_i32_227 = arith.constant 0 : i32
    %c8_i32_228 = arith.constant 8 : i32
    %c0_i32_229 = arith.constant 0 : i32
    %474 = tpu.memref_slice %arg17[%c0_i32_227, %c8_i32_228, %c0_i32_229] : memref<2x16x128xf32, #tpu.memory_space<vmem>> -> memref<2x8x128xf32, #tpu.memory_space<vmem>>
    %c0_i32_230 = arith.constant 0 : i32
    %c8_i32_231 = arith.constant 8 : i32
    %c0_i32_232 = arith.constant 0 : i32
    %475 = tpu.memref_slice %arg15[%c1_i32_225, %c0_i32_230, %c8_i32_231, %c0_i32_232] : memref<2x2x32x128xf32, #tpu.memory_space<any>> -> memref<1x2x8x128xf32, #tpu.memory_space<any>>
    %476 = tpu.memref_squeeze %475 : memref<1x2x8x128xf32, #tpu.memory_space<any>> -> memref<2x8x128xf32, #tpu.memory_space<any>>
    %477 = tpu.memref_slice %arg19[%c2_i32_226] : memref<4x!tpu.dma_semaphore, #tpu.memory_space<semaphore_mem>> -> memref<1x!tpu.dma_semaphore, #tpu.memory_space<semaphore_mem>>
    %478 = tpu.memref_squeeze %477 : memref<1x!tpu.dma_semaphore, #tpu.memory_space<semaphore_mem>> -> memref<!tpu.dma_semaphore, #tpu.memory_space<semaphore_mem>>
    tpu.enqueue_dma source(%474 : memref<2x8x128xf32, #tpu.memory_space<vmem>>) target(%476 : memref<2x8x128xf32, #tpu.memory_space<any>>) target_semaphore(%478 : memref<!tpu.dma_semaphore, #tpu.memory_space<semaphore_mem>>)
    %c1_i32_233 = arith.constant 1 : i32
    %c3_i32_234 = arith.constant 3 : i32
    %c0_i32_235 = arith.constant 0 : i32
    %c8_i32_236 = arith.constant 8 : i32
    %c0_i32_237 = arith.constant 0 : i32
    %479 = tpu.memref_slice %arg18[%c0_i32_235, %c8_i32_236, %c0_i32_237] : memref<2x16x128xf32, #tpu.memory_space<vmem>> -> memref<2x8x128xf32, #tpu.memory_space<vmem>>
    %c0_i32_238 = arith.constant 0 : i32
    %c8_i32_239 = arith.constant 8 : i32
    %c0_i32_240 = arith.constant 0 : i32
    %480 = tpu.memref_slice %arg16[%c1_i32_233, %c0_i32_238, %c8_i32_239, %c0_i32_240] : memref<2x2x32x128xf32, #tpu.memory_space<any>> -> memref<1x2x8x128xf32, #tpu.memory_space<any>>
    %481 = tpu.memref_squeeze %480 : memref<1x2x8x128xf32, #tpu.memory_space<any>> -> memref<2x8x128xf32, #tpu.memory_space<any>>
    %482 = tpu.memref_slice %arg19[%c3_i32_234] : memref<4x!tpu.dma_semaphore, #tpu.memory_space<semaphore_mem>> -> memref<1x!tpu.dma_semaphore, #tpu.memory_space<semaphore_mem>>
    %483 = tpu.memref_squeeze %482 : memref<1x!tpu.dma_semaphore, #tpu.memory_space<semaphore_mem>> -> memref<!tpu.dma_semaphore, #tpu.memory_space<semaphore_mem>>
    tpu.enqueue_dma source(%479 : memref<2x8x128xf32, #tpu.memory_space<vmem>>) target(%481 : memref<2x8x128xf32, #tpu.memory_space<any>>) target_semaphore(%483 : memref<!tpu.dma_semaphore, #tpu.memory_space<semaphore_mem>>)
    %484 = vector.extract_strided_slice %420 {offsets = [0, 0], sizes = [8, 128], strides = [1, 1]} : vector<16x128xf32> to vector<8x128xf32>
    %c0_241 = arith.constant 0 : index
    %c0_242 = arith.constant 0 : index
    %c0_243 = arith.constant 0 : index
    %485 = vector.load %arg17[%c0_241, %c0_242, %c0_243] : memref<2x16x128xf32, #tpu.memory_space<vmem>>, vector<1x16x128xf32>
    %486 = vector.shape_cast %485 : vector<1x16x128xf32> to vector<16x128xf32>
    %c0_244 = arith.constant 0 : index
    %c0_245 = arith.constant 0 : index
    %c0_246 = arith.constant 0 : index
    %487 = vector.load %arg18[%c0_244, %c0_245, %c0_246] : memref<2x16x128xf32, #tpu.memory_space<vmem>>, vector<1x16x128xf32>
    %488 = vector.shape_cast %487 : vector<1x16x128xf32> to vector<16x128xf32>
    %489 = vector.extract_strided_slice %484 {offsets = [0, 0], sizes = [8, 32], strides = [1, 1]} : vector<8x128xf32> to vector<8x32xf32>
    %490 = vector.extract_strided_slice %486 {offsets = [0, 0], sizes = [16, 32], strides = [1, 1]} : vector<16x128xf32> to vector<16x32xf32>
    %491 = tpu.transpose %490, [1, 0] : vector<16x32xf32> -> vector<32x16xf32>
    %cst_247 = arith.constant dense<0.000000e+00> : vector<8x16xf32>
    %492 = tpu.matmul %489, %491, %cst_247 {dimension_numbers = #tpu.dot_dimension_numbers<[1], [0], [0], [1], [0, 0, 1, 1], [], []>} : vector<8x32xf32>, vector<32x16xf32>, vector<8x16xf32> -> vector<8x16xf32>
    %cst_248 = arith.constant 0.176776692 : f32
    %493 = vector.broadcast %cst_248 : f32 to vector<8x16xf32>
    %494 = arith.mulf %492, %493 : vector<8x16xf32>
    %cst_249 = arith.constant -1.000000e+30 : f32
    %495 = vector.broadcast %cst_249 : f32 to vector<8x16xf32>
    %496 = arith.select %9, %494, %495 : vector<8x16xi1>, vector<8x16xf32>
    %cst_250 = arith.constant dense<0xFF800000> : vector<8xf32>
    %497 = vector.multi_reduction <maximumf>, %496, %cst_250 [1] : vector<8x16xf32> to vector<8xf32>
    %498 = vector.shape_cast %497 : vector<8xf32> to vector<8x1xf32>
    %499 = vector.broadcast %498 : vector<8x1xf32> to vector<8x16xf32>
    %500 = arith.subf %496, %499 : vector<8x16xf32>
    %501 = math.exp %500 : vector<8x16xf32>
    %cst_251 = arith.constant dense<0.000000e+00> : vector<8xf32>
    %502 = vector.multi_reduction <add>, %501, %cst_251 [1] : vector<8x16xf32> to vector<8xf32>
    %503 = vector.shape_cast %502 : vector<8xf32> to vector<8x1xf32>
    %504 = tpu.reciprocal %503 {approx = true} : vector<8x1xf32> -> vector<8x1xf32>
    %505 = vector.broadcast %504 : vector<8x1xf32> to vector<8x16xf32>
    %506 = arith.mulf %501, %505 : vector<8x16xf32>
    %507 = vector.extract_strided_slice %488 {offsets = [0, 0], sizes = [16, 32], strides = [1, 1]} : vector<16x128xf32> to vector<16x32xf32>
    %cst_252 = arith.constant dense<0.000000e+00> : vector<8x32xf32>
    %508 = tpu.matmul %506, %507, %cst_252 {dimension_numbers = #tpu.dot_dimension_numbers<[1], [0], [0], [1], [0, 0, 1, 1], [], []>} : vector<8x16xf32>, vector<16x32xf32>, vector<8x32xf32> -> vector<8x32xf32>
    %509 = vector.extract_strided_slice %484 {offsets = [0, 32], sizes = [8, 32], strides = [1, 1]} : vector<8x128xf32> to vector<8x32xf32>
    %510 = vector.extract_strided_slice %486 {offsets = [0, 32], sizes = [16, 32], strides = [1, 1]} : vector<16x128xf32> to vector<16x32xf32>
    %511 = tpu.transpose %510, [1, 0] : vector<16x32xf32> -> vector<32x16xf32>
    %cst_253 = arith.constant dense<0.000000e+00> : vector<8x16xf32>
    %512 = tpu.matmul %509, %511, %cst_253 {dimension_numbers = #tpu.dot_dimension_numbers<[1], [0], [0], [1], [0, 0, 1, 1], [], []>} : vector<8x32xf32>, vector<32x16xf32>, vector<8x16xf32> -> vector<8x16xf32>
    %cst_254 = arith.constant 0.176776692 : f32
    %513 = vector.broadcast %cst_254 : f32 to vector<8x16xf32>
    %514 = arith.mulf %512, %513 : vector<8x16xf32>
    %cst_255 = arith.constant -1.000000e+30 : f32
    %515 = vector.broadcast %cst_255 : f32 to vector<8x16xf32>
    %516 = arith.select %9, %514, %515 : vector<8x16xi1>, vector<8x16xf32>
    %cst_256 = arith.constant dense<0xFF800000> : vector<8xf32>
    %517 = vector.multi_reduction <maximumf>, %516, %cst_256 [1] : vector<8x16xf32> to vector<8xf32>
    %518 = vector.shape_cast %517 : vector<8xf32> to vector<8x1xf32>
    %519 = vector.broadcast %518 : vector<8x1xf32> to vector<8x16xf32>
    %520 = arith.subf %516, %519 : vector<8x16xf32>
    %521 = math.exp %520 : vector<8x16xf32>
    %cst_257 = arith.constant dense<0.000000e+00> : vector<8xf32>
    %522 = vector.multi_reduction <add>, %521, %cst_257 [1] : vector<8x16xf32> to vector<8xf32>
    %523 = vector.shape_cast %522 : vector<8xf32> to vector<8x1xf32>
    %524 = tpu.reciprocal %523 {approx = true} : vector<8x1xf32> -> vector<8x1xf32>
    %525 = vector.broadcast %524 : vector<8x1xf32> to vector<8x16xf32>
    %526 = arith.mulf %521, %525 : vector<8x16xf32>
    %527 = vector.extract_strided_slice %488 {offsets = [0, 32], sizes = [16, 32], strides = [1, 1]} : vector<16x128xf32> to vector<16x32xf32>
    %cst_258 = arith.constant dense<0.000000e+00> : vector<8x32xf32>
    %528 = tpu.matmul %526, %527, %cst_258 {dimension_numbers = #tpu.dot_dimension_numbers<[1], [0], [0], [1], [0, 0, 1, 1], [], []>} : vector<8x16xf32>, vector<16x32xf32>, vector<8x32xf32> -> vector<8x32xf32>
    %529 = vector.extract_strided_slice %484 {offsets = [0, 64], sizes = [8, 32], strides = [1, 1]} : vector<8x128xf32> to vector<8x32xf32>
    %530 = vector.extract_strided_slice %486 {offsets = [0, 64], sizes = [16, 32], strides = [1, 1]} : vector<16x128xf32> to vector<16x32xf32>
    %531 = tpu.transpose %530, [1, 0] : vector<16x32xf32> -> vector<32x16xf32>
    %cst_259 = arith.constant dense<0.000000e+00> : vector<8x16xf32>
    %532 = tpu.matmul %529, %531, %cst_259 {dimension_numbers = #tpu.dot_dimension_numbers<[1], [0], [0], [1], [0, 0, 1, 1], [], []>} : vector<8x32xf32>, vector<32x16xf32>, vector<8x16xf32> -> vector<8x16xf32>
    %cst_260 = arith.constant 0.176776692 : f32
    %533 = vector.broadcast %cst_260 : f32 to vector<8x16xf32>
    %534 = arith.mulf %532, %533 : vector<8x16xf32>
    %cst_261 = arith.constant -1.000000e+30 : f32
    %535 = vector.broadcast %cst_261 : f32 to vector<8x16xf32>
    %536 = arith.select %9, %534, %535 : vector<8x16xi1>, vector<8x16xf32>
    %cst_262 = arith.constant dense<0xFF800000> : vector<8xf32>
    %537 = vector.multi_reduction <maximumf>, %536, %cst_262 [1] : vector<8x16xf32> to vector<8xf32>
    %538 = vector.shape_cast %537 : vector<8xf32> to vector<8x1xf32>
    %539 = vector.broadcast %538 : vector<8x1xf32> to vector<8x16xf32>
    %540 = arith.subf %536, %539 : vector<8x16xf32>
    %541 = math.exp %540 : vector<8x16xf32>
    %cst_263 = arith.constant dense<0.000000e+00> : vector<8xf32>
    %542 = vector.multi_reduction <add>, %541, %cst_263 [1] : vector<8x16xf32> to vector<8xf32>
    %543 = vector.shape_cast %542 : vector<8xf32> to vector<8x1xf32>
    %544 = tpu.reciprocal %543 {approx = true} : vector<8x1xf32> -> vector<8x1xf32>
    %545 = vector.broadcast %544 : vector<8x1xf32> to vector<8x16xf32>
    %546 = arith.mulf %541, %545 : vector<8x16xf32>
    %547 = vector.extract_strided_slice %488 {offsets = [0, 64], sizes = [16, 32], strides = [1, 1]} : vector<16x128xf32> to vector<16x32xf32>
    %cst_264 = arith.constant dense<0.000000e+00> : vector<8x32xf32>
    %548 = tpu.matmul %546, %547, %cst_264 {dimension_numbers = #tpu.dot_dimension_numbers<[1], [0], [0], [1], [0, 0, 1, 1], [], []>} : vector<8x16xf32>, vector<16x32xf32>, vector<8x32xf32> -> vector<8x32xf32>
    %549 = vector.extract_strided_slice %484 {offsets = [0, 96], sizes = [8, 32], strides = [1, 1]} : vector<8x128xf32> to vector<8x32xf32>
    %550 = vector.extract_strided_slice %486 {offsets = [0, 96], sizes = [16, 32], strides = [1, 1]} : vector<16x128xf32> to vector<16x32xf32>
    %551 = tpu.transpose %550, [1, 0] : vector<16x32xf32> -> vector<32x16xf32>
    %cst_265 = arith.constant dense<0.000000e+00> : vector<8x16xf32>
    %552 = tpu.matmul %549, %551, %cst_265 {dimension_numbers = #tpu.dot_dimension_numbers<[1], [0], [0], [1], [0, 0, 1, 1], [], []>} : vector<8x32xf32>, vector<32x16xf32>, vector<8x16xf32> -> vector<8x16xf32>
    %cst_266 = arith.constant 0.176776692 : f32
    %553 = vector.broadcast %cst_266 : f32 to vector<8x16xf32>
    %554 = arith.mulf %552, %553 : vector<8x16xf32>
    %cst_267 = arith.constant -1.000000e+30 : f32
    %555 = vector.broadcast %cst_267 : f32 to vector<8x16xf32>
    %556 = arith.select %9, %554, %555 : vector<8x16xi1>, vector<8x16xf32>
    %cst_268 = arith.constant dense<0xFF800000> : vector<8xf32>
    %557 = vector.multi_reduction <maximumf>, %556, %cst_268 [1] : vector<8x16xf32> to vector<8xf32>
    %558 = vector.shape_cast %557 : vector<8xf32> to vector<8x1xf32>
    %559 = vector.broadcast %558 : vector<8x1xf32> to vector<8x16xf32>
    %560 = arith.subf %556, %559 : vector<8x16xf32>
    %561 = math.exp %560 : vector<8x16xf32>
    %cst_269 = arith.constant dense<0.000000e+00> : vector<8xf32>
    %562 = vector.multi_reduction <add>, %561, %cst_269 [1] : vector<8x16xf32> to vector<8xf32>
    %563 = vector.shape_cast %562 : vector<8xf32> to vector<8x1xf32>
    %564 = tpu.reciprocal %563 {approx = true} : vector<8x1xf32> -> vector<8x1xf32>
    %565 = vector.broadcast %564 : vector<8x1xf32> to vector<8x16xf32>
    %566 = arith.mulf %561, %565 : vector<8x16xf32>
    %567 = vector.extract_strided_slice %488 {offsets = [0, 96], sizes = [16, 32], strides = [1, 1]} : vector<16x128xf32> to vector<16x32xf32>
    %cst_270 = arith.constant dense<0.000000e+00> : vector<8x32xf32>
    %568 = tpu.matmul %566, %567, %cst_270 {dimension_numbers = #tpu.dot_dimension_numbers<[1], [0], [0], [1], [0, 0, 1, 1], [], []>} : vector<8x16xf32>, vector<16x32xf32>, vector<8x32xf32> -> vector<8x32xf32>
    %569 = tpu.concatenate %508, %528, %548, %568 in 1 : vector<8x32xf32>, vector<8x32xf32>, vector<8x32xf32>, vector<8x32xf32> -> vector<8x128xf32>
    %570 = vector.extract_strided_slice %420 {offsets = [8, 0], sizes = [8, 128], strides = [1, 1]} : vector<16x128xf32> to vector<8x128xf32>
    %c1_271 = arith.constant 1 : index
    %c0_272 = arith.constant 0 : index
    %c0_273 = arith.constant 0 : index
    %571 = vector.load %arg17[%c1_271, %c0_272, %c0_273] : memref<2x16x128xf32, #tpu.memory_space<vmem>>, vector<1x16x128xf32>
    %572 = vector.shape_cast %571 : vector<1x16x128xf32> to vector<16x128xf32>
    %c1_274 = arith.constant 1 : index
    %c0_275 = arith.constant 0 : index
    %c0_276 = arith.constant 0 : index
    %573 = vector.load %arg18[%c1_274, %c0_275, %c0_276] : memref<2x16x128xf32, #tpu.memory_space<vmem>>, vector<1x16x128xf32>
    %574 = vector.shape_cast %573 : vector<1x16x128xf32> to vector<16x128xf32>
    %575 = vector.extract_strided_slice %570 {offsets = [0, 0], sizes = [8, 32], strides = [1, 1]} : vector<8x128xf32> to vector<8x32xf32>
    %576 = vector.extract_strided_slice %572 {offsets = [0, 0], sizes = [16, 32], strides = [1, 1]} : vector<16x128xf32> to vector<16x32xf32>
    %577 = tpu.transpose %576, [1, 0] : vector<16x32xf32> -> vector<32x16xf32>
    %cst_277 = arith.constant dense<0.000000e+00> : vector<8x16xf32>
    %578 = tpu.matmul %575, %577, %cst_277 {dimension_numbers = #tpu.dot_dimension_numbers<[1], [0], [0], [1], [0, 0, 1, 1], [], []>} : vector<8x32xf32>, vector<32x16xf32>, vector<8x16xf32> -> vector<8x16xf32>
    %cst_278 = arith.constant 0.176776692 : f32
    %579 = vector.broadcast %cst_278 : f32 to vector<8x16xf32>
    %580 = arith.mulf %578, %579 : vector<8x16xf32>
    %cst_279 = arith.constant -1.000000e+30 : f32
    %581 = vector.broadcast %cst_279 : f32 to vector<8x16xf32>
    %582 = arith.select %9, %580, %581 : vector<8x16xi1>, vector<8x16xf32>
    %cst_280 = arith.constant dense<0xFF800000> : vector<8xf32>
    %583 = vector.multi_reduction <maximumf>, %582, %cst_280 [1] : vector<8x16xf32> to vector<8xf32>
    %584 = vector.shape_cast %583 : vector<8xf32> to vector<8x1xf32>
    %585 = vector.broadcast %584 : vector<8x1xf32> to vector<8x16xf32>
    %586 = arith.subf %582, %585 : vector<8x16xf32>
    %587 = math.exp %586 : vector<8x16xf32>
    %cst_281 = arith.constant dense<0.000000e+00> : vector<8xf32>
    %588 = vector.multi_reduction <add>, %587, %cst_281 [1] : vector<8x16xf32> to vector<8xf32>
    %589 = vector.shape_cast %588 : vector<8xf32> to vector<8x1xf32>
    %590 = tpu.reciprocal %589 {approx = true} : vector<8x1xf32> -> vector<8x1xf32>
    %591 = vector.broadcast %590 : vector<8x1xf32> to vector<8x16xf32>
    %592 = arith.mulf %587, %591 : vector<8x16xf32>
    %593 = vector.extract_strided_slice %574 {offsets = [0, 0], sizes = [16, 32], strides = [1, 1]} : vector<16x128xf32> to vector<16x32xf32>
    %cst_282 = arith.constant dense<0.000000e+00> : vector<8x32xf32>
    %594 = tpu.matmul %592, %593, %cst_282 {dimension_numbers = #tpu.dot_dimension_numbers<[1], [0], [0], [1], [0, 0, 1, 1], [], []>} : vector<8x16xf32>, vector<16x32xf32>, vector<8x32xf32> -> vector<8x32xf32>
    %595 = vector.extract_strided_slice %570 {offsets = [0, 32], sizes = [8, 32], strides = [1, 1]} : vector<8x128xf32> to vector<8x32xf32>
    %596 = vector.extract_strided_slice %572 {offsets = [0, 32], sizes = [16, 32], strides = [1, 1]} : vector<16x128xf32> to vector<16x32xf32>
    %597 = tpu.transpose %596, [1, 0] : vector<16x32xf32> -> vector<32x16xf32>
    %cst_283 = arith.constant dense<0.000000e+00> : vector<8x16xf32>
    %598 = tpu.matmul %595, %597, %cst_283 {dimension_numbers = #tpu.dot_dimension_numbers<[1], [0], [0], [1], [0, 0, 1, 1], [], []>} : vector<8x32xf32>, vector<32x16xf32>, vector<8x16xf32> -> vector<8x16xf32>
    %cst_284 = arith.constant 0.176776692 : f32
    %599 = vector.broadcast %cst_284 : f32 to vector<8x16xf32>
    %600 = arith.mulf %598, %599 : vector<8x16xf32>
    %cst_285 = arith.constant -1.000000e+30 : f32
    %601 = vector.broadcast %cst_285 : f32 to vector<8x16xf32>
    %602 = arith.select %9, %600, %601 : vector<8x16xi1>, vector<8x16xf32>
    %cst_286 = arith.constant dense<0xFF800000> : vector<8xf32>
    %603 = vector.multi_reduction <maximumf>, %602, %cst_286 [1] : vector<8x16xf32> to vector<8xf32>
    %604 = vector.shape_cast %603 : vector<8xf32> to vector<8x1xf32>
    %605 = vector.broadcast %604 : vector<8x1xf32> to vector<8x16xf32>
    %606 = arith.subf %602, %605 : vector<8x16xf32>
    %607 = math.exp %606 : vector<8x16xf32>
    %cst_287 = arith.constant dense<0.000000e+00> : vector<8xf32>
    %608 = vector.multi_reduction <add>, %607, %cst_287 [1] : vector<8x16xf32> to vector<8xf32>
    %609 = vector.shape_cast %608 : vector<8xf32> to vector<8x1xf32>
    %610 = tpu.reciprocal %609 {approx = true} : vector<8x1xf32> -> vector<8x1xf32>
    %611 = vector.broadcast %610 : vector<8x1xf32> to vector<8x16xf32>
    %612 = arith.mulf %607, %611 : vector<8x16xf32>
    %613 = vector.extract_strided_slice %574 {offsets = [0, 32], sizes = [16, 32], strides = [1, 1]} : vector<16x128xf32> to vector<16x32xf32>
    %cst_288 = arith.constant dense<0.000000e+00> : vector<8x32xf32>
    %614 = tpu.matmul %612, %613, %cst_288 {dimension_numbers = #tpu.dot_dimension_numbers<[1], [0], [0], [1], [0, 0, 1, 1], [], []>} : vector<8x16xf32>, vector<16x32xf32>, vector<8x32xf32> -> vector<8x32xf32>
    %615 = vector.extract_strided_slice %570 {offsets = [0, 64], sizes = [8, 32], strides = [1, 1]} : vector<8x128xf32> to vector<8x32xf32>
    %616 = vector.extract_strided_slice %572 {offsets = [0, 64], sizes = [16, 32], strides = [1, 1]} : vector<16x128xf32> to vector<16x32xf32>
    %617 = tpu.transpose %616, [1, 0] : vector<16x32xf32> -> vector<32x16xf32>
    %cst_289 = arith.constant dense<0.000000e+00> : vector<8x16xf32>
    %618 = tpu.matmul %615, %617, %cst_289 {dimension_numbers = #tpu.dot_dimension_numbers<[1], [0], [0], [1], [0, 0, 1, 1], [], []>} : vector<8x32xf32>, vector<32x16xf32>, vector<8x16xf32> -> vector<8x16xf32>
    %cst_290 = arith.constant 0.176776692 : f32
    %619 = vector.broadcast %cst_290 : f32 to vector<8x16xf32>
    %620 = arith.mulf %618, %619 : vector<8x16xf32>
    %cst_291 = arith.constant -1.000000e+30 : f32
    %621 = vector.broadcast %cst_291 : f32 to vector<8x16xf32>
    %622 = arith.select %9, %620, %621 : vector<8x16xi1>, vector<8x16xf32>
    %cst_292 = arith.constant dense<0xFF800000> : vector<8xf32>
    %623 = vector.multi_reduction <maximumf>, %622, %cst_292 [1] : vector<8x16xf32> to vector<8xf32>
    %624 = vector.shape_cast %623 : vector<8xf32> to vector<8x1xf32>
    %625 = vector.broadcast %624 : vector<8x1xf32> to vector<8x16xf32>
    %626 = arith.subf %622, %625 : vector<8x16xf32>
    %627 = math.exp %626 : vector<8x16xf32>
    %cst_293 = arith.constant dense<0.000000e+00> : vector<8xf32>
    %628 = vector.multi_reduction <add>, %627, %cst_293 [1] : vector<8x16xf32> to vector<8xf32>
    %629 = vector.shape_cast %628 : vector<8xf32> to vector<8x1xf32>
    %630 = tpu.reciprocal %629 {approx = true} : vector<8x1xf32> -> vector<8x1xf32>
    %631 = vector.broadcast %630 : vector<8x1xf32> to vector<8x16xf32>
    %632 = arith.mulf %627, %631 : vector<8x16xf32>
    %633 = vector.extract_strided_slice %574 {offsets = [0, 64], sizes = [16, 32], strides = [1, 1]} : vector<16x128xf32> to vector<16x32xf32>
    %cst_294 = arith.constant dense<0.000000e+00> : vector<8x32xf32>
    %634 = tpu.matmul %632, %633, %cst_294 {dimension_numbers = #tpu.dot_dimension_numbers<[1], [0], [0], [1], [0, 0, 1, 1], [], []>} : vector<8x16xf32>, vector<16x32xf32>, vector<8x32xf32> -> vector<8x32xf32>
    %635 = vector.extract_strided_slice %570 {offsets = [0, 96], sizes = [8, 32], strides = [1, 1]} : vector<8x128xf32> to vector<8x32xf32>
    %636 = vector.extract_strided_slice %572 {offsets = [0, 96], sizes = [16, 32], strides = [1, 1]} : vector<16x128xf32> to vector<16x32xf32>
    %637 = tpu.transpose %636, [1, 0] : vector<16x32xf32> -> vector<32x16xf32>
    %cst_295 = arith.constant dense<0.000000e+00> : vector<8x16xf32>
    %638 = tpu.matmul %635, %637, %cst_295 {dimension_numbers = #tpu.dot_dimension_numbers<[1], [0], [0], [1], [0, 0, 1, 1], [], []>} : vector<8x32xf32>, vector<32x16xf32>, vector<8x16xf32> -> vector<8x16xf32>
    %cst_296 = arith.constant 0.176776692 : f32
    %639 = vector.broadcast %cst_296 : f32 to vector<8x16xf32>
    %640 = arith.mulf %638, %639 : vector<8x16xf32>
    %cst_297 = arith.constant -1.000000e+30 : f32
    %641 = vector.broadcast %cst_297 : f32 to vector<8x16xf32>
    %642 = arith.select %9, %640, %641 : vector<8x16xi1>, vector<8x16xf32>
    %cst_298 = arith.constant dense<0xFF800000> : vector<8xf32>
    %643 = vector.multi_reduction <maximumf>, %642, %cst_298 [1] : vector<8x16xf32> to vector<8xf32>
    %644 = vector.shape_cast %643 : vector<8xf32> to vector<8x1xf32>
    %645 = vector.broadcast %644 : vector<8x1xf32> to vector<8x16xf32>
    %646 = arith.subf %642, %645 : vector<8x16xf32>
    %647 = math.exp %646 : vector<8x16xf32>
    %cst_299 = arith.constant dense<0.000000e+00> : vector<8xf32>
    %648 = vector.multi_reduction <add>, %647, %cst_299 [1] : vector<8x16xf32> to vector<8xf32>
    %649 = vector.shape_cast %648 : vector<8xf32> to vector<8x1xf32>
    %650 = tpu.reciprocal %649 {approx = true} : vector<8x1xf32> -> vector<8x1xf32>
    %651 = vector.broadcast %650 : vector<8x1xf32> to vector<8x16xf32>
    %652 = arith.mulf %647, %651 : vector<8x16xf32>
    %653 = vector.extract_strided_slice %574 {offsets = [0, 96], sizes = [16, 32], strides = [1, 1]} : vector<16x128xf32> to vector<16x32xf32>
    %cst_300 = arith.constant dense<0.000000e+00> : vector<8x32xf32>
    %654 = tpu.matmul %652, %653, %cst_300 {dimension_numbers = #tpu.dot_dimension_numbers<[1], [0], [0], [1], [0, 0, 1, 1], [], []>} : vector<8x16xf32>, vector<16x32xf32>, vector<8x32xf32> -> vector<8x32xf32>
    %655 = tpu.concatenate %594, %614, %634, %654 in 1 : vector<8x32xf32>, vector<8x32xf32>, vector<8x32xf32>, vector<8x32xf32> -> vector<8x128xf32>
    %656 = tpu.concatenate %569, %655 in 0 : vector<8x128xf32>, vector<8x128xf32> -> vector<16x128xf32>
    %c1_301 = arith.constant 1 : index
    %c0_302 = arith.constant 0 : index
    %c0_303 = arith.constant 0 : index
    %657 = vector.load %arg5[%c1_301, %c0_302, %c0_303] : memref<2x128x128xf32, #tpu.memory_space<vmem>>, vector<1x128x128xf32>
    %658 = vector.shape_cast %657 : vector<1x128x128xf32> to vector<128x128xf32>
    %cst_304 = arith.constant dense<0.000000e+00> : vector<16x128xf32>
    %659 = tpu.matmul %656, %658, %cst_304 {dimension_numbers = #tpu.dot_dimension_numbers<[1], [0], [0], [1], [0, 0, 1, 1], [], []>} : vector<16x128xf32>, vector<128x128xf32>, vector<16x128xf32> -> vector<16x128xf32>
    %660 = arith.addf %345, %659 : vector<16x128xf32>
    %c1_305 = arith.constant 1 : index
    %c0_306 = arith.constant 0 : index
    %c0_307 = arith.constant 0 : index
    %661 = vector.load %arg6[%c1_305, %c0_306, %c0_307] : memref<2x1x128xf32, #tpu.memory_space<vmem>>, vector<1x1x128xf32>
    %662 = vector.shape_cast %661 : vector<1x1x128xf32> to vector<1x128xf32>
    %663 = arith.mulf %660, %660 : vector<16x128xf32>
    %cst_308 = arith.constant dense<0.000000e+00> : vector<16xf32>
    %664 = vector.multi_reduction <add>, %663, %cst_308 [1] : vector<16x128xf32> to vector<16xf32>
    %665 = vector.shape_cast %664 : vector<16xf32> to vector<16x1xf32>
    %cst_309 = arith.constant 1.280000e+02 : f32
    %666 = vector.broadcast %cst_309 : f32 to vector<16x1xf32>
    %667 = arith.divf %665, %666 : vector<16x1xf32>
    %cst_310 = arith.constant 9.99999997E-7 : f32
    %668 = vector.broadcast %cst_310 : f32 to vector<16x1xf32>
    %669 = arith.addf %667, %668 : vector<16x1xf32>
    %670 = math.rsqrt %669 : vector<16x1xf32>
    %671 = vector.broadcast %670 : vector<16x1xf32> to vector<16x128xf32>
    %672 = arith.mulf %660, %671 : vector<16x128xf32>
    %673 = vector.broadcast %662 : vector<1x128xf32> to vector<16x128xf32>
    %674 = arith.mulf %672, %673 : vector<16x128xf32>
    %c1_311 = arith.constant 1 : index
    %c0_312 = arith.constant 0 : index
    %c0_313 = arith.constant 0 : index
    %675 = vector.load %arg7[%c1_311, %c0_312, %c0_313] : memref<2x128x256xf32, #tpu.memory_space<vmem>>, vector<1x128x256xf32>
    %676 = vector.shape_cast %675 : vector<1x128x256xf32> to vector<128x256xf32>
    %cst_314 = arith.constant dense<0.000000e+00> : vector<16x256xf32>
    %677 = tpu.matmul %674, %676, %cst_314 {dimension_numbers = #tpu.dot_dimension_numbers<[1], [0], [0], [1], [0, 0, 1, 1], [], []>} : vector<16x128xf32>, vector<128x256xf32>, vector<16x256xf32> -> vector<16x256xf32>
    %c1_315 = arith.constant 1 : index
    %c0_316 = arith.constant 0 : index
    %c0_317 = arith.constant 0 : index
    %678 = vector.load %arg8[%c1_315, %c0_316, %c0_317] : memref<2x128x256xf32, #tpu.memory_space<vmem>>, vector<1x128x256xf32>
    %679 = vector.shape_cast %678 : vector<1x128x256xf32> to vector<128x256xf32>
    %cst_318 = arith.constant dense<0.000000e+00> : vector<16x256xf32>
    %680 = tpu.matmul %674, %679, %cst_318 {dimension_numbers = #tpu.dot_dimension_numbers<[1], [0], [0], [1], [0, 0, 1, 1], [], []>} : vector<16x128xf32>, vector<128x256xf32>, vector<16x256xf32> -> vector<16x256xf32>
    %681 = arith.negf %677 : vector<16x256xf32>
    %682 = math.exp %681 : vector<16x256xf32>
    %cst_319 = arith.constant 1.000000e+00 : f32
    %683 = vector.broadcast %cst_319 : f32 to vector<16x256xf32>
    %684 = arith.addf %683, %682 : vector<16x256xf32>
    %685 = arith.divf %683, %684 : vector<16x256xf32>
    %686 = arith.mulf %677, %685 : vector<16x256xf32>
    %687 = arith.mulf %686, %680 : vector<16x256xf32>
    %c1_320 = arith.constant 1 : index
    %c0_321 = arith.constant 0 : index
    %c0_322 = arith.constant 0 : index
    %688 = vector.load %arg9[%c1_320, %c0_321, %c0_322] : memref<2x256x128xf32, #tpu.memory_space<vmem>>, vector<1x256x128xf32>
    %689 = vector.shape_cast %688 : vector<1x256x128xf32> to vector<256x128xf32>
    %cst_323 = arith.constant dense<0.000000e+00> : vector<16x128xf32>
    %690 = tpu.matmul %687, %689, %cst_323 {dimension_numbers = #tpu.dot_dimension_numbers<[1], [0], [0], [1], [0, 0, 1, 1], [], []>} : vector<16x256xf32>, vector<256x128xf32>, vector<16x128xf32> -> vector<16x128xf32>
    %691 = arith.addf %660, %690 : vector<16x128xf32>
    %c1_i32_324 = arith.constant 1 : i32
    %c2_i32_325 = arith.constant 2 : i32
    %c0_i32_326 = arith.constant 0 : i32
    %c8_i32_327 = arith.constant 8 : i32
    %c0_i32_328 = arith.constant 0 : i32
    %692 = tpu.memref_slice %arg17[%c0_i32_326, %c8_i32_327, %c0_i32_328] : memref<2x16x128xf32, #tpu.memory_space<vmem>> -> memref<2x8x128xf32, #tpu.memory_space<vmem>>
    %c0_i32_329 = arith.constant 0 : i32
    %c8_i32_330 = arith.constant 8 : i32
    %c0_i32_331 = arith.constant 0 : i32
    %693 = tpu.memref_slice %arg15[%c1_i32_324, %c0_i32_329, %c8_i32_330, %c0_i32_331] : memref<2x2x32x128xf32, #tpu.memory_space<any>> -> memref<1x2x8x128xf32, #tpu.memory_space<any>>
    %694 = tpu.memref_squeeze %693 : memref<1x2x8x128xf32, #tpu.memory_space<any>> -> memref<2x8x128xf32, #tpu.memory_space<any>>
    %695 = tpu.memref_slice %arg19[%c2_i32_325] : memref<4x!tpu.dma_semaphore, #tpu.memory_space<semaphore_mem>> -> memref<1x!tpu.dma_semaphore, #tpu.memory_space<semaphore_mem>>
    %696 = tpu.memref_squeeze %695 : memref<1x!tpu.dma_semaphore, #tpu.memory_space<semaphore_mem>> -> memref<!tpu.dma_semaphore, #tpu.memory_space<semaphore_mem>>
    tpu.wait_dma2 semaphore(%696 : memref<!tpu.dma_semaphore, #tpu.memory_space<semaphore_mem>>) src(%692 : memref<2x8x128xf32, #tpu.memory_space<vmem>>) dst(%694 : memref<2x8x128xf32, #tpu.memory_space<any>>)
    %c1_i32_332 = arith.constant 1 : i32
    %c3_i32_333 = arith.constant 3 : i32
    %c0_i32_334 = arith.constant 0 : i32
    %c8_i32_335 = arith.constant 8 : i32
    %c0_i32_336 = arith.constant 0 : i32
    %697 = tpu.memref_slice %arg18[%c0_i32_334, %c8_i32_335, %c0_i32_336] : memref<2x16x128xf32, #tpu.memory_space<vmem>> -> memref<2x8x128xf32, #tpu.memory_space<vmem>>
    %c0_i32_337 = arith.constant 0 : i32
    %c8_i32_338 = arith.constant 8 : i32
    %c0_i32_339 = arith.constant 0 : i32
    %698 = tpu.memref_slice %arg16[%c1_i32_332, %c0_i32_337, %c8_i32_338, %c0_i32_339] : memref<2x2x32x128xf32, #tpu.memory_space<any>> -> memref<1x2x8x128xf32, #tpu.memory_space<any>>
    %699 = tpu.memref_squeeze %698 : memref<1x2x8x128xf32, #tpu.memory_space<any>> -> memref<2x8x128xf32, #tpu.memory_space<any>>
    %700 = tpu.memref_slice %arg19[%c3_i32_333] : memref<4x!tpu.dma_semaphore, #tpu.memory_space<semaphore_mem>> -> memref<1x!tpu.dma_semaphore, #tpu.memory_space<semaphore_mem>>
    %701 = tpu.memref_squeeze %700 : memref<1x!tpu.dma_semaphore, #tpu.memory_space<semaphore_mem>> -> memref<!tpu.dma_semaphore, #tpu.memory_space<semaphore_mem>>
    tpu.wait_dma2 semaphore(%701 : memref<!tpu.dma_semaphore, #tpu.memory_space<semaphore_mem>>) src(%697 : memref<2x8x128xf32, #tpu.memory_space<vmem>>) dst(%699 : memref<2x8x128xf32, #tpu.memory_space<any>>)
    %c0_340 = arith.constant 0 : index
    %c0_341 = arith.constant 0 : index
    %702 = vector.load %arg10[%c0_340, %c0_341] : memref<1x128xf32, #tpu.memory_space<vmem>>, vector<1x128xf32>
    %703 = arith.mulf %691, %691 : vector<16x128xf32>
    %cst_342 = arith.constant dense<0.000000e+00> : vector<16xf32>
    %704 = vector.multi_reduction <add>, %703, %cst_342 [1] : vector<16x128xf32> to vector<16xf32>
    %705 = vector.shape_cast %704 : vector<16xf32> to vector<16x1xf32>
    %cst_343 = arith.constant 1.280000e+02 : f32
    %706 = vector.broadcast %cst_343 : f32 to vector<16x1xf32>
    %707 = arith.divf %705, %706 : vector<16x1xf32>
    %cst_344 = arith.constant 9.99999997E-7 : f32
    %708 = vector.broadcast %cst_344 : f32 to vector<16x1xf32>
    %709 = arith.addf %707, %708 : vector<16x1xf32>
    %710 = math.rsqrt %709 : vector<16x1xf32>
    %711 = vector.broadcast %710 : vector<16x1xf32> to vector<16x128xf32>
    %712 = arith.mulf %691, %711 : vector<16x128xf32>
    %713 = vector.broadcast %702 : vector<1x128xf32> to vector<16x128xf32>
    %714 = arith.mulf %712, %713 : vector<16x128xf32>
    %c0_345 = arith.constant 0 : index
    %c0_346 = arith.constant 0 : index
    %715 = vector.load %arg11[%c0_345, %c0_346] : memref<128x256xf32, #tpu.memory_space<vmem>>, vector<128x256xf32>
    %cst_347 = arith.constant dense<0.000000e+00> : vector<16x256xf32>
    %716 = tpu.matmul %714, %715, %cst_347 {dimension_numbers = #tpu.dot_dimension_numbers<[1], [0], [0], [1], [0, 0, 1, 1], [], []>} : vector<16x128xf32>, vector<128x256xf32>, vector<16x256xf32> -> vector<16x256xf32>
    %c0_348 = arith.constant 0 : index
    %c0_349 = arith.constant 0 : index
    %717 = vector.load %arg14[%c0_348, %c0_349] : memref<16x256xf32, #tpu.memory_space<vmem>>, vector<16x256xf32>
    tpu.vector_store %arg14[%c0_348, %c0_349], %716 {strides = array<i32>} : memref<16x256xf32, #tpu.memory_space<vmem>>, vector<16x256xf32>,
    return
  }
}

</mosaic_0001>

<bundles_post_ra>
// kernel: tpu_custom_call.1
= control target key start
LH: loop header
LB: loop body
LE: loop exit
PB: predicated region body
PF: predicated region fallthrough
CT: control target
= control target key end

     0   :  { %s8496_s0 = inlined_call_operand.vmem [shape: f32[16,128], index: 0, kind: input, shape index: {}]   ;;  %s8497_s1 = inlined_call_operand.vmem [shape: f32[8,32], index: 1, kind: input, shape index: {}]   ;;  %s8498_s2 = inlined_call_operand.vmem [shape: f32[8,32], index: 2, kind: input, shape index: {}]   ;;  %s8499_s3 = inlined_call_operand.vmem [shape: f32[2,1,128], index: 3, kind: input, shape index: {}]   ;;  %s8500_s4 = inlined_call_operand.hbm [shape: f32[2,128,384], index: 4, kind: input, shape index: {}]   ;;  %s8501_s5 = inlined_call_operand.hbm [shape: f32[2,128,128], index: 5, kind: input, shape index: {}]   ;;  %s8502_s6 = inlined_call_operand.vmem [shape: f32[2,1,128], index: 6, kind: input, shape index: {}]   ;;  %s8503_s7 = inlined_call_operand.vmem [shape: f32[2,128,256], index: 7, kind: input, shape index: {}]   ;;  %s8504_s8 = inlined_call_operand.hbm [shape: f32[2,128,256], index: 8, kind: input, shape index: {}]   ;;  %s8505_s9 = inlined_call_operand.hbm [shape: f32[2,256,128], index: 9, kind: input, shape index: {}]   ;;  %s8506_s10 = inlined_call_operand.vmem [shape: f32[1,128], index: 10, kind: input, shape index: {}]   ;;  %s8507_s11 = inlined_call_operand.hbm [shape: f32[128,256], index: 11, kind: input, shape index: {}]   ;;  %s8508_s12 = inlined_call_operand.hbm [shape: f32[2,2,32,128], index: 12, kind: input, shape index: {}, may-alias: {12,15}]   ;;  %s8509_s13 = inlined_call_operand.hbm [shape: f32[2,2,32,128], index: 13, kind: input, shape index: {}, may-alias: {13,16}]   ;;  %s8510_s14 = inlined_call_operand.hbm [shape: f32[16,256], index: 14, kind: output, shape index: {0}]   ;;  %s8511_s15 = inlined_call_operand.hbm [shape: f32[2,2,32,128], index: 15, kind: output, shape index: {1}, may-alias: {12,15}]   ;;  %s8512_s16 = inlined_call_operand.hbm [shape: f32[2,2,32,128], index: 16, kind: output, shape index: {2}, may-alias: {13,16}]  }
   0x1   :  { %8552 = sst [smem:[#allocation38_spill]] %s8496_s0 }
   0x2   :  { %8553 = sst [smem:[#allocation39_spill]] %s8506_s10 }
   0x3   :  { %8554 = sst [smem:[#allocation40_spill]] %s8510_s14 }
   0x4   :  { %8555 = sst [smem:[#allocation41_spill]] %s8512_s16 }
   0x5   :  { %22 = vsyncpa [#allocation6], 0 }
   0x6   :  { %23 = vsyncpa [#allocation9], 0 }
   0x7   :  { %24 = vsyncpa [#allocation12], 0 }
   0x8   :  { %25 = vsyncpa [#allocation7], 0  ;;  %s6993_s21 = smov [#allocation8]   ;;  %s6643_s25 = scalar_lea.hbm %s8501_s5, 4096 }
   0x9   :  { %s51_s22 = sshll.u32 %s6993_s21, 4  ;;  %p6644_p0 = scmp.ne.s32.totalorder %s8501_s5, %s6643_s25  ;;  %s52_s22 = int_to_ptr.vmem [resolvable:$true] %s51_s22 }
   0xa   :  { %p6647_p1 = scmp.lt.u32.totalorder %s6643_s25, %s8501_s5 }
   0xc   :  { %p6649_p2 = pnand %p6647_p1, %p6644_p0 }
   0xe   :  { %6652 = shalt.err (!%p6649_p2)
}
   0xf   :  { %s6653_s30 = scalar_lea.vmem %s52_s22, 4096  ;;  %p6658_p4 = scmp.lt.s32.totalorder %s52_s22, %s52_s22 }
  0x10   :  { %p6654_p3 = scmp.ne.s32.totalorder %s52_s22, %s6653_s30  ;;  %p6659_p5 = scmp.lt.s32.totalorder %s6653_s30, %s6653_s30 }
  0x12   :  { %p6660_p6 = por %p6659_p5, %p6658_p4 }
  0x14   :  { %p6661_p7 = pnand %p6660_p6, %p6654_p3 }
  0x16   :  { %6664 = shalt.err (!%p6661_p7)
}
  0x17   :  { %s6994_s0 = smov 128   ;;  %s8539_s17 = smov 8  }
  0x18   :  { %57 = dma.hbm_to_vmem [thread:$0]  %s8501_s5, 4096, %s52_s22, [#allocation9], %s6994_s0, %s6994_s0, %s8539_s17  }
  0x19   :  { %s6996_s20 = smov [#allocation11]   ;;  %s6997_s23 = smov [#allocation5]  }
  0x1a   :  { %s79_s21 = sshll.u32 %s6996_s20, 4  ;;  %s39_s24 = sshll.u32 %s6997_s23, 4  ;;  %s80_s21 = int_to_ptr.vmem [resolvable:$true] %s79_s21  ;;  %s40_s24 = int_to_ptr.vmem [resolvable:$true] %s39_s24 }
  0x1b   :  { %s6665_s27 = scalar_lea.hbm %s8505_s9, 8192 }
  0x1c   :  { %p6666_p8 = scmp.ne.s32.totalorder %s8505_s9, %s6665_s27  ;;  %p6669_p9 = scmp.lt.u32.totalorder %s6665_s27, %s8505_s9 }
  0x1e   :  { %p6671_p10 = pnand %p6669_p9, %p6666_p8 }
  0x20   :  { %6674 = shalt.err (!%p6671_p10)
}
  0x21   :  { %s6675_s5 = scalar_lea.vmem %s80_s21, 8192  ;;  %p6680_p12 = scmp.lt.s32.totalorder %s80_s21, %s80_s21 }
  0x22   :  { %p6676_p11 = scmp.ne.s32.totalorder %s80_s21, %s6675_s5  ;;  %p6681_p13 = scmp.lt.s32.totalorder %s6675_s5, %s6675_s5 }
  0x24   :  { %p6682_p0 = por %p6681_p13, %p6680_p12 }
  0x26   :  { %p6683_p1 = pnand %p6682_p0, %p6676_p11 }
  0x28   :  { %6686 = shalt.err (!%p6683_p1)
}
  0x29   :  { %85 = dma.hbm_to_vmem [thread:$0]  %s8505_s9, 8192, %s80_s21, [#allocation12], %s6994_s0, %s6994_s0, %s8539_s17  }
  0x2a   :  { %s6687_s14 = scalar_lea.hbm %s8500_s4, 12288 }
  0x2b   :  { %p6688_p2 = scmp.ne.s32.totalorder %s8500_s4, %s6687_s14  ;;  %p6691_p3 = scmp.lt.u32.totalorder %s6687_s14, %s8500_s4 }
  0x2d   :  { %p6693_p4 = pnand %p6691_p3, %p6688_p2 }
  0x2f   :  { %6696 = shalt.err (!%p6693_p4)
}
  0x30   :  { %s6697_s28 = scalar_lea.vmem %s40_s24, 12288  ;;  %p6702_p6 = scmp.lt.s32.totalorder %s40_s24, %s40_s24 }
  0x31   :  { %p6698_p5 = scmp.ne.s32.totalorder %s40_s24, %s6697_s28  ;;  %p6703_p7 = scmp.lt.s32.totalorder %s6697_s28, %s6697_s28 }
  0x33   :  { %p6704_p8 = por %p6703_p7, %p6702_p6 }
  0x35   :  { %p6705_p9 = pnand %p6704_p8, %p6698_p5 }
  0x37   :  { %6708 = shalt.err (!%p6705_p9)
}
  0x38   :  { %s6998_s9 = smov 384   ;;  %s6999_s0 = smov 24  }
  0x39   :  { %45 = dma.hbm_to_vmem [thread:$0]  %s8500_s4, 12288, %s40_s24, [#allocation6], %s6998_s9, %s6998_s9, %s6999_s0  }
  0x3a   :  { %s7000_s30 = smov [#allocation10]   ;;  %s6709_s19 = scalar_lea.hbm %s8504_s8, 8192 }
  0x3b   :  { %s67_s5 = sshll.u32 %s7000_s30, 4  ;;  %p6710_p10 = scmp.ne.s32.totalorder %s8504_s8, %s6709_s19  ;;  %s68_s5 = int_to_ptr.vmem [resolvable:$true] %s67_s5 }
  0x3c   :  { %p6713_p11 = scmp.lt.u32.totalorder %s6709_s19, %s8504_s8 }
  0x3e   :  { %p6715_p12 = pnand %p6713_p11, %p6710_p10 }
  0x40   :  { %6718 = shalt.err (!%p6715_p12)
}
  0x41   :  { %s6719_s26 = scalar_lea.vmem %s68_s5, 8192  ;;  %p6724_p0 = scmp.lt.s32.totalorder %s68_s5, %s68_s5 }
  0x42   :  { %p6720_p13 = scmp.ne.s32.totalorder %s68_s5, %s6719_s26  ;;  %p6725_p1 = scmp.lt.s32.totalorder %s6719_s26, %s6719_s26 }
  0x44   :  { %p6726_p2 = por %p6725_p1, %p6724_p0 }
  0x46   :  { %p6727_p3 = pnand %p6726_p2, %p6720_p13 }
  0x48   :  { %6730 = shalt.err (!%p6727_p3)
}
  0x49   :  { %s8535_s4 = smov 256   ;;  %s8516_s24 = smov 16  }
  0x4a   :  { %73 = dma.hbm_to_vmem [thread:$0]  %s8504_s8, 8192, %s68_s5, [#allocation9], %s8535_s4, %s8535_s4, %s8516_s24  }
  0x4b   :  { %s7003_s9 = smov [#allocation13]   ;;  %s6731_s30 = scalar_lea.hbm %s8507_s11, 4096 }
  0x4c   :  { %s93_s0 = sshll.u32 %s7003_s9, 4  ;;  %p6732_p4 = scmp.ne.s32.totalorder %s8507_s11, %s6731_s30  ;;  %s94_s0 = int_to_ptr.vmem [resolvable:$true] %s93_s0 }
  0x4d   :  { %p6735_p5 = scmp.lt.u32.totalorder %s6731_s30, %s8507_s11 }
  0x4f   :  { %p6737_p6 = pnand %p6735_p5, %p6732_p4 }
  0x51   :  { %6740 = shalt.err (!%p6737_p6)
}
  0x52   :  { %s6741_s14 = scalar_lea.vmem %s94_s0, 4096  ;;  %p6746_p8 = scmp.lt.s32.totalorder %s94_s0, %s94_s0 }
  0x53   :  { %p6742_p7 = scmp.ne.s32.totalorder %s94_s0, %s6741_s14  ;;  %p6747_p9 = scmp.lt.s32.totalorder %s6741_s14, %s6741_s14 }
  0x55   :  { %p6748_p10 = por %p6747_p9, %p6746_p8 }
  0x57   :  { %p6749_p11 = pnand %p6748_p10, %p6742_p7 }
  0x59   :  { %6752 = shalt.err (!%p6749_p11)
}
  0x5a   :  { %99 = dma.hbm_to_vmem [thread:$0]  %s8507_s11, 4096, %s94_s0, [#allocation12], %s8535_s4, %s8535_s4, %s8516_s24  }
  0x5b   :  { %6969 = dma.done.wait [#allocation6], 12288  }
  0x5c   :  { %6970 = vsyncadd [#allocation6], 4294955008 }
  0x5d   :  { %6971 = dma.done.wait [#allocation9], 12288  }
  0x5e   :  { %6972 = vsyncadd [#allocation9], 4294955008 }
  0x5f   :  { %6973 = dma.done.wait [#allocation12], 12288  }
  0x60   :  { %6974 = vsyncadd [#allocation12], 4294955008  ;;  %s8556_s26 = sld [smem:[#allocation38_spill]]  ;;  %v161_v2 = vld [vmem:[#allocation5 + $0x8] sm:$0xff]  ;;  %v164_v4 = vld [vmem:[#allocation5 + $0x20] sm:$0xff]  ;;  %v7004_v47 = vmov 0.0  }
  0x61   :  { %v160_v5 = vld [vmem:[#allocation5] sm:$0xff]  ;;  %v163_v6 = vld [vmem:[#allocation5 + $0x18] sm:$0xff]  ;;  %v5823_v7 = vpack.c.bf16 %v164_v4, %v161_v2  ;;  %v170_v10 = vld [vmem:[#allocation5 + $0x50] sm:$0xff]  ;;  %272 = vmatprep.mubr.f32.mxu0 %v7004_v47  ;;  %s8522_s0 = smov 80   ;;  %s8520_s21 = smov 112   ;;  %vm378_vm0 = vcmask 130048  }
  0x62   :  { %v5825_v8 = vpack.c.bf16 %v163_v6, %v160_v5  ;;  %v167_v9 = vld [vmem:[#allocation5 + $0x38] sm:$0xff]  ;;  %v166_v11 = vld [vmem:[#allocation5 + $0x30] sm:$0xff]  ;;  %v169_v14 = vld [vmem:[#allocation5 + $0x48] sm:$0xff]  ;;  %s8518_s29 = smov 48   ;;  %s8527_s18 = smov 64  }
  0x63   :  { %v5827_v13 = vpack.c.bf16 %v170_v10, %v167_v9  ;;  %v173_v15 = vld [vmem:[#allocation5 + $0x68] sm:$0xff]  ;;  %v176_v16 = vld [vmem:[#allocation5 + $0x80] sm:$0xff]  ;;  %5824 = vmatprep.subr.bf16.mxu0 %v5823_v7  ;;  %v5829_v17 = vpack.c.bf16 %v169_v14, %v166_v11  ;;  %v175_v20 = vld [vmem:[#allocation5 + $0x78] sm:$0xff]  ;;  %s8525_s19 = smov 96   ;;  %s6753_s25 = scalar_lea.hbm %s8508_s12, 256 }
  0x64   :  { %5826 = vmatpush1.bf16.msra.mxu0 %v5825_v8  ;;  %v5831_v18 = vpack.c.bf16 %v176_v16, %v173_v15  ;;  %v172_v19 = vld [vmem:[#allocation5 + $0x60] sm:$0xff]  ;;  %v179_v21 = vld [vmem:[#allocation5 + $0x98] sm:$0xff]  ;;  %v182_v22 = vld [vmem:[#allocation5 + $0xb0] sm:$0xff]  ;;  %p6754_p12 = scmp.ne.s32.totalorder %s8508_s12, %s6753_s25  ;;  %s8515_s9 = scalar_lea.hbm %s8508_s12, 2048 }
  0x65   :  { %5828 = vmatprep.subr.bf16.mxu0 %v5827_v13  ;;  %v5833_v23 = vpack.c.bf16 %v175_v20, %v172_v19  ;;  %v5835_v24 = vpack.c.bf16 %v182_v22, %v179_v21  ;;  %v178_v25 = vld [vmem:[#allocation5 + $0x90] sm:$0xff]  ;;  %v181_v26 = vld [vmem:[#allocation5 + $0xa8] sm:$0xff]  ;;  %v188_v29 = vld [vmem:[#allocation5 + $0xe0] sm:$0xff]  ;;  %p6756_p13 = scmp.lt.u32.totalorder %s8515_s9, %s6753_s25  ;;  %p6757_p0 = scmp.lt.u32.totalorder %s6753_s25, %s8508_s12 }
  0x66   :  { %v7175_v0 = vld [vmem:[%s8556_s26] sm:$0xff]  ;;  %v7180_v1 = vld [vmem:[%s8556_s26 + $0x8] sm:$0xff]  ;;  %v5837_v27 = vpack.c.bf16 %v181_v26, %v178_v25  ;;  %v187_v32 = vld [vmem:[#allocation5 + $0xd8] sm:$0xff] }
  0x67   :  { %v137_v3 = vmul.f32 %v7175_v0, %v7175_v0  ;;  %v138_v12 = vmul.f32 %v7180_v1, %v7180_v1  ;;  %v185_v28 = vld [vmem:[#allocation5 + $0xc8] sm:$0xff]  ;;  %v184_v31 = vld [vmem:[#allocation5 + $0xc0] sm:$0xff]  ;;  %v191_v34 = vld [vmem:[#allocation5 + $0xf8] sm:$0xff]  ;;  %p6758_p1 = por %p6757_p0, %p6756_p13 }
  0x68   :  { %5830 = vmatpush1.bf16.msra.mxu0 %v5829_v17  ;;  %v5839_v30 = vpack.c.bf16 %v188_v29, %v185_v28  ;;  %v5841_v33 = vpack.c.bf16 %v187_v32, %v184_v31  ;;  %v194_v35 = vld [vmem:[#allocation5 + $0x110] sm:$0xff]  ;;  %v193_v38 = vld [vmem:[#allocation5 + $0x108] sm:$0xff]  ;;  %v200_v41 = vld [vmem:[#allocation5 + $0x140] sm:$0xff] }
  0x69   :  { %139 = vadd.xlane.f32.xlu0 %v137_v3  ;;  %5832 = vmatprep.subr.bf16.mxu0 %v5831_v18  ;;  %v5843_v36 = vpack.c.bf16 %v194_v35, %v191_v34  ;;  %v190_v37 = vld [vmem:[#allocation5 + $0xf0] sm:$0xff]  ;;  %v197_v40 = vld [vmem:[#allocation5 + $0x128] sm:$0xff]  ;;  %v196_v42 = vld [vmem:[#allocation5 + $0x120] sm:$0xff]  ;;  %p6759_p2 = pnand %p6758_p1, %p6754_p12 }
  0x6a   :  { %v5845_v39 = vpack.c.bf16 %v193_v38, %v190_v37  ;;  %v5847_v43 = vpack.c.bf16 %v200_v41, %v197_v40  ;;  %v199_v44 = vld [vmem:[#allocation5 + $0x138] sm:$0xff]  ;;  %v206_v46 = vld [vmem:[#allocation5 + $0x170] sm:$0xff]  ;;  %v205_v51 = vld [vmem:[#allocation5 + $0x168] sm:$0xff] }
  0x6b   :  { %v203_v45 = vld [vmem:[#allocation5 + $0x158] sm:$0xff]  ;;  %v5849_v48 = vpack.c.bf16 %v199_v44, %v196_v42  ;;  %v202_v50 = vld [vmem:[#allocation5 + $0x150] sm:$0xff]  ;;  %v165_v53 = vld [vmem:[#allocation5 + $0x28] sm:$0xff] }
  0x6c   :  { %5834 = vmatpush1.bf16.msra.mxu0 %v5833_v23  ;;  %v5851_v49 = vpack.c.bf16 %v206_v46, %v203_v45  ;;  %v162_v52 = vld [vmem:[#allocation5 + $0x10] sm:$0xff]  ;;  %v5853_v54 = vpack.c.bf16 %v205_v51, %v202_v50  ;;  %v168_v56 = vld [vmem:[#allocation5 + $0x40] sm:$0xff]  ;;  %v171_v57 = vld [vmem:[#allocation5 + $0x58] sm:$0xff] }
  0x6d   :  { %141 = vadd.xlane.f32.xlu0 %v138_v12  ;;  %5836 = vmatprep.subr.bf16.mxu0 %v5835_v24  ;;  %v5855_v55 = vpack.c.bf16 %v165_v53, %v162_v52  ;;  %v5859_v58 = vpack.c.bf16 %v171_v57, %v168_v56  ;;  %v174_v59 = vld [vmem:[#allocation5 + $0x70] sm:$0xff]  ;;  %v177_v60 = vld [vmem:[#allocation5 + $0x88] sm:$0xff]  ;;  %v180_v61 = vld [vmem:[#allocation5 + $0xa0] sm:$0xff] }
  0x6e   :  { %v5863_v62 = vpack.c.bf16 %v177_v60, %v174_v59  ;;  %v183_v63 = vld [vmem:[#allocation5 + $0xb8] sm:$0xff]  ;;  %v186_v3 = vld [vmem:[#allocation5 + $0xd0] sm:$0xff]  ;;  %v189_v4 = vld [vmem:[#allocation5 + $0xe8] sm:$0xff] }
  0x6f   :  { %5856 = vmatprep.subr.bf16.mxu1 %v5855_v55  ;;  %v5867_v2 = vpack.c.bf16 %v183_v63, %v180_v61  ;;  %v5871_v5 = vpack.c.bf16 %v189_v4, %v186_v3  ;;  %v192_v6 = vld [vmem:[#allocation5 + $0x100] sm:$0xff]  ;;  %v195_v7 = vld [vmem:[#allocation5 + $0x118] sm:$0xff]  ;;  %v198_v9 = vld [vmem:[#allocation5 + $0x130] sm:$0xff] }
  0x70   :  { %5838 = vmatpush1.bf16.msra.mxu0 %v5837_v27  ;;  %5858 = vmatpush3.bf16.msra.mxu1 %v5855_v55  ;;  %v5875_v8 = vpack.c.bf16 %v195_v7, %v192_v6  ;;  %v201_v10 = vld [vmem:[#allocation5 + $0x148] sm:$0xff]  ;;  %v204_v12 = vld [vmem:[#allocation5 + $0x160] sm:$0xff]  ;;  %v207_v13 = vld [vmem:[#allocation5 + $0x178] sm:$0xff] }
  0x71   :  { %5840 = vmatprep.subr.bf16.mxu0 %v5839_v30  ;;  %5860 = vmatprep.subr.bf16.mxu1 %v5859_v58  ;;  %v5879_v11 = vpack.c.bf16 %v201_v10, %v198_v9  ;;  %v5883_v14 = vpack.c.bf16 %v207_v13, %v204_v12  ;;  %v5100_v22 = vld [vmem:[%s8499_s3] ss:$0 sm:$0xff] }
  0x72   :  { %v7249_v38 = vld [vmem:[%s8497_s1] sm:$0xff]  ;;  %s8529_s1 = smov 32  }
  0x74   :  { %5842 = vmatpush1.bf16.msra.mxu0 %v5841_v33  ;;  %5862 = vmatpush3.bf16.msra.mxu1 %v5859_v58 }
  0x75   :  { %5844 = vmatprep.subr.bf16.mxu0 %v5843_v36  ;;  %5864 = vmatprep.subr.bf16.mxu1 %v5863_v62 }
  0x78   :  { %5846 = vmatpush1.bf16.msra.mxu0 %v5845_v39  ;;  %5866 = vmatpush3.bf16.msra.mxu1 %v5863_v62 }
  0x79   :  { %5848 = vmatprep.subr.bf16.mxu0 %v5847_v43  ;;  %5868 = vmatprep.subr.bf16.mxu1 %v5867_v2 }
  0x7c   :  { %5850 = vmatpush1.bf16.msra.mxu0 %v5849_v48  ;;  %5870 = vmatpush3.bf16.msra.mxu1 %v5867_v2  ;;  %v7273_v48 = vld [vmem:[%s8498_s2] sm:$0xff]  ;;  %s7011_s2 = smov [#allocation2]  }
  0x7d   :  { %5852 = vmatprep.subr.bf16.mxu0 %v5851_v49  ;;  %5872 = vmatprep.subr.bf16.mxu1 %v5871_v5  ;;  %s126_s8 = sshll.u32 %s7011_s2, 4  ;;  %s7313_s8 = int_to_ptr.vmem [resolvable:$true] %s126_s8 }
  0x80   :  { %5854 = vmatpush1.bf16.msra.mxu0 %v5853_v54  ;;  %5874 = vmatpush3.bf16.msra.mxu1 %v5871_v5 }
  0x81   :  { %5876 = vmatprep.subr.bf16.mxu1 %v5875_v8 }
  0x84   :  { %5878 = vmatpush3.bf16.msra.mxu1 %v5875_v8 }
  0x85   :  { %5880 = vmatprep.subr.bf16.mxu1 %v5879_v11 }
  0x88   :  { %5882 = vmatpush3.bf16.msra.mxu1 %v5879_v11 }
  0x89   :  { %5884 = vmatprep.subr.bf16.mxu1 %v5883_v14 }
  0x8c   :  { %5886 = vmatpush3.bf16.msra.mxu1 %v5883_v14 }
  0xf6   :  { %v140_v15 = vpop.xlane.xlu0 %139 }
  0xf7   :  { %v144_v16 = vmul.f32 0.0078125, %v140_v15 }
  0xf9   :  { %v146_v17 = vadd.f32 1e-06, %v144_v16 }
  0xfa   :  { %v142_v18 = vpop.xlane.xlu0 %141 }
  0xfb   :  { %6377 = vrsqrt.f32 %v146_v17  ;;  %v145_v19 = vmul.f32 0.0078125, %v142_v18 }
  0xfd   :  { %v147_v20 = vadd.f32 1e-06, %v145_v19 }
  0xff   :  { %6379 = vrsqrt.f32 %v147_v20 }
 0x105   :  { %v6378_v21 = vpop.eup %6377 }
 0x106   :  { %v150_v23 = vmul.f32 %v6378_v21, %v7175_v0 }
 0x108   :  { %v158_v24 = vmul.f32 %v5100_v22, %v150_v23  ;;  %v119_v23 = vlaneseq }
 0x109   :  { %v6380_v25 = vpop.eup %6379 }
 0x10a   :  { %273 = vmatmul.mubr.f32.vlgmr.msra.gmra.mrb[0].mxu0 %v158_v24  ;;  %5491 = vmatprep.mubr.f32.mxu1 %v158_v24  ;;  %v151_v26 = vmul.f32 %v6380_v25, %v7180_v1 }
 0x10b   :  { %278 = vmatprep.mubr.f32.mxu0 %v7004_v47 }
 0x10c   :  { %v159_v27 = vmul.f32 %v5100_v22, %v151_v26  ;;  %v120_v26 = vshrl.u32 %v119_v23, 7 }
 0x10e   :  { %279 = vmatmul.mubr.f32.gmra.mrb[2].mxu0 %v159_v27  ;;  %5492 = vmatmul.mubr.f32.vlgmr.msra.gmra.mrb[0].mxu1 %v159_v27 }
 0x1dd   :  { %v7193_v28 = vpop.f32.mrb[0].mxu0 }
 0x1de   :  { %425 = vrot.lane.b32.xlu1 %v7193_v28, %s8522_s0  ;;  %393 = vrot.lane.b32.xlu0 %v7193_v28, %s8520_s21  ;;  %v7199_v29 = vpop.f32.mrb[1].mxu0  ;;  %v360_v35 = vsub.f32 0.0, %v7193_v28 }
 0x1df   :  { %v490_v37 = vsub.f32 0.0, %v7199_v29 }
 0x1e1   :  { %v7201_v30 = vpop.f32.mrb[2].mxu0  ;;  %v7203_v31 = vpop.f32.mrb[0].mxu1 }
 0x1e2   :  { %456 = vrot.lane.b32.xlu1 %v7193_v28, %s8518_s29  ;;  %427 = vrot.lane.b32.xlu0 %v7201_v30, %s8522_s0  ;;  %v7209_v32 = vpop.f32.mrb[3].mxu0  ;;  %v7211_v33 = vpop.f32.mrb[1].mxu1  ;;  %v361_v34 = vsub.f32 0.0, %v7201_v30  ;;  %v382_v16 = vmul.f32 %v7201_v30, %v7249_v38 }
 0x1e3   :  { %v491_v36 = vsub.f32 0.0, %v7209_v32 }
 0x1e6   :  { %522 = vrot.lane.b32.xlu1 %v7199_v29, %s8520_s21  ;;  %458 = vrot.lane.b32.xlu0 %v7201_v30, %s8518_s29 }
 0x1ea   :  { %550 = vrot.lane.b32.xlu1 %v7199_v29, %s8522_s0  ;;  %552 = vrot.lane.b32.xlu0 %v7209_v32, %s8522_s0 }
 0x1ee   :  { %387 = vrot.lane.b32.xlu1 %v360_v35, %s8522_s0  ;;  %421 = vrot.lane.b32.xlu0 %v361_v34, %s8518_s29 }
 0x1f2   :  { %419 = vrot.lane.b32.xlu1 %v360_v35, %s8518_s29  ;;  %452 = vrot.lane.b32.xlu0 %v361_v34, %s8516_s24 }
 0x1f6   :  { %450 = vrot.lane.b32.xlu1 %v360_v35, %s8516_s24  ;;  %546 = vrot.lane.b32.xlu0 %v491_v36, %s8518_s29 }
 0x1fa   :  { %516 = vrot.lane.b32.xlu1 %v490_v37, %s8522_s0  ;;  %574 = vrot.lane.b32.xlu0 %v491_v36, %s8516_s24 }
 0x1fe   :  { %544 = vrot.lane.b32.xlu1 %v490_v37, %s8518_s29  ;;  %580 = vrot.lane.b32.xlu0 %v7209_v32, %s8518_s29 }
 0x202   :  { %572 = vrot.lane.b32.xlu1 %v490_v37, %s8516_s24  ;;  %366 = vrot.lane.b32.xlu0 %v361_v34, %s8520_s21 }
 0x206   :  { %395 = vrot.lane.b32.xlu1 %v7201_v30, %s8520_s21  ;;  %374 = vrot.lane.b32.xlu0 %v7201_v30, %s8516_s24 }
 0x20a   :  { %524 = vrot.lane.b32.xlu1 %v7209_v32, %s8520_s21  ;;  %504 = vrot.lane.b32.xlu0 %v7209_v32, %s8516_s24 }
 0x20e   :  { %389 = vrot.lane.b32.xlu1 %v361_v34, %s8522_s0  ;;  %433 = vrot.lane.b32.xlu0 %v7249_v38, %s8527_s18 }
 0x212   :  { %496 = vrot.lane.b32.xlu0 %v491_v36, %s8520_s21  ;;  %518 = vrot.lane.b32.xlu1 %v491_v36, %s8522_s0  ;;  %v123_v36 = vand.u32 127, %v119_v23 }
 0x216   :  { %578 = vrot.lane.b32.xlu1 %v7199_v29, %s8518_s29 }
 0x21a   :  { %364 = vrot.lane.b32.xlu1 %v360_v35, %s8520_s21  ;;  %v121_v35 = vadd.s32 8, %v120_v26 }
 0x21e   :  { %372 = vrot.lane.b32.xlu1 %v7193_v28, %s8516_s24 }
 0x222   :  { %494 = vrot.lane.b32.xlu1 %v490_v37, %s8520_s21 }
 0x226   :  { %502 = vrot.lane.b32.xlu1 %v7199_v29, %s8516_s24 }
 0x22a   :  { %402 = vrot.lane.b32.xlu1 %v7249_v38, %s8529_s1 }
 0x22e   :  { %464 = vrot.lane.b32.xlu1 %v7249_v38, %s8525_s19 }
 0x250   :  { %v426_v39 = vpop.permute.xlu1 %425  ;;  %v394_v40 = vpop.permute.xlu0 %393 }
 0x254   :  { %v457_v41 = vpop.permute.xlu1 %456  ;;  %v428_v42 = vpop.permute.xlu0 %427 }
 0x258   :  { %v523_v43 = vpop.permute.xlu1 %522  ;;  %v459_v44 = vpop.permute.xlu0 %458 }
 0x25c   :  { %v551_v45 = vpop.permute.xlu1 %550  ;;  %v7268_v46 = vpop.permute.xlu0 %552 }
 0x260   :  { %v388_v49 = vpop.permute.xlu1 %387  ;;  %v422_v50 = vpop.permute.xlu0 %421 }
 0x261   :  { %v399_v51 = vsel %vm378_vm0, %v388_v49, %v394_v40  ;;  %v432_v52 = vsel %vm378_vm0, %v422_v50, %v428_v42 }
 0x262   :  { %v407_v53 = vmul.f32 %v399_v51, %v7273_v48  ;;  %v439_v54 = vmul.f32 %v432_v52, %v7273_v48 }
 0x264   :  { %v420_v55 = vpop.permute.xlu1 %419  ;;  %411 = vrot.lane.b32.xlu1 %v407_v53, %s8529_s1  ;;  %v453_v56 = vpop.permute.xlu0 %452 }
 0x265   :  { %v431_v57 = vsel %vm378_vm0, %v420_v55, %v426_v39  ;;  %v463_v58 = vsel %vm378_vm0, %v453_v56, %v459_v44 }
 0x266   :  { %v438_v59 = vmul.f32 %v431_v57, %v7273_v48  ;;  %v470_v60 = vmul.f32 %v463_v58, %v7273_v48 }
 0x268   :  { %v451_v61 = vpop.permute.xlu1 %450  ;;  %442 = vrot.lane.b32.xlu0 %v438_v59, %s8527_s18  ;;  %444 = vrot.lane.b32.xlu1 %v439_v54, %s8527_s18  ;;  %v7286_v62 = vpop.permute.xlu0 %546 }
 0x269   :  { %v462_v63 = vsel %vm378_vm0, %v451_v61, %v457_v41 }
 0x26a   :  { %v469_v2 = vmul.f32 %v462_v63, %v7273_v48 }
 0x26c   :  { %v517_v3 = vpop.permute.xlu1 %516  ;;  %473 = vrot.lane.b32.xlu0 %v469_v2, %s8525_s19  ;;  %475 = vrot.lane.b32.xlu1 %v470_v60, %s8525_s19  ;;  %v7292_v4 = vpop.permute.xlu0 %574 }
 0x26d   :  { %v528_v5 = vsel %vm378_vm0, %v517_v3, %v523_v43 }
 0x26e   :  { %v532_v6 = vmul.f32 %v528_v5, %v7273_v48 }
 0x270   :  { %v545_v7 = vpop.permute.xlu1 %544  ;;  %536 = vrot.lane.b32.xlu0 %v532_v6, %s8529_s1  ;;  %v7297_v8 = vpop.permute.xlu0 %580 }
 0x271   :  { %v556_v9 = vsel %vm378_vm0, %v545_v7, %v551_v45 }
 0x272   :  { %v560_v10 = vmul.f32 %v556_v9, %v7273_v48 }
 0x274   :  { %v573_v11 = vpop.permute.xlu1 %572  ;;  %564 = vrot.lane.b32.xlu0 %v560_v10, %s8527_s18  ;;  %v367_v12 = vpop.permute.xlu0 %366 }
 0x278   :  { %v396_v13 = vpop.permute.xlu1 %395  ;;  %v375_v14 = vpop.permute.xlu0 %374 }
 0x279   :  { %v380_v15 = vsel %vm378_vm0, %v367_v12, %v375_v14 }
 0x27a   :  { %v384_v17 = vmul.f32 %v380_v15, %v7273_v48 }
 0x27c   :  { %v7306_v18 = vadd.f32 %v384_v17, %v382_v16  ;;  %v525_v19 = vpop.permute.xlu1 %524  ;;  %v505_v20 = vpop.permute.xlu0 %504 }
 0x280   :  { %v390_v21 = vpop.permute.xlu1 %389  ;;  %v7308_v22 = vpop.permute.xlu0 %433 }
 0x281   :  { %v400_v24 = vsel %vm378_vm0, %v390_v21, %v396_v13 }
 0x282   :  { %v408_v25 = vmul.f32 %v400_v24, %v7273_v48 }
 0x284   :  { %413 = vrot.lane.b32.xlu0 %v408_v25, %s8529_s1  ;;  %v519_v27 = vpop.permute.xlu1 %518  ;;  %v497_v34 = vpop.permute.xlu0 %496 }
 0x285   :  { %v529_v37 = vsel %vm378_vm0, %v519_v27, %v525_v19  ;;  %v509_v39 = vsel %vm378_vm0, %v497_v34, %v505_v20 }
 0x286   :  { %6762 = shalt.err (!%p6759_p2)  }
 0x287   :  { %s6763_s2 = scalar_lea.vmem %s7313_s8, 256  ;;  %s6767_s23 = scalar_lea.vmem %s7313_s8, 512 }
 0x288   :  { %p7335_p3 = scmp.ne.s32.totalorder %s7313_s8, %s6763_s2  ;;  %p6768_p4 = scmp.lt.s32.totalorder %s7313_s8, %s7313_s8 }
 0x289   :  { %p6769_p5 = scmp.lt.s32.totalorder %s6767_s23, %s6763_s2 }
 0x28b   :  { %p7344_p6 = por %p6769_p5, %p6768_p4 }
 0x28d   :  { %p8542_p7 = pnand %p7344_p6, %p7335_p3 }
 0x28f   :  { %6774 = shalt.err (!%p8542_p7)  }
 0x290   :  { %s8537_s26 = smov 512   ;;  %v533_v40 = vmul.f32 %v529_v37, %v7273_v48  ;;  %v511_v41 = vmul.f32 %v7209_v32, %v7249_v38  ;;  %v513_v42 = vmul.f32 %v509_v39, %v7273_v48  ;;  %vm7368_vm1 = vcmp.le.s32.totalorder %v123_v36, %v121_v35  ;;  %s7013_s11 = smov [#allocation3]   ;;  %v579_v49 = vpop.permute.xlu1 %578 }
 0x291   :  { %129 = dma.hbm_to_vmem [thread:$0]  %s8508_s12, 256, %s7313_s8, [#allocation4], %s8537_s26, %s8535_s4, %s8539_s17  ;;  %v557_v44 = vsel %vm378_vm0, %v7286_v62, %v7268_v46  ;;  %v584_v50 = vsel %vm378_vm0, %v573_v11, %v579_v49 }
 0x292   :  { %s132_s30 = sshll.u32 %s7013_s11, 4  ;;  %v7377_v45 = vadd.f32 %v513_v42, %v511_v41  ;;  %538 = vrot.lane.b32.xlu1 %v533_v40, %s8529_s1  ;;  %s6775_s14 = scalar_lea.hbm %s8509_s13, 256  ;;  %s7375_s30 = int_to_ptr.vmem [resolvable:$true] %s132_s30 }
 0x293   :  { %p6776_p8 = scmp.ne.s32.totalorder %s8509_s13, %s6775_s14  ;;  %s8524_s9 = scalar_lea.hbm %s8509_s13, 2048 }
 0x294   :  { %p6778_p9 = scmp.lt.u32.totalorder %s8524_s9, %s6775_s14  ;;  %p6779_p10 = scmp.lt.u32.totalorder %s6775_s14, %s8509_s13 }
 0x296   :  { %p6780_p11 = por %p6779_p10, %p6778_p9 }
 0x298   :  { %p6781_p12 = pnand %p6780_p11, %p6776_p8 }
 0x29a   :  { %6784 = shalt.err (!%p6781_p12)  }
 0x29b   :  { %s6785_s22 = scalar_lea.vmem %s7375_s30, 256  ;;  %s8531_s24 = scalar_lea.vmem %s7375_s30, 512 }
 0x29c   :  { %p7399_p13 = scmp.ne.s32.totalorder %s7375_s30, %s6785_s22  ;;  %p6790_p0 = scmp.lt.s32.totalorder %s7375_s30, %s7375_s30 }
 0x29d   :  { %p6791_p1 = scmp.lt.s32.totalorder %s8531_s24, %s6785_s22 }
 0x29f   :  { %p7408_p2 = por %p6791_p1, %p6790_p0 }
 0x2a1   :  { %p8533_p4 = pnand %p7408_p2, %p7399_p13 }
 0x2a3   :  { %6796 = shalt.err (!%p8533_p4)  }
 0x2a4   :  { %135 = dma.hbm_to_vmem [thread:$0]  %s8509_s13, 256, %s7375_s30, [#allocation4 + $0x1], %s8537_s26, %s8535_s4, %s8539_s17  ;;  %v561_v46 = vmul.f32 %v557_v44, %v7273_v48  ;;  %v588_v51 = vmul.f32 %v584_v50, %v7273_v48  ;;  %v585_v52 = vsel %vm378_vm0, %v7292_v4, %v7297_v8  ;;  %v365_v53 = vpop.permute.xlu1 %364  ;;  %v381_v57 = vmul.f32 %v7193_v28, %v7249_v38 }
 0x2a5   :  { %v589_v54 = vmul.f32 %v585_v52, %v7273_v48  ;;  %v510_v63 = vmul.f32 %v7199_v29, %v7249_v38  ;;  %vm481_vm2 = vcmask 261120   ;;  %v436_v10 = vmul.f32 %v7308_v22, %v7193_v28 }
 0x2a6   :  { %592 = vrot.lane.b32.xlu0 %v588_v51, %s8525_s19  ;;  %566 = vrot.lane.b32.xlu1 %v561_v46, %s8527_s18  ;;  %vm484_vm3 = vcmask 523264   ;;  %vm487_vm4 = vcmask 785408   ;;  %v558_v24 = vmul.f32 %v7308_v22, %v7199_v29  ;;  %v437_v35 = vmul.f32 %v7308_v22, %v7201_v30 }
 0x2a8   :  { %v373_v55 = vpop.permute.xlu1 %372 }
 0x2a9   :  { %v379_v56 = vsel %vm378_vm0, %v365_v53, %v373_v55 }
 0x2aa   :  { %594 = vrot.lane.b32.xlu1 %v589_v54, %s8525_s19  ;;  %v383_v58 = vmul.f32 %v379_v56, %v7273_v48 }
 0x2ac   :  { %v385_v59 = vadd.f32 %v383_v58, %v381_v57  ;;  %v495_v60 = vpop.permute.xlu1 %494 }
 0x2b0   :  { %v503_v61 = vpop.permute.xlu1 %502 }
 0x2b1   :  { %v508_v62 = vsel %vm378_vm0, %v495_v60, %v503_v61 }
 0x2b2   :  { %v512_v2 = vmul.f32 %v508_v62, %v7273_v48 }
 0x2b4   :  { %v514_v3 = vadd.f32 %v512_v2, %v510_v63  ;;  %v7445_v4 = vpop.permute.xlu1 %402 }
 0x2b5   :  { %v405_v6 = vmul.f32 %v7445_v4, %v7193_v28  ;;  %v530_v19 = vmul.f32 %v7445_v4, %v7199_v29  ;;  %v406_v34 = vmul.f32 %v7445_v4, %v7201_v30  ;;  %v531_v49 = vmul.f32 %v7445_v4, %v7209_v32 }
 0x2b8   :  { %v7447_v5 = vpop.permute.xlu1 %464 }
 0x2b9   :  { %v467_v14 = vmul.f32 %v7447_v5, %v7193_v28  ;;  %v468_v39 = vmul.f32 %v7447_v5, %v7201_v30  ;;  %v559_v30 = vmul.f32 %v7308_v22, %v7209_v32  ;;  %v586_v54 = vmul.f32 %v7447_v5, %v7199_v29 }
 0x2ba   :  { %v587_v60 = vmul.f32 %v7447_v5, %v7209_v32 }
 0x2d6   :  { %v412_v7 = vpop.permute.xlu1 %411 }
 0x2d7   :  { %v417_v8 = vadd.f32 %v412_v7, %v405_v6 }
 0x2d9   :  { %v482_v9 = vsel %vm481_vm2, %v385_v59, %v417_v8 }
 0x2da   :  { %v443_v11 = vpop.permute.xlu0 %442  ;;  %v445_v27 = vpop.permute.xlu1 %444 }
 0x2db   :  { %v448_v12 = vadd.f32 %v443_v11, %v436_v10  ;;  %v449_v41 = vadd.f32 %v445_v27, %v437_v35 }
 0x2dd   :  { %v485_v13 = vsel %vm484_vm3, %v482_v9, %v448_v12 }
 0x2de   :  { %v474_v15 = vpop.permute.xlu0 %473  ;;  %v476_v36 = vpop.permute.xlu1 %475 }
 0x2df   :  { %v479_v16 = vadd.f32 %v474_v15, %v467_v14  ;;  %v480_v42 = vadd.f32 %v476_v36, %v468_v39 }
 0x2e1   :  { %v7458_v17 = vsel %vm487_vm4, %v485_v13, %v479_v16 }
 0x2e2   :  { %v537_v20 = vpop.permute.xlu0 %536 }
 0x2e3   :  { %v542_v21 = vadd.f32 %v537_v20, %v530_v19 }
 0x2e5   :  { %v600_v23 = vsel %vm481_vm2, %v514_v3, %v542_v21 }
 0x2e6   :  { %v565_v25 = vpop.permute.xlu0 %564 }
 0x2e7   :  { %v570_v26 = vadd.f32 %v565_v25, %v558_v24 }
 0x2e9   :  { %v602_v28 = vsel %vm484_vm3, %v600_v23, %v570_v26 }
 0x2f6   :  { %v414_v37 = vpop.permute.xlu0 %413 }
 0x2f7   :  { %v418_v40 = vadd.f32 %v414_v37, %v406_v34 }
 0x2f9   :  { %v483_v44 = vsel %vm481_vm2, %v7306_v18, %v418_v40 }
 0x2fa   :  { %v486_v50 = vsel %vm484_vm3, %v483_v44, %v449_v41 }
 0x2fb   :  { %v7478_v51 = vsel %vm487_vm4, %v486_v50, %v480_v42 }
 0x304   :  { %v539_v46 = vpop.permute.xlu1 %538 }
 0x305   :  { %v543_v52 = vadd.f32 %v539_v46, %v531_v49 }
 0x307   :  { %v601_v53 = vsel %vm481_vm2, %v7377_v45, %v543_v52 }
 0x318   :  { %v567_v18 = vpop.permute.xlu1 %566  ;;  %v593_v55 = vpop.permute.xlu0 %592 }
 0x319   :  { %v571_v56 = vadd.f32 %v567_v18, %v559_v30  ;;  %v598_v57 = vadd.f32 %v593_v55, %v586_v54 }
 0x31b   :  { %v603_v58 = vsel %vm484_vm3, %v601_v53, %v571_v56  ;;  %v604_v59 = vsel %vm487_vm4, %v602_v28, %v598_v57 }
 0x31c   :  { %v595_v61 = vpop.permute.xlu1 %594 }
 0x31d   :  { %v599_v62 = vadd.f32 %v595_v61, %v587_v60 }
 0x31f   :  { %v7491_v45 = vsel %vm487_vm4, %v603_v58, %v599_v62 }
 0x320   :  { %6975 = dma.done.wait [#allocation4], 256 }
 0x321   :  { %6976 = vsyncadd [#allocation4], 4294967040 }
 0x322   :  { %6977 = dma.done.wait [#allocation4 + $0x1], 256 }
 0x323   :  { %6978 = vsyncadd [#allocation4 + $0x1], 4294967040  ;;  %612 = vst [vmem:[#allocation2 + $0x8] sm:$0xff] %v604_v59  ;;  %v7014_v29 = vmov 0.0|0.0   ;;  %vm7015_vm5 = vmmov 0   ;;  %v632_v32 = vld [vmem:[#allocation2] sm:$0xff] }
 0x324   :  { %613 = vst [vmem:[#allocation2 + $0x18] sm:$0xff] %v7491_v45  ;;  %614 = vst [vmem:[#allocation3 + $0x8] sm:$0xff] %v7211_v33  ;;  %5887 = vmatprep.subr.bf16.mxu0 %v7014_v29  ;;  %5498 = vmatprep.mubr.msk.f32.mxu0 %vm7015_vm5, %v7004_v47  ;;  %v5888_v2 = vpack.c.bf16 %v604_v59, %v632_v32  ;;  %v7518_v10 = vpack.i.bf16 %v604_v59, %v632_v32  ;;  %v634_v16 = vld [vmem:[#allocation3] sm:$0xff]  ;;  %s7016_s27 = smov [#allocation2 + $0x8]   ;;  %s617_s21 = scalar_lea.hbm %s8511_s15, 128 }
 0x325   :  { %615 = vst [vmem:[#allocation3 + $0x18] sm:$0xff] %v7203_v31  ;;  %5891 = vmatprep.subr.bf16.mxu1 %v7014_v29  ;;  %5505 = vmatprep.mubr.msk.f32.mxu1 %vm7015_vm5, %v7004_v47  ;;  %vm7504_vm6 = vmpackc.low %vm481_vm2, %vm481_vm2  ;;  %v5892_v19 = vpack.c.bf16 %v7211_v33, %v634_v16  ;;  %v7552_v30 = vpack.i.bf16 %v7211_v33, %v634_v16  ;;  %s620_s28 = sshll.u32 %s7016_s27, 4  ;;  %s7808_s28 = int_to_ptr.vmem [resolvable:$true] %s620_s28 }
 0x326   :  { %5890 = vmatpush3.bf16.xpose.msk.msra.mxu0 %vm7504_vm6, %v5888_v2  ;;  %6382 = vrot.lane.b32.xlu1 %v7518_v10, %s8525_s19  ;;  %s6797_s29 = scalar_lea.vmem %s7808_s28, 256  ;;  %p6802_p8 = scmp.lt.s32.totalorder %s7808_s28, %s7313_s8 }
 0x327   :  { %5898 = vmatprep.subr.bf16.mxu0 %v7014_v29  ;;  %5893 = vmatpush3.bf16.msra.mxu1 %v5892_v19  ;;  %p7812_p5 = scmp.ne.s32.totalorder %s7808_s28, %s6797_s29  ;;  %p6803_p9 = scmp.lt.s32.totalorder %s6767_s23, %s6797_s29 }
 0x328   :  { %5894 = vmatprep.subr.bf16.mxu1 %v7014_v29 }
 0x329   :  { %p7820_p10 = por %p6803_p9, %p6802_p8 }
 0x32a   :  { %6387 = vrot.lane.b32.xlu1 %v7518_v10, %s8527_s18 }
 0x32b   :  { %p8532_p11 = pnand %p7820_p10, %p7812_p5 }
 0x32d   :  { %5499 = vmatmul.mubr.msk.f32.vlgmr.msra.gmra.mrb[4].mxu0 %vm481_vm2, %v7458_v17 }
 0x32e   :  { %5519 = vmatprep.mubr.msk.f32.mxu0 %vm7015_vm5, %v7004_v47  ;;  %977 = vrot.lane.b32.xlu1 %v7458_v17, %s8527_s18 }
 0x398   :  { %v6383_v21 = vpop.permute.xlu1 %6382 }
 0x399   :  { %v6385_v23 = vunpack.i.h.bf16 %v6383_v21  ;;  %v6384_v24 = vunpack.i.l.bf16 %v6383_v21 }
 0x39b   :  { %v5895_v26 = vpack.c.bf16 %v6385_v23, %v6384_v24 }
 0x39c   :  { %v6388_v27 = vpop.permute.xlu1 %6387 }
 0x39d   :  { %v6390_v34 = vunpack.i.h.bf16 %v6388_v27  ;;  %v6389_v35 = vunpack.i.l.bf16 %v6388_v27 }
 0x39f   :  { %v5902_v36 = vpack.c.bf16 %v6390_v34, %v6389_v35 }
 0x3a0   :  { %v978_v39 = vpop.permute.xlu1 %977 }
 0x400   :  { %v711_v3 = vpop.f32.mrb[4].mxu0 }
 0x401   :  { %v715_v6 = vmul.f32 0.17677669, %v711_v3  ;;  %v5500_v7 = vpop.f32.mrb[5].mxu0 }
 0x402   :  { %v1341_v7 = vld [vmem:[#allocation2 + $0x10] sm:$0xff] }
 0x403   :  { %v716_v8 = vsel %vm7368_vm1, %v715_v6, -1e+30  ;;  %v7585_v21 = vpack.i.bf16 %v7491_v45, %v1341_v7 }
 0x404   :  { %v717_v9 = vsel %vm378_vm0, %v716_v8, -inf }
 0x405   :  { %718 = vmax.xlane.f32.xlu0 %v717_v9  ;;  %v5916_v9 = vpack.c.bf16 %v7491_v45, %v1341_v7  ;;  %v1344_v45 = vld [vmem:[#allocation3 + $0x10] sm:$0xff] }
 0x492   :  { %v719_v11 = vpop.xlane.xlu0 %718 }
 0x493   :  { %v720_v12 = vsub.f32 %v716_v8, %v719_v11 }
 0x495   :  { %v721_v13 = vmul.f32 1.442695, %v720_v12 }
 0x497   :  { %6456 = vpow2.f32 %v721_v13 }
 0x4a1   :  { %v6457_v14 = vpop.eup %6456 }
 0x4a2   :  { %v723_v15 = vsel %vm378_vm0, %v6457_v14, 0.0 }
 0x4a3   :  { %724 = vadd.xlane.f32.xlu0 %v723_v15 }
 0x4b9   :  { %801 = vrot.lane.b32.xlu0 %v7458_v17, %s8525_s19 }
 0x530   :  { %v725_v20 = vpop.xlane.xlu0 %724 }
 0x531   :  { %6458 = vrcp.f32 %v725_v20 }
 0x534   :  { %v802_v37 = vpop.permute.xlu0 %801 }
 0x53b   :  { %v6459_v25 = vpop.eup %6458 }
 0x53c   :  { %v727_v28 = vmul.f32 %v6459_v25, %v6457_v14 }
 0x53e   :  { %5506 = vmatmul.mubr.msk.f32.vlgmr.msra.gmra.mrb[2].mxu1 %vm378_vm0, %v727_v28 }
 0x53f   :  { %5897 = vmatpush3.bf16.xpose.msk.msra.mxu1 %vm7504_vm6, %v5895_v26  ;;  %5512 = vmatprep.mubr.msk.f32.mxu1 %vm7015_vm5, %v7004_v47 }
 0x540   :  { %5901 = vmatprep.subr.bf16.mxu1 %v7014_v29 }
 0x546   :  { %5513 = vmatmul.mubr.msk.f32.vlgmr.msra.gmra.mrb[4].mxu1 %vm481_vm2, %v802_v37 }
 0x547   :  { %5904 = vmatpush3.bf16.xpose.msk.msra.mxu1 %vm7504_vm6, %v5902_v36  ;;  %5526 = vmatprep.mubr.msk.f32.mxu1 %vm7015_vm5, %v7004_v47  ;;  %v5920_v36 = vpack.c.bf16 %v7203_v31, %v1344_v45 }
 0x548   :  { %5905 = vmatprep.subr.bf16.mxu1 %v7014_v29 }
 0x54e   :  { %5527 = vmatmul.mubr.msk.f32.vlgmr.msra.gmra.mrb[6].mxu1 %vm481_vm2, %v978_v39 }
 0x54f   :  { %5533 = vmatprep.mubr.msk.f32.mxu1 %vm7015_vm5, %v7004_v47 }
 0x611   :  { %v7546_v40 = vpop.f32.mrb[2].mxu1 }
 0x612   :  { %v5507_v41 = vpop.f32.mrb[3].mxu1 }
 0x619   :  { %v879_v42 = vpop.f32.mrb[4].mxu1 }
 0x61a   :  { %v5514_v44 = vpop.f32.mrb[5].mxu1  ;;  %v883_v23 = vmul.f32 0.17677669, %v879_v42 }
 0x61c   :  { %v884_v24 = vsel %vm7368_vm1, %v883_v23, -1e+30 }
 0x61d   :  { %v885_v25 = vsel %vm378_vm0, %v884_v24, -inf }
 0x621   :  { %v1055_v49 = vpop.f32.mrb[6].mxu1 }
 0x622   :  { %v1059_v50 = vmul.f32 0.17677669, %v1055_v49  ;;  %v5528_v46 = vpop.f32.mrb[7].mxu1 }
 0x624   :  { %v1060_v52 = vsel %vm7368_vm1, %v1059_v50, -1e+30 }
 0x625   :  { %v1061_v53 = vsel %vm378_vm0, %v1060_v52, -inf }
 0x626   :  { %1062 = vmax.xlane.f32.xlu1 %v1061_v53 }
 0x637   :  { %6392 = vrot.lane.b32.xlu1 %v7552_v30, %s8527_s18 }
 0x63b   :  { %1151 = vrot.lane.b32.xlu1 %v7458_v17, %s8529_s1 }
 0x6b3   :  { %v1063_v54 = vpop.xlane.xlu1 %1062 }
 0x6b4   :  { %v1064_v18 = vsub.f32 %v1060_v52, %v1063_v54 }
 0x6b6   :  { %v1065_v55 = vmul.f32 1.442695, %v1064_v18 }
 0x6b7   :  { %v6393_v58 = vpop.permute.xlu1 %6392 }
 0x6b8   :  { %6460 = vpow2.f32 %v1065_v55  ;;  %v6395_v59 = vunpack.i.h.bf16 %v6393_v58  ;;  %v6394_v60 = vunpack.i.l.bf16 %v6393_v58 }
 0x6ba   :  { %v5906_v61 = vpack.c.bf16 %v6395_v59, %v6394_v60 }
 0x6bb   :  { %v1152_v8 = vpop.permute.xlu1 %1151 }
 0x6bc   :  { %5907 = vmatpush3.bf16.msra.mxu1 %v5906_v61 }
 0x6bd   :  { %5908 = vmatprep.subr.bf16.mxu1 %v7014_v29 }
 0x6c2   :  { %v6461_v56 = vpop.eup %6460 }
 0x6c3   :  { %v1067_v57 = vsel %vm378_vm0, %v6461_v56, 0.0 }
 0x6c4   :  { %1068 = vadd.xlane.f32.xlu0 %v1067_v57 }
 0x6da   :  { %6397 = vrot.lane.b32.xlu0 %v7518_v10, %s8529_s1 }
 0x751   :  { %v1069_v33 = vpop.xlane.xlu0 %1068 }
 0x752   :  { %6462 = vrcp.f32 %v1069_v33 }
 0x755   :  { %v6398_v17 = vpop.permute.xlu0 %6397 }
 0x756   :  { %v6400_v62 = vunpack.i.h.bf16 %v6398_v17  ;;  %v6399_v32 = vunpack.i.l.bf16 %v6398_v17 }
 0x758   :  { %v5909_v3 = vpack.c.bf16 %v6400_v62, %v6399_v32 }
 0x75c   :  { %v6463_v2 = vpop.eup %6462 }
 0x75d   :  { %v1071_v6 = vmul.f32 %v6463_v2, %v6461_v56 }
 0x75f   :  { %5534 = vmatmul.mubr.msk.f32.vlgmr.msra.gmra.mrb[8].mxu1 %vm378_vm0, %v1071_v6 }
 0x760   :  { %5911 = vmatpush3.bf16.xpose.msk.msra.mxu1 %vm7504_vm6, %v5909_v3  ;;  %5540 = vmatprep.mubr.msk.f32.mxu1 %vm7015_vm5, %v7004_v47 }
 0x761   :  { %5915 = vmatprep.subr.bf16.mxu1 %v7014_v29 }
 0x767   :  { %5541 = vmatmul.mubr.msk.f32.vlgmr.msra.gmra.mrb[10].mxu1 %vm481_vm2, %v1152_v8 }
 0x768   :  { %5918 = vmatpush3.bf16.xpose.msk.msra.mxu1 %vm7504_vm6, %v5916_v9  ;;  %5554 = vmatprep.mubr.msk.f32.mxu1 %vm7015_vm5, %v7004_v47  ;;  %v7619_v9 = vpack.i.bf16 %v7203_v31, %v1344_v45 }
 0x769   :  { %5919 = vmatprep.subr.bf16.mxu1 %v7014_v29 }
 0x76f   :  { %5555 = vmatmul.mubr.msk.f32.vlgmr.msra.gmra.mrb[12].mxu1 %vm481_vm2, %v7478_v51 }
 0x770   :  { %5561 = vmatprep.mubr.msk.f32.mxu1 %vm7015_vm5, %v7004_v47  ;;  %5921 = vmatpush3.bf16.msra.mxu1 %v5920_v36 }
 0x771   :  { %5922 = vmatprep.subr.bf16.mxu1 %v7014_v29 }
 0x832   :  { %v7579_v10 = vpop.f32.mrb[8].mxu1 }
 0x833   :  { %v5535_v11 = vpop.f32.mrb[9].mxu1 }
 0x83a   :  { %v1229_v12 = vpop.f32.mrb[10].mxu1 }
 0x83b   :  { %v5542_v13 = vpop.f32.mrb[11].mxu1  ;;  %v1233_v37 = vmul.f32 0.17677669, %v1229_v12 }
 0x83d   :  { %v1234_v39 = vsel %vm7368_vm1, %v1233_v37, -1e+30 }
 0x83e   :  { %v1235_v41 = vsel %vm378_vm0, %v1234_v39, -inf }
 0x842   :  { %v1421_v14 = vpop.f32.mrb[12].mxu1 }
 0x843   :  { %v1425_v15 = vmul.f32 0.17677669, %v1421_v14  ;;  %v5556_v16 = vpop.f32.mrb[13].mxu1 }
 0x845   :  { %v1426_v19 = vsel %vm7368_vm1, %v1425_v15, -1e+30 }
 0x846   :  { %v1427_v20 = vsel %vm378_vm0, %v1426_v19, -inf }
 0x847   :  { %1428 = vmax.xlane.f32.xlu1 %v1427_v20 }
 0x858   :  { %6402 = vrot.lane.b32.xlu1 %v7585_v21, %s8525_s19 }
 0x87c   :  { %886 = vmax.xlane.f32.xlu1 %v885_v25 }
 0x8d4   :  { %v1429_v26 = vpop.xlane.xlu1 %1428 }
 0x8d5   :  { %v1430_v28 = vsub.f32 %v1426_v19, %v1429_v26 }
 0x8d7   :  { %v1431_v27 = vmul.f32 1.442695, %v1430_v28 }
 0x8d8   :  { %v6403_v44 = vpop.permute.xlu1 %6402 }
 0x8d9   :  { %6464 = vpow2.f32 %v1431_v27  ;;  %v6405_v49 = vunpack.i.h.bf16 %v6403_v44  ;;  %v6404_v50 = vunpack.i.l.bf16 %v6403_v44 }
 0x8db   :  { %v5923_v52 = vpack.c.bf16 %v6405_v49, %v6404_v50 }
 0x8e3   :  { %v6465_v34 = vpop.eup %6464 }
 0x8e4   :  { %v1433_v35 = vsel %vm378_vm0, %v6465_v34, 0.0 }
 0x8e5   :  { %1434 = vadd.xlane.f32.xlu0 %v1433_v35 }
 0x8fb   :  { %1511 = vrot.lane.b32.xlu0 %v7478_v51, %s8525_s19 }
 0x909   :  { %v887_v18 = vpop.xlane.xlu1 %886 }
 0x90a   :  { %v888_v55 = vsub.f32 %v884_v24, %v887_v18 }
 0x90c   :  { %v889_v57 = vmul.f32 1.442695, %v888_v55 }
 0x91a   :  { %1236 = vmax.xlane.f32.xlu0 %v1235_v41 }
 0x972   :  { %v1435_v42 = vpop.xlane.xlu0 %1434 }
 0x973   :  { %6466 = vrcp.f32 %v1435_v42 }
 0x974   :  { %6468 = vpow2.f32 %v889_v57 }
 0x976   :  { %v1512_v54 = vpop.permute.xlu0 %1511 }
 0x97d   :  { %v6467_v46 = vpop.eup %6466 }
 0x97e   :  { %v1437_v53 = vmul.f32 %v6467_v46, %v6465_v34  ;;  %v6469_v3 = vpop.eup %6468 }
 0x97f   :  { %v891_v6 = vsel %vm378_vm0, %v6469_v3, 0.0 }
 0x980   :  { %5562 = vmatmul.mubr.msk.f32.vlgmr.msra.gmra.mrb[14].mxu1 %vm378_vm0, %v1437_v53 }
 0x981   :  { %5925 = vmatpush3.bf16.xpose.msk.msra.mxu1 %vm7504_vm6, %v5923_v52  ;;  %5568 = vmatprep.mubr.msk.f32.mxu1 %vm7015_vm5, %v7004_v47 }
 0x982   :  { %5933 = vmatprep.subr.bf16.mxu1 %v7014_v29 }
 0x988   :  { %5569 = vmatmul.mubr.msk.f32.vlgmr.msra.gmra.mrb[16].mxu1 %vm481_vm2, %v1512_v54 }
 0x989   :  { %5589 = vmatprep.mubr.msk.f32.mxu1 %vm7015_vm5, %v7004_v47 }
 0x9a7   :  { %v1237_v56 = vpop.xlane.xlu0 %1236 }
 0x9a8   :  { %v1238_v58 = vsub.f32 %v1234_v39, %v1237_v56 }
 0x9aa   :  { %v1239_v61 = vmul.f32 1.442695, %v1238_v58 }
 0x9ac   :  { %6470 = vpow2.f32 %v1239_v61 }
 0x9b6   :  { %v6471_v7 = vpop.eup %6470 }
 0x9b7   :  { %v1241_v8 = vsel %vm378_vm0, %v6471_v7, 0.0 }
 0xa53   :  { %v7609_v59 = vpop.f32.mrb[14].mxu1 }
 0xa54   :  { %v5563_v60 = vpop.f32.mrb[15].mxu1 }
 0xa5b   :  { %v1589_v33 = vpop.f32.mrb[16].mxu1 }
 0xa5c   :  { %v1593_v17 = vmul.f32 0.17677669, %v1589_v33  ;;  %v5570_v62 = vpop.f32.mrb[17].mxu1 }
 0xa5e   :  { %v1594_v32 = vsel %vm7368_vm1, %v1593_v17, -1e+30 }
 0xa5f   :  { %v1595_v2 = vsel %vm378_vm0, %v1594_v32, -inf }
 0xa60   :  { %1596 = vmax.xlane.f32.xlu1 %v1595_v2 }
 0xa64   :  { %892 = vadd.xlane.f32.xlu1 %v891_v6 }
 0xa68   :  { %1242 = vadd.xlane.f32.xlu1 %v1241_v8 }
 0xa79   :  { %6407 = vrot.lane.b32.xlu1 %v7552_v30, %s8525_s19 }
 0xa7d   :  { %6417 = vrot.lane.b32.xlu1 %v7619_v9, %s8525_s19 }
 0xa81   :  { %6422 = vrot.lane.b32.xlu1 %v7585_v21, %s8527_s18 }
 0xaed   :  { %v1597_v11 = vpop.xlane.xlu1 %1596 }
 0xaee   :  { %v1598_v12 = vsub.f32 %v1594_v32, %v1597_v11 }
 0xaf0   :  { %v1599_v13 = vmul.f32 1.442695, %v1598_v12 }
 0xaf1   :  { %v893_v14 = vpop.xlane.xlu1 %892 }
 0xaf2   :  { %6472 = vpow2.f32 %v1599_v13 }
 0xaf3   :  { %6474 = vrcp.f32 %v893_v14 }
 0xaf5   :  { %v1243_v15 = vpop.xlane.xlu1 %1242 }
 0xaf6   :  { %6476 = vrcp.f32 %v1243_v15 }
 0xaf9   :  { %v6408_v16 = vpop.permute.xlu1 %6407 }
 0xafa   :  { %v6410_v19 = vunpack.i.h.bf16 %v6408_v16  ;;  %v6409_v20 = vunpack.i.l.bf16 %v6408_v16 }
 0xafc   :  { %v6473_v23 = vpop.eup %6472  ;;  %v5899_v24 = vpack.c.bf16 %v6410_v19, %v6409_v20 }
 0xafd   :  { %v6475_v31 = vpop.eup %6474  ;;  %v1601_v25 = vsel %vm378_vm0, %v6473_v23, 0.0  ;;  %v6418_v27 = vpop.permute.xlu1 %6417 }
 0xafe   :  { %1602 = vadd.xlane.f32.xlu0 %v1601_v25  ;;  %5900 = vmatpush3.bf16.msra.mxu0 %v5899_v24  ;;  %v895_v26 = vmul.f32 %v6475_v31, %v6469_v3  ;;  %v6420_v36 = vunpack.i.h.bf16 %v6418_v27  ;;  %v6419_v37 = vunpack.i.l.bf16 %v6418_v27 }
 0xaff   :  { %5912 = vmatprep.subr.bf16.mxu0 %v7014_v29 }
 0xb00   :  { %v6477_v39 = vpop.eup %6476  ;;  %v5927_v42 = vpack.c.bf16 %v6420_v36, %v6419_v37 }
 0xb01   :  { %5520 = vmatmul.mubr.msk.f32.vlgmr.msra.gmra.mrb[6].mxu0 %vm378_vm0, %v895_v26  ;;  %v1245_v44 = vmul.f32 %v6477_v39, %v6471_v7  ;;  %v6423_v49 = vpop.permute.xlu1 %6422 }
 0xb02   :  { %5547 = vmatprep.mubr.msk.f32.mxu0 %vm7015_vm5, %v7004_v47  ;;  %v6425_v46 = vunpack.i.h.bf16 %v6423_v49  ;;  %v6424_v52 = vunpack.i.l.bf16 %v6423_v49 }
 0xb04   :  { %v5930_v53 = vpack.c.bf16 %v6425_v46, %v6424_v52 }
 0xb14   :  { %6412 = vrot.lane.b32.xlu0 %v7552_v30, %s8529_s1 }
 0xb18   :  { %1687 = vrot.lane.b32.xlu0 %v7478_v51, %s8527_s18 }
 0xb8b   :  { %v1603_v28 = vpop.xlane.xlu0 %1602 }
 0xb8c   :  { %6478 = vrcp.f32 %v1603_v28 }
 0xb8f   :  { %v6413_v34 = vpop.permute.xlu0 %6412 }
 0xb90   :  { %v6415_v35 = vunpack.i.h.bf16 %v6413_v34  ;;  %v6414_v45 = vunpack.i.l.bf16 %v6413_v34 }
 0xb92   :  { %v5913_v41 = vpack.c.bf16 %v6415_v35, %v6414_v45 }
 0xb93   :  { %v1688_v54 = vpop.permute.xlu0 %1687 }
 0xb94   :  { %5914 = vmatpush3.bf16.msra.mxu0 %v5913_v41 }
 0xb95   :  { %5926 = vmatprep.subr.bf16.mxu0 %v7014_v29 }
 0xb96   :  { %v6479_v30 = vpop.eup %6478 }
 0xb97   :  { %5548 = vmatmul.mubr.msk.f32.vlgmr.msra.gmra.mrb[8].mxu0 %vm378_vm0, %v1245_v44  ;;  %v1605_v50 = vmul.f32 %v6479_v30, %v6473_v23 }
 0xb98   :  { %5928 = vmatpush3.bf16.msra.mxu0 %v5927_v42  ;;  %5575 = vmatprep.mubr.msk.f32.mxu0 %vm7015_vm5, %v7004_v47 }
 0xb99   :  { %5929 = vmatprep.subr.bf16.mxu0 %v7014_v29 }
 0xb9b   :  { %5576 = vmatmul.mubr.msk.f32.vlgmr.msra.gmra.mrb[10].mxu0 %vm378_vm0, %v1605_v50 }
 0xb9c   :  { %5582 = vmatprep.mubr.msk.f32.mxu0 %vm7015_vm5, %v7004_v47 }
 0xba1   :  { %5932 = vmatpush3.bf16.xpose.msk.msra.mxu0 %vm7504_vm6, %v5930_v53  ;;  %v2050_v53 = vld [vmem:[#allocation8] sm:$0xff] }
 0xba2   :  { %5940 = vmatprep.subr.bf16.mxu0 %v7014_v29 }
 0xba8   :  { %5583 = vmatmul.mubr.msk.f32.vlgmr.msra.gmra.mrb[12].mxu0 %vm481_vm2, %v1688_v54  ;;  %v2051_v54 = vld [vmem:[#allocation8 + $0x8] sm:$0xff] }
 0xba9   :  { %5603 = vmatprep.mubr.msk.f32.mxu0 %vm7015_vm5, %v7004_v47 }
 0xbd4   :  { %v7648_v18 = vpop.f32.mrb[6].mxu0 }
 0xbd5   :  { %v5521_v55 = vpop.f32.mrb[7].mxu0 }
 0xbd6   :  { %v5943_v55 = vpack.c.bf16 %v2051_v54, %v2050_v53  ;;  %v2171_v53 = vld [vmem:[%s8503_s7 + $0x28] sm:$0xff] }
 0xc6a   :  { %v7650_v56 = vpop.f32.mrb[8].mxu0 }
 0xc6b   :  { %v5549_v57 = vpop.f32.mrb[9].mxu0 }
 0xc6c   :  { %v2053_v57 = vld [vmem:[#allocation8 + $0x18] sm:$0xff] }
 0xc6e   :  { %v1683_v58 = vpop.f32.mrb[10].mxu0 }
 0xc6f   :  { %v6441_v60 = vpack.i.bf16 %v1683_v58, %v7648_v18  ;;  %v5577_v61 = vpop.f32.mrb[11].mxu0  ;;  %v2052_v18 = vld [vmem:[#allocation8 + $0x10] sm:$0xff] }
 0xc70   :  { %v5947_v58 = vpack.c.bf16 %v2053_v57, %v2052_v18  ;;  %v2054_v61 = vld [vmem:[#allocation8 + $0x20] sm:$0xff]  ;;  %v2173_v18 = vld [vmem:[%s8503_s7 + $0x38] sm:$0xff] }
 0xc71   :  { %v2282_v57 = vld [vmem:[#allocation10 + $0x38] sm:$0xff] }
 0xc7b   :  { %v1765_v33 = vpop.f32.mrb[12].mxu0 }
 0xc7c   :  { %v1769_v17 = vmul.f32 0.17677669, %v1765_v33  ;;  %v5584_v62 = vpop.f32.mrb[13].mxu0  ;;  %v2055_v33 = vld [vmem:[#allocation8 + $0x28] sm:$0xff] }
 0xc7d   :  { %v2056_v62 = vld [vmem:[#allocation8 + $0x30] sm:$0xff] }
 0xc7e   :  { %v1770_v32 = vsel %vm7368_vm1, %v1769_v17, -1e+30  ;;  %v5951_v17 = vpack.c.bf16 %v2055_v33, %v2054_v61  ;;  %v2170_v33 = vld [vmem:[%s8503_s7 + $0x20] sm:$0xff] }
 0xc7f   :  { %v1771_v2 = vsel %vm378_vm0, %v1770_v32, -inf }
 0xc80   :  { %1772 = vmax.xlane.f32.xlu1 %v1771_v2  ;;  %v2058_v2 = vld [vmem:[#allocation8 + $0x40] sm:$0xff] }
 0xc91   :  { %6432 = vrot.lane.b32.xlu1 %v7585_v21, %s8529_s1 }
 0xc95   :  { %1861 = vrot.lane.b32.xlu1 %v7478_v51, %s8529_s1 }
 0xd0d   :  { %v1773_v3 = vpop.xlane.xlu1 %1772 }
 0xd0e   :  { %v1774_v6 = vsub.f32 %v1770_v32, %v1773_v3  ;;  %v2059_v3 = vld [vmem:[#allocation8 + $0x48] sm:$0xff] }
 0xd10   :  { %v1775_v7 = vmul.f32 1.442695, %v1774_v6  ;;  %v5959_v6 = vpack.c.bf16 %v2059_v3, %v2058_v2  ;;  %v2175_v2 = vld [vmem:[%s8503_s7 + $0x48] sm:$0xff]  ;;  %v2177_v3 = vld [vmem:[%s8503_s7 + $0x58] sm:$0xff] }
 0xd11   :  { %v6433_v16 = vpop.permute.xlu1 %6432 }
 0xd12   :  { %6480 = vpow2.f32 %v1775_v7  ;;  %v6435_v51 = vunpack.i.h.bf16 %v6433_v16  ;;  %v6434_v19 = vunpack.i.l.bf16 %v6433_v16  ;;  %v2060_v7 = vld [vmem:[#allocation8 + $0x50] sm:$0xff] }
 0xd14   :  { %v5937_v24 = vpack.c.bf16 %v6435_v51, %v6434_v19 }
 0xd15   :  { %v1862_v31 = vpop.permute.xlu1 %1861 }
 0xd1c   :  { %v6481_v8 = vpop.eup %6480 }
 0xd1d   :  { %v1777_v11 = vsel %vm378_vm0, %v6481_v8, 0.0 }
 0xd1e   :  { %1778 = vadd.xlane.f32.xlu0 %v1777_v11 }
 0xd34   :  { %6427 = vrot.lane.b32.xlu0 %v7619_v9, %s8527_s18 }
 0xdab   :  { %v1779_v12 = vpop.xlane.xlu0 %1778 }
 0xdac   :  { %6482 = vrcp.f32 %v1779_v12  ;;  %v2062_v12 = vld [vmem:[#allocation8 + $0x60] sm:$0xff] }
 0xdaf   :  { %v6428_v13 = vpop.permute.xlu0 %6427 }
 0xdb0   :  { %v6430_v14 = vunpack.i.h.bf16 %v6428_v13  ;;  %v6429_v15 = vunpack.i.l.bf16 %v6428_v13  ;;  %v2063_v13 = vld [vmem:[#allocation8 + $0x68] sm:$0xff] }
 0xdb2   :  { %v5934_v21 = vpack.c.bf16 %v6430_v14, %v6429_v15  ;;  %v5967_v14 = vpack.c.bf16 %v2063_v13, %v2062_v12  ;;  %v2064_v15 = vld [vmem:[#allocation8 + $0x70] sm:$0xff]  ;;  %v2174_v12 = vld [vmem:[%s8503_s7 + $0x40] sm:$0xff] }
 0xdb4   :  { %5935 = vmatpush3.bf16.msra.mxu1 %v5934_v21  ;;  %v2065_v21 = vld [vmem:[#allocation8 + $0x78] sm:$0xff] }
 0xdb5   :  { %5936 = vmatprep.subr.bf16.mxu1 %v7014_v29  ;;  %v5971_v16 = vpack.c.bf16 %v2065_v21, %v2064_v15  ;;  %v2283_v15 = vld [vmem:[#allocation10 + $0x40] sm:$0xff]  ;;  %v2285_v21 = vld [vmem:[#allocation10 + $0x50] sm:$0xff] }
 0xdb6   :  { %v6483_v20 = vpop.eup %6482 }
 0xdb7   :  { %v1781_v23 = vmul.f32 %v6483_v20, %v6481_v8  ;;  %v2061_v8 = vld [vmem:[#allocation8 + $0x58] sm:$0xff] }
 0xdb8   :  { %v5963_v11 = vpack.c.bf16 %v2061_v8, %v2060_v7  ;;  %v5983_v7 = vpack.c.bf16 %v2177_v3, %v2175_v2  ;;  %v2284_v8 = vld [vmem:[#allocation10 + $0x48] sm:$0xff]  ;;  %v2193_v3 = vld [vmem:[%s8503_s7 + $0xd8] sm:$0xff] }
 0xdb9   :  { %5590 = vmatmul.mubr.msk.f32.vlgmr.msra.gmra.mrb[18].mxu1 %vm378_vm0, %v1781_v23 }
 0xdba   :  { %5596 = vmatprep.mubr.msk.f32.mxu1 %vm7015_vm5, %v7004_v47 }
 0xdbd   :  { %5939 = vmatpush3.bf16.xpose.msk.msra.mxu1 %vm7504_vm6, %v5937_v24 }
 0xdc4   :  { %5597 = vmatmul.mubr.msk.f32.vlgmr.msra.gmra.mrb[20].mxu1 %vm481_vm2, %v1862_v31 }
 0xdc5   :  { %2262 = vmatprep.mubr.f32.mxu1 %v7004_v47 }
 0xe8c   :  { %v1857_v25 = vpop.f32.mrb[18].mxu1 }
 0xe8d   :  { %v6446_v26 = vpack.i.bf16 %v1857_v25, %v7579_v10  ;;  %v5591_v28 = vpop.f32.mrb[19].mxu1 }
 0xe97   :  { %v1939_v27 = vpop.f32.mrb[20].mxu1 }
 0xe98   :  { %v1943_v34 = vmul.f32 0.17677669, %v1939_v27  ;;  %v5598_v35 = vpop.f32.mrb[21].mxu1 }
 0xe9a   :  { %v1944_v45 = vsel %vm7368_vm1, %v1943_v34, -1e+30 }
 0xe9b   :  { %v1945_v36 = vsel %vm378_vm0, %v1944_v45, -inf }
 0xe9c   :  { %1946 = vmax.xlane.f32.xlu0 %v1945_v36 }
 0xeb2   :  { %6437 = vrot.lane.b32.xlu0 %v7619_v9, %s8529_s1 }
 0xeb6   :  { %6447 = vrot.lane.b32.xlu0 %v6446_v26, %s8527_s18 }
 0xf29   :  { %v1947_v37 = vpop.xlane.xlu0 %1946 }
 0xf2a   :  { %v1948_v39 = vsub.f32 %v1944_v45, %v1947_v37 }
 0xf2c   :  { %v1949_v41 = vmul.f32 1.442695, %v1948_v39 }
 0xf2d   :  { %v6438_v42 = vpop.permute.xlu0 %6437 }
 0xf2e   :  { %6484 = vpow2.f32 %v1949_v41  ;;  %v6440_v10 = vunpack.i.h.bf16 %v6438_v42  ;;  %v6439_v44 = vunpack.i.l.bf16 %v6438_v42  ;;  %v2276_v42 = vld [vmem:[#allocation10 + $0x8] sm:$0xff] }
 0xf30   :  { %v5941_v30 = vpack.c.bf16 %v6440_v10, %v6439_v44  ;;  %v2278_v44 = vld [vmem:[#allocation10 + $0x18] sm:$0xff] }
 0xf31   :  { %v6448_v25 = vpop.permute.xlu0 %6447 }
 0xf32   :  { %5942 = vmatpush3.bf16.msra.mxu0 %v5941_v30  ;;  %v6450_v27 = vunpack.i.h.bf16 %v6448_v25  ;;  %v6449_v34 = vunpack.i.l.bf16 %v6448_v25  ;;  %v2166_v30 = vld [vmem:[%s8503_s7] sm:$0xff] }
 0xf33   :  { %5944 = vmatprep.subr.bf16.mxu0 %v5943_v55 }
 0xf38   :  { %v6485_v49 = vpop.eup %6484 }
 0xf39   :  { %v1951_v50 = vsel %vm378_vm0, %v6485_v49, 0.0 }
 0xf3a   :  { %1952 = vadd.xlane.f32.xlu1 %v1951_v50  ;;  %v6007_v50 = vpack.c.bf16 %v2278_v44, %v2276_v42  ;;  %v2182_v44 = vld [vmem:[%s8503_s7 + $0x80] sm:$0xff] }
 0xf4b   :  { %6442 = vrot.lane.b32.xlu1 %v6441_v60, %s8529_s1  ;;  %v2057_v60 = vld [vmem:[#allocation8 + $0x38] sm:$0xff] }
 0xf4c   :  { %v5955_v32 = vpack.c.bf16 %v2057_v60, %v2056_v62  ;;  %v2279_v62 = vld [vmem:[#allocation10 + $0x20] sm:$0xff] }
 0xfc7   :  { %v1953_v46 = vpop.xlane.xlu1 %1952 }
 0xfc8   :  { %6486 = vrcp.f32 %v1953_v46 }
 0xfcb   :  { %v6443_v23 = vpop.permute.xlu1 %6442 }
 0xfcc   :  { %v6445_v24 = vunpack.i.h.bf16 %v6443_v23  ;;  %v6444_v31 = vunpack.i.l.bf16 %v6443_v23 }
 0xfce   :  { %v2047_v26 = vsel %vm481_vm2, %v7609_v59, %v6445_v24  ;;  %v1337_v28 = vsel %vm481_vm2, %v7546_v40, %v6444_v31  ;;  %v2167_v40 = vld [vmem:[%s8503_s7 + $0x8] sm:$0xff]  ;;  %v2169_v59 = vld [vmem:[%s8503_s7 + $0x18] sm:$0xff] }
 0xfcf   :  { %v2048_v37 = vsel %vm484_vm3, %v2047_v26, %v6450_v27  ;;  %v5975_v10 = vpack.c.bf16 %v2169_v59, %v2167_v40  ;;  %v2179_v26 = vld [vmem:[%s8503_s7 + $0x68] sm:$0xff]  ;;  %v2185_v40 = vld [vmem:[%s8503_s7 + $0x98] sm:$0xff] }
 0xfd0   :  { %v2292_v59 = vld [vmem:[#allocation10 + $0x88] sm:$0xff] }
 0xfd1   :  { %5976 = vmatprep.subr.bf16.mxu1 %v5975_v10  ;;  %v2294_v10 = vld [vmem:[#allocation10 + $0x98] sm:$0xff] }
 0xfd2   :  { %v6487_v9 = vpop.eup %6486 }
 0xfd3   :  { %v1955_v52 = vmul.f32 %v6487_v9, %v6485_v49  ;;  %v2168_v49 = vld [vmem:[%s8503_s7 + $0x10] sm:$0xff]  ;;  %v2275_v9 = vld [vmem:[#allocation10] sm:$0xff] }
 0xfd4   :  { %v5977_v46 = vpack.c.bf16 %v2168_v49, %v2166_v30  ;;  %v2184_v30 = vld [vmem:[%s8503_s7 + $0x90] sm:$0xff]  ;;  %v6023_v49 = vpack.c.bf16 %v2294_v10, %v2292_v59 }
 0xfd5   :  { %5604 = vmatmul.mubr.msk.f32.vlgmr.msra.gmra.mrb[14].mxu0 %vm378_vm0, %v1955_v52  ;;  %v2277_v52 = vld [vmem:[#allocation10 + $0x10] sm:$0xff] }
 0xfd6   :  { %5946 = vmatpush3.bf16.msra.mxu0 %v5943_v55  ;;  %v6009_v54 = vpack.c.bf16 %v2277_v52, %v2275_v9  ;;  %v2280_v55 = vld [vmem:[#allocation10 + $0x28] sm:$0xff]  ;;  %5978 = vmatpush1.bf16.msra.mxu1 %v5977_v46  ;;  %v2291_v46 = vld [vmem:[#allocation10 + $0x80] sm:$0xff]  ;;  %v2293_v9 = vld [vmem:[#allocation10 + $0x90] sm:$0xff] }
 0xfd7   :  { %5948 = vmatprep.subr.bf16.mxu0 %v5947_v58  ;;  %v6011_v61 = vpack.c.bf16 %v2282_v57, %v2280_v55  ;;  %v6025_v52 = vpack.c.bf16 %v2293_v9, %v2291_v46  ;;  %v2298_v57 = vld [vmem:[#allocation10 + $0xb8] sm:$0xff]  ;;  %v2433_v46 = vld [vmem:[#allocation11 + $0x88] sm:$0xff] }
 0xfda   :  { %5950 = vmatpush3.bf16.msra.mxu0 %v5947_v58  ;;  %v5979_v58 = vpack.c.bf16 %v2173_v18, %v2171_v53  ;;  %v2187_v53 = vld [vmem:[%s8503_s7 + $0xa8] sm:$0xff] }
 0xfdb   :  { %5952 = vmatprep.subr.bf16.mxu0 %v5951_v17  ;;  %v2296_v18 = vld [vmem:[#allocation10 + $0xa8] sm:$0xff] }
 0xfdc   :  { %5980 = vmatprep.subr.bf16.mxu1 %v5979_v58  ;;  %v2186_v58 = vld [vmem:[%s8503_s7 + $0xa0] sm:$0xff] }
 0xfde   :  { %5954 = vmatpush3.bf16.msra.mxu0 %v5951_v17  ;;  %v2172_v17 = vld [vmem:[%s8503_s7 + $0x30] sm:$0xff] }
 0xfdf   :  { %5956 = vmatprep.subr.bf16.mxu0 %v5955_v32  ;;  %v5981_v60 = vpack.c.bf16 %v2172_v17, %v2170_v33  ;;  %v6027_v33 = vpack.c.bf16 %v2298_v57, %v2296_v18  ;;  %v2434_v18 = vld [vmem:[#allocation11 + $0x90] sm:$0xff] }
 0xfe1   :  { %5982 = vmatpush1.bf16.msra.mxu1 %v5981_v60  ;;  %v2297_v60 = vld [vmem:[#allocation10 + $0xb0] sm:$0xff] }
 0xfe2   :  { %5958 = vmatpush3.bf16.msra.mxu0 %v5955_v32  ;;  %v2281_v32 = vld [vmem:[#allocation10 + $0x30] sm:$0xff]  ;;  %5984 = vmatprep.subr.bf16.mxu1 %v5983_v7  ;;  %v2302_v7 = vld [vmem:[#allocation10 + $0xd8] sm:$0xff] }
 0xfe3   :  { %5960 = vmatprep.subr.bf16.mxu0 %v5959_v6 }
 0xfe6   :  { %5962 = vmatpush3.bf16.msra.mxu0 %v5959_v6  ;;  %v6013_v6 = vpack.c.bf16 %v2281_v32, %v2279_v62  ;;  %v2295_v62 = vld [vmem:[#allocation10 + $0xa0] sm:$0xff]  ;;  %v2191_v32 = vld [vmem:[%s8503_s7 + $0xc8] sm:$0xff] }
 0xfe7   :  { %5964 = vmatprep.subr.bf16.mxu0 %v5963_v11  ;;  %v6029_v2 = vpack.c.bf16 %v2297_v60, %v2295_v62  ;;  %v2437_v62 = vld [vmem:[#allocation11 + $0xa8] sm:$0xff] }
 0xfea   :  { %5966 = vmatpush3.bf16.msra.mxu0 %v5963_v11  ;;  %v2286_v11 = vld [vmem:[#allocation10 + $0x58] sm:$0xff] }
 0xfeb   :  { %5968 = vmatprep.subr.bf16.mxu0 %v5967_v14  ;;  %v6015_v13 = vpack.c.bf16 %v2286_v11, %v2284_v8  ;;  %v5999_v8 = vpack.c.bf16 %v2193_v3, %v2191_v32  ;;  %v2420_v32 = vld [vmem:[#allocation11 + $0x20] sm:$0xff] }
 0xfee   :  { %5970 = vmatpush3.bf16.msra.mxu0 %v5967_v14  ;;  %v2176_v14 = vld [vmem:[%s8503_s7 + $0x50] sm:$0xff] }
 0xfef   :  { %5972 = vmatprep.subr.bf16.mxu0 %v5971_v16 }
 0xff2   :  { %5974 = vmatpush3.bf16.msra.mxu0 %v5971_v16  ;;  %v5985_v16 = vpack.c.bf16 %v2176_v14, %v2174_v12  ;;  %v2190_v12 = vld [vmem:[%s8503_s7 + $0xc0] sm:$0xff] }
 0xff3   :  { %6008 = vmatprep.subr.bf16.mxu0 %v6007_v50  ;;  %v5993_v50 = vpack.c.bf16 %v2184_v30, %v2182_v44  ;;  %v2299_v14 = vld [vmem:[#allocation10 + $0xc0] sm:$0xff] }
 0xff4   :  { %5986 = vmatpush1.bf16.msra.mxu1 %v5985_v16  ;;  %v2195_v16 = vld [vmem:[%s8503_s7 + $0xe8] sm:$0xff] }
0x10a8   :  { %v2031_v51 = vpop.f32.mrb[14].mxu0 }
0x10a9   :  { %v6451_v19 = vpack.i.bf16 %v2031_v51, %v7650_v56  ;;  %v5605_v20 = vpop.f32.mrb[15].mxu0  ;;  %v1338_v56 = vsel %vm484_vm3, %v1337_v28, %v6449_v34  ;;  %v6017_v51 = vpack.c.bf16 %v2285_v21, %v2283_v15  ;;  %v2288_v28 = vld [vmem:[#allocation10 + $0x68] sm:$0xff]  ;;  %v2178_v34 = vld [vmem:[%s8503_s7 + $0x60] sm:$0xff]  ;;  %v2301_v21 = vld [vmem:[#allocation10 + $0xd0] sm:$0xff] }
0x10ab   :  { %6452 = vrot.lane.b32.xlu1 %v6451_v19, %s8525_s19 }
0x111d   :  { %v6453_v35 = vpop.permute.xlu1 %6452 }
0x111e   :  { %v6455_v45 = vunpack.i.h.bf16 %v6453_v35  ;;  %v6454_v36 = vunpack.i.l.bf16 %v6453_v35  ;;  %v2180_v35 = vld [vmem:[%s8503_s7 + $0x70] sm:$0xff] }
0x1120   :  { %v1339_v39 = vsel %vm487_vm4, %v1338_v56, %v6454_v36  ;;  %v2049_v41 = vsel %vm487_vm4, %v2048_v37, %v6455_v45  ;;  %v5989_v36 = vpack.c.bf16 %v2180_v35, %v2178_v34  ;;  %v2287_v56 = vld [vmem:[#allocation10 + $0x60] sm:$0xff]  ;;  %v2289_v37 = vld [vmem:[#allocation10 + $0x70] sm:$0xff] }
0x1121   :  { %5638 = vmatprep.mubr.f32.mxu0 %v1339_v39  ;;  %v6021_v39 = vpack.c.bf16 %v2289_v37, %v2287_v56 }
0x1122   :  { %5639 = vmatmul.mubr.f32.vlgmr.msra.gmra.mrb[16].mxu0 %v2049_v41  ;;  %v2183_v41 = vld [vmem:[%s8503_s7 + $0x88] sm:$0xff] }
0x1123   :  { %2371 = vmatprep.mubr.f32.mxu0 %v7004_v47  ;;  %6010 = vmatpush1.bf16.msra.mxu0 %v6009_v54  ;;  %v5991_v42 = vpack.c.bf16 %v2185_v40, %v2183_v41  ;;  %v2189_v54 = vld [vmem:[%s8503_s7 + $0xb8] sm:$0xff] }
0x1124   :  { %6012 = vmatprep.subr.bf16.mxu0 %v6011_v61  ;;  %v5995_v55 = vpack.c.bf16 %v2189_v54, %v2187_v53  ;;  %v2188_v61 = vld [vmem:[%s8503_s7 + $0xb0] sm:$0xff]  ;;  %v2417_v53 = vld [vmem:[#allocation11 + $0x8] sm:$0xff] }
0x1125   :  { %v5997_v17 = vpack.c.bf16 %v2188_v61, %v2186_v58  ;;  %v2418_v58 = vld [vmem:[#allocation11 + $0x10] sm:$0xff]  ;;  %v2419_v61 = vld [vmem:[#allocation11 + $0x18] sm:$0xff] }
0x1127   :  { %6014 = vmatpush1.bf16.msra.mxu0 %v6013_v6  ;;  %v2300_v6 = vld [vmem:[#allocation10 + $0xc8] sm:$0xff] }
0x1128   :  { %6016 = vmatprep.subr.bf16.mxu0 %v6015_v13  ;;  %v6031_v11 = vpack.c.bf16 %v2302_v7, %v2300_v6  ;;  %v2192_v13 = vld [vmem:[%s8503_s7 + $0xd0] sm:$0xff]  ;;  %v2439_v7 = vld [vmem:[#allocation11 + $0xb8] sm:$0xff] }
0x1129   :  { %v6001_v15 = vpack.c.bf16 %v2192_v13, %v2190_v12  ;;  %v2438_v6 = vld [vmem:[#allocation11 + $0xb0] sm:$0xff]  ;;  %v2423_v12 = vld [vmem:[#allocation11 + $0x38] sm:$0xff] }
0x112b   :  { %6018 = vmatpush1.bf16.msra.mxu0 %v6017_v51  ;;  %v2197_v51 = vld [vmem:[%s8503_s7 + $0xf8] sm:$0xff] }
0x11f5   :  { %v5640_v19 = vpop.f32.mrb[16].mxu0 }
0x11f6   :  { %v7729_v20 = vadd.f32 %v5640_v19, %v7180_v1  ;;  %v2132_v23 = vpop.f32.mrb[17].mxu0  ;;  %v2181_v1 = vld [vmem:[%s8503_s7 + $0x78] sm:$0xff]  ;;  %v6033_v19 = vpack.c.bf16 %v2301_v21, %v2299_v14  ;;  %v2440_v14 = vld [vmem:[#allocation11 + $0xc0] sm:$0xff] }
0x11f7   :  { %v7732_v24 = vadd.f32 %v2132_v23, %v7175_v0  ;;  %v5987_v27 = vpack.c.bf16 %v2181_v1, %v2179_v26  ;;  %v2290_v0 = vld [vmem:[#allocation10 + $0x78] sm:$0xff]  ;;  %v6003_v23 = vpack.c.bf16 %v2197_v51, %v2195_v16  ;;  %v2194_v26 = vld [vmem:[%s8503_s7 + $0xe0] sm:$0xff]  ;;  %v2425_v51 = vld [vmem:[#allocation11 + $0x48] sm:$0xff] }
0x11f8   :  { %v2145_v31 = vmul.f32 %v7729_v20, %v7729_v20  ;;  %v6019_v45 = vpack.c.bf16 %v2290_v0, %v2288_v28  ;;  %v2196_v28 = vld [vmem:[%s8503_s7 + $0xf0] sm:$0xff]  ;;  %v2424_v16 = vld [vmem:[#allocation11 + $0x40] sm:$0xff] }
0x11f9   :  { %v2144_v25 = vmul.f32 %v7732_v24, %v7732_v24  ;;  %5988 = vmatprep.subr.bf16.mxu1 %v5987_v27  ;;  %v2303_v27 = vld [vmem:[#allocation10 + $0xe0] sm:$0xff]  ;;  %v2305_v0 = vld [vmem:[#allocation10 + $0xf0] sm:$0xff]  ;;  %v6005_v34 = vpack.c.bf16 %v2196_v28, %v2194_v26 }
0x11fa   :  { %2148 = vadd.xlane.f32.xlu1 %v2145_v31  ;;  %6020 = vmatprep.subr.bf16.mxu0 %v6019_v45  ;;  %v2304_v31 = vld [vmem:[#allocation10 + $0xe8] sm:$0xff]  ;;  %v6037_v35 = vpack.c.bf16 %v2305_v0, %v2303_v27  ;;  %v2426_v26 = vld [vmem:[#allocation11 + $0x50] sm:$0xff]  ;;  %v2444_v27 = vld [vmem:[#allocation11 + $0xe0] sm:$0xff] }
0x11fb   :  { %2146 = vadd.xlane.f32.xlu0 %v2144_v25  ;;  %5990 = vmatpush1.bf16.msra.mxu1 %v5989_v36  ;;  %v2306_v25 = vld [vmem:[#allocation10 + $0xf8] sm:$0xff]  ;;  %v2445_v0 = vld [vmem:[#allocation11 + $0xe8] sm:$0xff] }
0x11fc   :  { %6022 = vmatpush1.bf16.msra.mxu0 %v6021_v39  ;;  %5992 = vmatprep.subr.bf16.mxu1 %v5991_v42  ;;  %v6035_v1 = vpack.c.bf16 %v2306_v25, %v2304_v31  ;;  %v5133_v42 = vld [vmem:[%s8502_s6] ss:$0 sm:$0xff]  ;;  %v2443_v31 = vld [vmem:[#allocation11 + $0xd8] sm:$0xff] }
0x11fd   :  { %6024 = vmatprep.subr.bf16.mxu0 %v6023_v49 }
0x11ff   :  { %5994 = vmatpush1.bf16.msra.mxu1 %v5993_v50  ;;  %v2432_v50 = vld [vmem:[#allocation11 + $0x80] sm:$0xff] }
0x1200   :  { %6026 = vmatpush1.bf16.msra.mxu0 %v6025_v52  ;;  %5996 = vmatprep.subr.bf16.mxu1 %v5995_v55  ;;  %v6039_v9 = vpack.c.bf16 %v2433_v46, %v2432_v50  ;;  %v2416_v52 = vld [vmem:[#allocation11] sm:$0xff]  ;;  %v2435_v55 = vld [vmem:[#allocation11 + $0x98] sm:$0xff] }
0x1201   :  { %6028 = vmatprep.subr.bf16.mxu0 %v6027_v33  ;;  %v6041_v54 = vpack.c.bf16 %v2417_v53, %v2416_v52  ;;  %v6043_v57 = vpack.c.bf16 %v2435_v55, %v2434_v18  ;;  %v6045_v33 = vpack.c.bf16 %v2419_v61, %v2418_v58 }
0x1203   :  { %5998 = vmatpush1.bf16.msra.mxu1 %v5997_v17  ;;  %v2436_v17 = vld [vmem:[#allocation11 + $0xa0] sm:$0xff] }
0x1204   :  { %6030 = vmatpush1.bf16.msra.mxu0 %v6029_v2  ;;  %6000 = vmatprep.subr.bf16.mxu1 %v5999_v8  ;;  %v6047_v60 = vpack.c.bf16 %v2437_v62, %v2436_v17  ;;  %v2421_v2 = vld [vmem:[#allocation11 + $0x28] sm:$0xff]  ;;  %v6051_v8 = vpack.c.bf16 %v2439_v7, %v2438_v6 }
0x1205   :  { %6032 = vmatprep.subr.bf16.mxu0 %v6031_v11  ;;  %v6049_v3 = vpack.c.bf16 %v2421_v2, %v2420_v32  ;;  %v2422_v11 = vld [vmem:[#allocation11 + $0x30] sm:$0xff] }
0x1206   :  { %v6053_v13 = vpack.c.bf16 %v2423_v12, %v2422_v11 }
0x1207   :  { %6002 = vmatpush1.bf16.msra.mxu1 %v6001_v15  ;;  %v2441_v15 = vld [vmem:[#allocation11 + $0xc8] sm:$0xff] }
0x1208   :  { %6034 = vmatpush1.bf16.msra.mxu0 %v6033_v19  ;;  %6004 = vmatprep.subr.bf16.mxu1 %v6003_v23  ;;  %v6055_v21 = vpack.c.bf16 %v2441_v15, %v2440_v14  ;;  %v6057_v19 = vpack.c.bf16 %v2425_v51, %v2424_v16  ;;  %v2442_v23 = vld [vmem:[#allocation11 + $0xd0] sm:$0xff] }
0x1209   :  { %6036 = vmatprep.subr.bf16.mxu0 %v6035_v1  ;;  %v6059_v25 = vpack.c.bf16 %v2443_v31, %v2442_v23  ;;  %v2427_v1 = vld [vmem:[#allocation11 + $0x58] sm:$0xff] }
0x120a   :  { %v6061_v28 = vpack.c.bf16 %v2427_v1, %v2426_v26 }
0x120b   :  { %6006 = vmatpush1.bf16.msra.mxu1 %v6005_v34  ;;  %v6063_v34 = vpack.c.bf16 %v2445_v0, %v2444_v27 }
0x120c   :  { %6038 = vmatpush1.bf16.msra.mxu0 %v6037_v35  ;;  %6040 = vmatprep.subr.bf16.mxu1 %v6039_v9  ;;  %v2428_v35 = vld [vmem:[#allocation11 + $0x60] sm:$0xff] }
0x1287   :  { %v2149_v45 = vpop.xlane.xlu1 %2148 }
0x1288   :  { %v2151_v36 = vmul.f32 0.0078125, %v2149_v45  ;;  %v2147_v56 = vpop.xlane.xlu0 %2146  ;;  %v2429_v45 = vld [vmem:[#allocation11 + $0x68] sm:$0xff] }
0x1289   :  { %v2150_v37 = vmul.f32 0.0078125, %v2147_v56  ;;  %v2446_v56 = vld [vmem:[#allocation11 + $0xf0] sm:$0xff] }
0x128a   :  { %v2153_v39 = vadd.f32 1e-06, %v2151_v36  ;;  %v6065_v36 = vpack.c.bf16 %v2429_v45, %v2428_v35 }
0x128b   :  { %v2152_v41 = vadd.f32 1e-06, %v2150_v37  ;;  %v2447_v37 = vld [vmem:[#allocation11 + $0xf8] sm:$0xff] }
0x128c   :  { %6488 = vrsqrt.f32 %v2153_v39  ;;  %v6067_v39 = vpack.c.bf16 %v2447_v37, %v2446_v56 }
0x128d   :  { %6490 = vrsqrt.f32 %v2152_v41  ;;  %v2430_v41 = vld [vmem:[#allocation11 + $0x70] sm:$0xff] }
0x1296   :  { %v6489_v40 = vpop.eup %6488 }
0x1297   :  { %v6491_v59 = vpop.eup %6490  ;;  %v2157_v30 = vmul.f32 %v6489_v40, %v7729_v20  ;;  %v2431_v40 = vld [vmem:[#allocation11 + $0x78] sm:$0xff] }
0x1298   :  { %v2156_v10 = vmul.f32 %v6491_v59, %v7732_v24  ;;  %v6069_v59 = vpack.c.bf16 %v2431_v40, %v2430_v41 }
0x1299   :  { %v2165_v49 = vmul.f32 %v5133_v42, %v2157_v30 }
0x129a   :  { %v2164_v44 = vmul.f32 %v5133_v42, %v2156_v10 }
0x129c   :  { %2263 = vmatmul.mubr.f32.vlgmr.msra.gmra.mrb[22].mxu1 %v2164_v44  ;;  %2372 = vmatmul.mubr.f32.vlgmr.msra.gmra.mrb[18].mxu0 %v2164_v44 }
0x129d   :  { %2268 = vmatprep.mubr.f32.mxu1 %v7004_v47  ;;  %2377 = vmatprep.mubr.f32.mxu0 %v7004_v47 }
0x129e   :  { %6042 = vmatpush3.bf16.msra.mxu1 %v6041_v54 }
0x129f   :  { %6044 = vmatprep.subr.bf16.mxu1 %v6043_v57 }
0x12a0   :  { %2269 = vmatmul.mubr.f32.gmra.mrb[24].mxu1 %v2165_v49  ;;  %2378 = vmatmul.mubr.f32.gmra.mrb[20].mxu0 %v2165_v49 }
0x12a2   :  { %6046 = vmatpush3.bf16.msra.mxu1 %v6045_v33 }
0x12a3   :  { %6048 = vmatprep.subr.bf16.mxu1 %v6047_v60 }
0x12a6   :  { %6050 = vmatpush3.bf16.msra.mxu1 %v6049_v3 }
0x12a7   :  { %6052 = vmatprep.subr.bf16.mxu1 %v6051_v8 }
0x12aa   :  { %6054 = vmatpush3.bf16.msra.mxu1 %v6053_v13 }
0x12ab   :  { %6056 = vmatprep.subr.bf16.mxu1 %v6055_v21 }
0x12ae   :  { %6058 = vmatpush3.bf16.msra.mxu1 %v6057_v19 }
0x12af   :  { %6060 = vmatprep.subr.bf16.mxu1 %v6059_v25 }
0x12b2   :  { %6062 = vmatpush3.bf16.msra.mxu1 %v6061_v28 }
0x12b3   :  { %6064 = vmatprep.subr.bf16.mxu1 %v6063_v34 }
0x12b6   :  { %6066 = vmatpush3.bf16.msra.mxu1 %v6065_v36 }
0x12b7   :  { %6068 = vmatprep.subr.bf16.mxu1 %v6067_v39 }
0x12ba   :  { %6070 = vmatpush3.bf16.msra.mxu1 %v6069_v59 }
0x136f   :  { %v2264_v42 = vpop.f32.mrb[22].mxu1  ;;  %v2373_v10 = vpop.f32.mrb[18].mxu0 }
0x1370   :  { %v5134_v44 = vmul.f32 -1.442695, %v2264_v42  ;;  %v2266_v30 = vpop.f32.mrb[23].mxu1  ;;  %v2375_v49 = vpop.f32.mrb[19].mxu0 }
0x1371   :  { %v5135_v50 = vmul.f32 -1.442695, %v2266_v30 }
0x1372   :  { %6492 = vpow2.f32 %v5134_v44 }
0x1373   :  { %6494 = vpow2.f32 %v5135_v50  ;;  %v2270_v46 = vpop.f32.mrb[24].mxu1  ;;  %v2379_v9 = vpop.f32.mrb[20].mxu0 }
0x1374   :  { %v5136_v52 = vmul.f32 -1.442695, %v2270_v46  ;;  %v2272_v53 = vpop.f32.mrb[25].mxu1  ;;  %v2381_v54 = vpop.f32.mrb[21].mxu0 }
0x1375   :  { %v5137_v18 = vmul.f32 -1.442695, %v2272_v53 }
0x1376   :  { %6496 = vpow2.f32 %v5136_v52 }
0x1377   :  { %6498 = vpow2.f32 %v5137_v18 }
0x137c   :  { %v6493_v55 = vpop.eup %6492 }
0x137d   :  { %v6495_v57 = vpop.eup %6494  ;;  %v2396_v58 = vadd.f32 1.0, %v6493_v55 }
0x137e   :  { %v2397_v61 = vadd.f32 1.0, %v6495_v57 }
0x137f   :  { %6500 = vrcp.f32 %v2396_v58 }
0x1380   :  { %v6497_v33 = vpop.eup %6496  ;;  %6502 = vrcp.f32 %v2397_v61 }
0x1381   :  { %v6499_v17 = vpop.eup %6498  ;;  %v2398_v62 = vadd.f32 1.0, %v6497_v33 }
0x1382   :  { %v2399_v60 = vadd.f32 1.0, %v6499_v17 }
0x1383   :  { %6504 = vrcp.f32 %v2398_v62 }
0x1384   :  { %6506 = vrcp.f32 %v2399_v60 }
0x1389   :  { %v6501_v32 = vpop.eup %6500 }
0x138a   :  { %v6503_v2 = vpop.eup %6502  ;;  %v2408_v3 = vmul.f32 %v6501_v32, %v2264_v42 }
0x138b   :  { %v2409_v6 = vmul.f32 %v6503_v2, %v2266_v30 }
0x138c   :  { %v2412_v7 = vmul.f32 %v2408_v3, %v2373_v10 }
0x138d   :  { %v6505_v8 = vpop.eup %6504  ;;  %v2413_v11 = vmul.f32 %v2409_v6, %v2375_v49 }
0x138e   :  { %v6507_v12 = vpop.eup %6506  ;;  %v2410_v13 = vmul.f32 %v6505_v8, %v2270_v46 }
0x138f   :  { %v2411_v14 = vmul.f32 %v6507_v12, %v2272_v53  ;;  %2512 = vmatprep.mubr.f32.mxu1 %v2413_v11 }
0x1390   :  { %v2414_v15 = vmul.f32 %v2410_v13, %v2379_v9  ;;  %2513 = vmatmul.mubr.f32.vlgmr.msra.gmra.mrb[26].mxu1 %v2412_v7 }
0x1391   :  { %v2415_v21 = vmul.f32 %v2411_v14, %v2381_v54 }
0x1393   :  { %2517 = vmatprep.mubr.f32.mxu1 %v2415_v21 }
0x1394   :  { %2518 = vmatmul.mubr.f32.gmra.mrb[28].mxu1 %v2414_v15 }
0x1395   :  { %6808 = shalt.err (!%p8532_p11)  }
0x1396   :  { %s6821_s22 = scalar_lea.hbm %s8511_s15, 384  ;;  %s8534_s29 = scalar_lea.hbm %s8511_s15, 2048 }
0x1397   :  { %p6810_p12 = scmp.ne.s32.totalorder %s617_s21, %s6821_s22  ;;  %p6812_p0 = scmp.lt.u32.totalorder %s617_s21, %s8511_s15 }
0x1398   :  { %p6813_p1 = scmp.lt.u32.totalorder %s8534_s29, %s6821_s22  ;;  %p6815_p9 = scmp.lt.u32.totalorder %s6821_s22, %s617_s21 }
0x139a   :  { %p6814_p8 = por %p6813_p1, %p6812_p0 }
0x139c   :  { %p6816_p11 = por %p6815_p9, %p6814_p8 }
0x139e   :  { %p6817_p4 = pnand %p6816_p11, %p6810_p12 }
0x13a0   :  { %6820 = shalt.err (!%p6817_p4)  }
0x13a1   :  { %623 = dma.vmem_to_hbm [thread:$0]  %s7808_s28, 256, %s617_s21, [#allocation4 + $0x2], %s8535_s4, %s8537_s26, %s8539_s17 }
0x13a2   :  { %s625_s19 = scalar_lea.hbm %s8512_s16, 128  ;;  %s7017_s27 = smov [#allocation3 + $0x8]  }
0x13a3   :  { %s628_s1 = sshll.u32 %s7017_s27, 4  ;;  %s8570_s21 = scalar_lea.vmem %s7375_s30, 512  ;;  %s7853_s1 = int_to_ptr.vmem [resolvable:$true] %s628_s1 }
0x13a4   :  { %8567 = sst [smem:[#allocation35_spill]] %s7853_s1  ;;  %s6822_s24 = scalar_lea.vmem %s7853_s1, 256 }
0x13a5   :  { %p7857_p4 = scmp.ne.s32.totalorder %s7853_s1, %s6822_s24  ;;  %p6827_p11 = scmp.lt.s32.totalorder %s7853_s1, %s7375_s30 }
0x13a6   :  { %p6828_p12 = scmp.lt.s32.totalorder %s8570_s21, %s6822_s24 }
0x13a7   :  { %s8568_s11 = scalar_select %p7857_p4, 1, 0 }
0x13a8   :  { %p7865_p0 = por %p6828_p12, %p6827_p11 }
0x13a9   :  { %8569 = sst [smem:[#allocation36_spill]] %s8568_s11 }
0x13aa   :  { %s8571_s22 = scalar_select %p7865_p0, 1, 0 }
0x13ab   :  { %p8541_p1 = pnand %p7865_p0, %p7857_p4 }
0x13ac   :  { %8572 = sst [smem:[#allocation37_spill]] %s8571_s22 }
0x13ad   :  { %6833 = shalt.err (!%p8541_p1)  }
0x13ae   :  { %s6846_s18 = scalar_lea.hbm %s8512_s16, 384  ;;  %s8544_s21 = scalar_lea.hbm %s8512_s16, 2048 }
0x13af   :  { %p6835_p8 = scmp.ne.s32.totalorder %s625_s19, %s6846_s18  ;;  %p6837_p9 = scmp.lt.u32.totalorder %s625_s19, %s8512_s16 }
0x13b0   :  { %p6838_p11 = scmp.lt.u32.totalorder %s8544_s21, %s6846_s18  ;;  %p6840_p1 = scmp.lt.u32.totalorder %s6846_s18, %s625_s19 }
0x13b2   :  { %p6839_p12 = por %p6838_p11, %p6837_p9 }
0x13b4   :  { %p6841_p7 = por %p6840_p1, %p6839_p12 }
0x13b6   :  { %p6842_p4 = pnand %p6841_p7, %p6835_p8 }
0x13b8   :  { %6845 = shalt.err (!%p6842_p4)  }
0x13b9   :  { %s8573_s23 = smov 8   ;;  %s8574_s9 = smov 512  }
0x13ba   :  { %s8575_s10 = smov 256  }
0x13bb   :  { %631 = dma.vmem_to_hbm [thread:$0]  %s7853_s1, 256, %s625_s19, [#allocation4 + $0x3], %s8575_s10, %s8574_s9, %s8573_s23 }
0x1463   :  { %v5331_v16 = vpop.f32.mrb[26].mxu1 }
0x1464   :  { %v5332_v51 = vpop.f32.mrb[27].mxu1 }
0x1465   :  { %v5333_v19 = vadd.f32 %v5332_v51, %v5331_v16 }
0x1467   :  { %v7896_v23 = vadd.f32 %v5333_v19, %v7732_v24  ;;  %v5334_v31 = vpop.f32.mrb[28].mxu1 }
0x1468   :  { %v5335_v25 = vpop.f32.mrb[29].mxu1 }
0x1469   :  { %v5336_v26 = vadd.f32 %v5335_v25, %v5334_v31 }
0x146b   :  { %v7899_v1 = vadd.f32 %v5336_v26, %v7729_v20 }
0x146c   :  { %6979 = dma.done.wait [#allocation4 + $0x2], 256 }
0x146d   :  { %6980 = vsyncadd [#allocation4 + $0x2], 4294967040  ;;  %v2543_v28 = vmul.f32 %v7896_v23, %v7896_v23 }
0x146e   :  { %6981 = dma.done.wait [#allocation4 + $0x3], 256 }
0x146f   :  { %6982 = vsyncadd [#allocation4 + $0x3], 4294967040  ;;  %2678 = vmatprep.mubr.f32.mxu0 %v7004_v47  ;;  %2545 = vadd.xlane.f32.xlu0 %v2543_v28  ;;  %v2544_v24 = vmul.f32 %v7899_v1, %v7899_v1  ;;  %v2567_v27 = vld [vmem:[#allocation5 + $0x188] sm:$0xff]  ;;  %v2570_v0 = vld [vmem:[#allocation5 + $0x1a0] sm:$0xff]  ;;  %s8576_s26 = smov 80   ;;  %s8577_s29 = smov 112  }
0x1470   :  { %v2566_v34 = vld [vmem:[#allocation5 + $0x180] sm:$0xff]  ;;  %v6071_v35 = vpack.c.bf16 %v2570_v0, %v2567_v27  ;;  %v2569_v20 = vld [vmem:[#allocation5 + $0x198] sm:$0xff]  ;;  %v2576_v36 = vld [vmem:[#allocation5 + $0x1d0] sm:$0xff]  ;;  %s8579_s19 = smov 16   ;;  %s8580_s18 = smov 32  }
0x1471   :  { %v2573_v45 = vld [vmem:[#allocation5 + $0x1b8] sm:$0xff]  ;;  %v6073_v56 = vpack.c.bf16 %v2569_v20, %v2566_v34  ;;  %v2572_v39 = vld [vmem:[#allocation5 + $0x1b0] sm:$0xff]  ;;  %v2575_v41 = vld [vmem:[#allocation5 + $0x1c8] sm:$0xff]  ;;  %s8581_s27 = smov 64   ;;  %s8582_s24 = smov 96  }
0x1472   :  { %v6075_v37 = vpack.c.bf16 %v2576_v36, %v2573_v45  ;;  %v2579_v40 = vld [vmem:[#allocation5 + $0x1e8] sm:$0xff]  ;;  %6072 = vmatprep.subr.bf16.mxu0 %v6071_v35  ;;  %v2582_v59 = vld [vmem:[#allocation5 + $0x200] sm:$0xff]  ;;  %v6077_v42 = vpack.c.bf16 %v2575_v41, %v2572_v39  ;;  %v2581_v30 = vld [vmem:[#allocation5 + $0x1f8] sm:$0xff]  ;;  %s6871_s21 = scalar_lea.hbm %s8508_s12, 1280  ;;  %s8583_s22 = scalar_lea.hbm %s8508_s12, 2048 }
0x1473   :  { %2547 = vadd.xlane.f32.xlu0 %v2544_v24  ;;  %6074 = vmatpush1.bf16.msra.mxu0 %v6073_v56  ;;  %v6079_v10 = vpack.c.bf16 %v2582_v59, %v2579_v40  ;;  %v2578_v44 = vld [vmem:[#allocation5 + $0x1e0] sm:$0xff]  ;;  %v2585_v49 = vld [vmem:[#allocation5 + $0x218] sm:$0xff]  ;;  %v2588_v50 = vld [vmem:[#allocation5 + $0x230] sm:$0xff]  ;;  %p6851_p1 = scmp.lt.u32.totalorder %s8583_s22, %s6871_s21 }
0x1474   :  { %6076 = vmatprep.subr.bf16.mxu0 %v6075_v37  ;;  %v6081_v46 = vpack.c.bf16 %v2581_v30, %v2578_v44  ;;  %v6083_v9 = vpack.c.bf16 %v2588_v50, %v2585_v49  ;;  %v2584_v52 = vld [vmem:[#allocation5 + $0x210] sm:$0xff]  ;;  %v2587_v53 = vld [vmem:[#allocation5 + $0x228] sm:$0xff]  ;;  %v2594_v18 = vld [vmem:[#allocation5 + $0x260] sm:$0xff] }
0x1475   :  { %v2591_v54 = vld [vmem:[#allocation5 + $0x248] sm:$0xff]  ;;  %v6085_v55 = vpack.c.bf16 %v2587_v53, %v2584_v52  ;;  %v2590_v58 = vld [vmem:[#allocation5 + $0x240] sm:$0xff]  ;;  %v2593_v61 = vld [vmem:[#allocation5 + $0x258] sm:$0xff] }
0x1476   :  { %v6087_v57 = vpack.c.bf16 %v2594_v18, %v2591_v54  ;;  %v2597_v33 = vld [vmem:[#allocation5 + $0x278] sm:$0xff]  ;;  %v2600_v17 = vld [vmem:[#allocation5 + $0x290] sm:$0xff]  ;;  %v6089_v62 = vpack.c.bf16 %v2593_v61, %v2590_v58  ;;  %v2599_v2 = vld [vmem:[#allocation5 + $0x288] sm:$0xff] }
0x1477   :  { %6078 = vmatpush1.bf16.msra.mxu0 %v6077_v42  ;;  %v6091_v60 = vpack.c.bf16 %v2600_v17, %v2597_v33  ;;  %v2596_v32 = vld [vmem:[#allocation5 + $0x270] sm:$0xff]  ;;  %v2603_v3 = vld [vmem:[#allocation5 + $0x2a8] sm:$0xff]  ;;  %v2606_v6 = vld [vmem:[#allocation5 + $0x2c0] sm:$0xff] }
0x1478   :  { %6080 = vmatprep.subr.bf16.mxu0 %v6079_v10  ;;  %v6093_v7 = vpack.c.bf16 %v2599_v2, %v2596_v32  ;;  %v6095_v8 = vpack.c.bf16 %v2606_v6, %v2603_v3  ;;  %v2602_v11 = vld [vmem:[#allocation5 + $0x2a0] sm:$0xff]  ;;  %v2605_v12 = vld [vmem:[#allocation5 + $0x2b8] sm:$0xff]  ;;  %v2612_v14 = vld [vmem:[#allocation5 + $0x2f0] sm:$0xff] }
0x1479   :  { %v2609_v13 = vld [vmem:[#allocation5 + $0x2d8] sm:$0xff]  ;;  %v6097_v15 = vpack.c.bf16 %v2605_v12, %v2602_v11  ;;  %v2608_v16 = vld [vmem:[#allocation5 + $0x2d0] sm:$0xff]  ;;  %v2611_v51 = vld [vmem:[#allocation5 + $0x2e8] sm:$0xff] }
0x147a   :  { %v6099_v21 = vpack.c.bf16 %v2612_v14, %v2609_v13  ;;  %v6101_v19 = vpack.c.bf16 %v2611_v51, %v2608_v16  ;;  %v2568_v31 = vld [vmem:[#allocation5 + $0x190] sm:$0xff]  ;;  %v2571_v25 = vld [vmem:[#allocation5 + $0x1a8] sm:$0xff]  ;;  %v2574_v26 = vld [vmem:[#allocation5 + $0x1c0] sm:$0xff] }
0x147b   :  { %6082 = vmatpush1.bf16.msra.mxu0 %v6081_v46  ;;  %v6103_v28 = vpack.c.bf16 %v2571_v25, %v2568_v31  ;;  %v2577_v24 = vld [vmem:[#allocation5 + $0x1d8] sm:$0xff]  ;;  %v2580_v0 = vld [vmem:[#allocation5 + $0x1f0] sm:$0xff]  ;;  %v2583_v34 = vld [vmem:[#allocation5 + $0x208] sm:$0xff] }
0x147c   :  { %6084 = vmatprep.subr.bf16.mxu0 %v6083_v9  ;;  %v6107_v27 = vpack.c.bf16 %v2577_v24, %v2574_v26  ;;  %v6111_v35 = vpack.c.bf16 %v2583_v34, %v2580_v0  ;;  %v2586_v20 = vld [vmem:[#allocation5 + $0x220] sm:$0xff]  ;;  %v2589_v45 = vld [vmem:[#allocation5 + $0x238] sm:$0xff]  ;;  %v2592_v56 = vld [vmem:[#allocation5 + $0x250] sm:$0xff] }
0x147d   :  { %6104 = vmatprep.subr.bf16.mxu1 %v6103_v28  ;;  %v6115_v36 = vpack.c.bf16 %v2589_v45, %v2586_v20  ;;  %v2595_v37 = vld [vmem:[#allocation5 + $0x268] sm:$0xff]  ;;  %v2598_v41 = vld [vmem:[#allocation5 + $0x280] sm:$0xff]  ;;  %v2601_v40 = vld [vmem:[#allocation5 + $0x298] sm:$0xff] }
0x147e   :  { %6106 = vmatpush3.bf16.msra.mxu1 %v6103_v28  ;;  %v6119_v39 = vpack.c.bf16 %v2595_v37, %v2592_v56  ;;  %v6123_v59 = vpack.c.bf16 %v2601_v40, %v2598_v41  ;;  %v2604_v42 = vld [vmem:[#allocation5 + $0x2b0] sm:$0xff]  ;;  %v2607_v10 = vld [vmem:[#allocation5 + $0x2c8] sm:$0xff]  ;;  %v2610_v30 = vld [vmem:[#allocation5 + $0x2e0] sm:$0xff] }
0x147f   :  { %6086 = vmatpush1.bf16.msra.mxu0 %v6085_v55  ;;  %6108 = vmatprep.subr.bf16.mxu1 %v6107_v27  ;;  %v6127_v44 = vpack.c.bf16 %v2607_v10, %v2604_v42  ;;  %v2613_v49 = vld [vmem:[#allocation5 + $0x2f8] sm:$0xff] }
0x1480   :  { %6088 = vmatprep.subr.bf16.mxu0 %v6087_v57  ;;  %v6131_v50 = vpack.c.bf16 %v2613_v49, %v2610_v30  ;;  %v5139_v57 = vld [vmem:[%s8499_s3 + $0x1] ss:$0 sm:$0xff]  ;;  %s8578_s3 = smov 48  }
0x1482   :  { %6110 = vmatpush3.bf16.msra.mxu1 %v6107_v27 }
0x1483   :  { %6090 = vmatpush1.bf16.msra.mxu0 %v6089_v62  ;;  %6112 = vmatprep.subr.bf16.mxu1 %v6111_v35 }
0x1484   :  { %6092 = vmatprep.subr.bf16.mxu0 %v6091_v60 }
0x1486   :  { %6114 = vmatpush3.bf16.msra.mxu1 %v6111_v35 }
0x1487   :  { %6094 = vmatpush1.bf16.msra.mxu0 %v6093_v7  ;;  %6116 = vmatprep.subr.bf16.mxu1 %v6115_v36 }
0x1488   :  { %6096 = vmatprep.subr.bf16.mxu0 %v6095_v8 }
0x148a   :  { %6118 = vmatpush3.bf16.msra.mxu1 %v6115_v36 }
0x148b   :  { %6098 = vmatpush1.bf16.msra.mxu0 %v6097_v15  ;;  %6120 = vmatprep.subr.bf16.mxu1 %v6119_v39 }
0x148c   :  { %6100 = vmatprep.subr.bf16.mxu0 %v6099_v21 }
0x148e   :  { %6122 = vmatpush3.bf16.msra.mxu1 %v6119_v39 }
0x148f   :  { %6102 = vmatpush1.bf16.msra.mxu0 %v6101_v19  ;;  %6124 = vmatprep.subr.bf16.mxu1 %v6123_v59 }
0x1492   :  { %6126 = vmatpush3.bf16.msra.mxu1 %v6123_v59 }
0x1493   :  { %6128 = vmatprep.subr.bf16.mxu1 %v6127_v44 }
0x1496   :  { %6130 = vmatpush3.bf16.msra.mxu1 %v6127_v44 }
0x1497   :  { %6132 = vmatprep.subr.bf16.mxu1 %v6131_v50 }
0x149a   :  { %6134 = vmatpush3.bf16.msra.mxu1 %v6131_v50 }
0x14fc   :  { %v2546_v46 = vpop.xlane.xlu0 %2545 }
0x14fd   :  { %v2549_v9 = vmul.f32 0.0078125, %v2546_v46 }
0x14ff   :  { %v2551_v52 = vadd.f32 1e-06, %v2549_v9 }
0x1500   :  { %v2548_v53 = vpop.xlane.xlu0 %2547 }
0x1501   :  { %6508 = vrsqrt.f32 %v2551_v52  ;;  %v2550_v54 = vmul.f32 0.0078125, %v2548_v53 }
0x1503   :  { %v2552_v18 = vadd.f32 1e-06, %v2550_v54 }
0x1505   :  { %6510 = vrsqrt.f32 %v2552_v18 }
0x150b   :  { %v6509_v55 = vpop.eup %6508 }
0x150c   :  { %v2555_v58 = vmul.f32 %v6509_v55, %v7896_v23 }
0x150e   :  { %v2563_v61 = vmul.f32 %v5139_v57, %v2555_v58 }
0x150f   :  { %v6511_v33 = vpop.eup %6510 }
0x1510   :  { %v2556_v17 = vmul.f32 %v6511_v33, %v7899_v1  ;;  %2679 = vmatmul.mubr.f32.vlgmr.msra.gmra.mrb[22].mxu0 %v2563_v61  ;;  %5673 = vmatprep.mubr.f32.mxu1 %v2563_v61 }
0x1511   :  { %2684 = vmatprep.mubr.f32.mxu0 %v7004_v47 }
0x1512   :  { %v2564_v62 = vmul.f32 %v5139_v57, %v2556_v17 }
0x1514   :  { %2685 = vmatmul.mubr.f32.gmra.mrb[24].mxu0 %v2564_v62  ;;  %5674 = vmatmul.mubr.f32.vlgmr.msra.gmra.mrb[30].mxu1 %v2564_v62 }
0x15e3   :  { %v7912_v60 = vpop.f32.mrb[22].mxu0 }
0x15e4   :  { %2826 = vrot.lane.b32.xlu1 %v7912_v60, %s8576_s26  ;;  %2798 = vrot.lane.b32.xlu0 %v7912_v60, %s8577_s29  ;;  %v7918_v32 = vpop.f32.mrb[23].mxu0  ;;  %v2766_v11 = vsub.f32 0.0, %v7912_v60 }
0x15e5   :  { %v2882_v13 = vsub.f32 0.0, %v7918_v32 }
0x15e7   :  { %v7920_v2 = vpop.f32.mrb[24].mxu0  ;;  %v7922_v3 = vpop.f32.mrb[30].mxu1 }
0x15e8   :  { %2854 = vrot.lane.b32.xlu1 %v7912_v60, %s8578_s3  ;;  %2828 = vrot.lane.b32.xlu0 %v7920_v2, %s8576_s26  ;;  %v7928_v6 = vpop.f32.mrb[25].mxu0  ;;  %v7930_v7 = vpop.f32.mrb[31].mxu1  ;;  %v2767_v8 = vsub.f32 0.0, %v7920_v2 }
0x15e9   :  { %v2883_v12 = vsub.f32 0.0, %v7928_v6 }
0x15ec   :  { %2914 = vrot.lane.b32.xlu1 %v7918_v32, %s8577_s29  ;;  %2856 = vrot.lane.b32.xlu0 %v7920_v2, %s8578_s3 }
0x15f0   :  { %2942 = vrot.lane.b32.xlu1 %v7918_v32, %s8576_s26  ;;  %2944 = vrot.lane.b32.xlu0 %v7928_v6, %s8576_s26 }
0x15f4   :  { %2792 = vrot.lane.b32.xlu1 %v2766_v11, %s8576_s26  ;;  %2822 = vrot.lane.b32.xlu0 %v2767_v8, %s8578_s3 }
0x15f8   :  { %2820 = vrot.lane.b32.xlu1 %v2766_v11, %s8578_s3  ;;  %2850 = vrot.lane.b32.xlu0 %v2767_v8, %s8579_s19 }
0x15fc   :  { %2848 = vrot.lane.b32.xlu1 %v2766_v11, %s8579_s19  ;;  %2938 = vrot.lane.b32.xlu0 %v2883_v12, %s8578_s3 }
0x1600   :  { %2908 = vrot.lane.b32.xlu1 %v2882_v13, %s8576_s26  ;;  %2966 = vrot.lane.b32.xlu0 %v2883_v12, %s8579_s19 }
0x1604   :  { %2936 = vrot.lane.b32.xlu1 %v2882_v13, %s8578_s3  ;;  %2972 = vrot.lane.b32.xlu0 %v7928_v6, %s8578_s3 }
0x1608   :  { %2964 = vrot.lane.b32.xlu1 %v2882_v13, %s8579_s19  ;;  %2772 = vrot.lane.b32.xlu0 %v2767_v8, %s8577_s29 }
0x160c   :  { %2800 = vrot.lane.b32.xlu1 %v7920_v2, %s8577_s29  ;;  %2780 = vrot.lane.b32.xlu0 %v7920_v2, %s8579_s19 }
0x1610   :  { %2916 = vrot.lane.b32.xlu1 %v7928_v6, %s8577_s29  ;;  %2896 = vrot.lane.b32.xlu0 %v7928_v6, %s8579_s19 }
0x1614   :  { %2794 = vrot.lane.b32.xlu1 %v2767_v8, %s8576_s26  ;;  %2888 = vrot.lane.b32.xlu0 %v2883_v12, %s8577_s29 }
0x1618   :  { %2910 = vrot.lane.b32.xlu1 %v2883_v12, %s8576_s26  ;;  %s2529_s26 = scalar_lea.hbm %s8508_s12, 1024 }
0x1619   :  { %p6848_p7 = scmp.ne.s32.totalorder %s2529_s26, %s6871_s21  ;;  %p6850_p4 = scmp.lt.u32.totalorder %s2529_s26, %s8508_s12 }
0x161a   :  { %p6853_p9 = scmp.lt.u32.totalorder %s6871_s21, %s2529_s26 }
0x161b   :  { %p6852_p8 = por %p6851_p1, %p6850_p4 }
0x161c   :  { %2970 = vrot.lane.b32.xlu1 %v7918_v32, %s8578_s3 }
0x161d   :  { %p6854_p11 = por %p6853_p9, %p6852_p8 }
0x161f   :  { %p6855_p12 = pnand %p6854_p11, %p6848_p7 }
0x1620   :  { %2770 = vrot.lane.b32.xlu1 %v2766_v11, %s8577_s29 }
0x1624   :  { %2778 = vrot.lane.b32.xlu1 %v7912_v60, %s8579_s19 }
0x1628   :  { %2886 = vrot.lane.b32.xlu1 %v2882_v13, %s8577_s29 }
0x162c   :  { %2894 = vrot.lane.b32.xlu1 %v7918_v32, %s8579_s19 }
0x1656   :  { %v2827_v14 = vpop.permute.xlu1 %2826  ;;  %v2799_v51 = vpop.permute.xlu0 %2798 }
0x165a   :  { %v2855_v15 = vpop.permute.xlu1 %2854  ;;  %v2829_v27 = vpop.permute.xlu0 %2828 }
0x165e   :  { %v2915_v21 = vpop.permute.xlu1 %2914  ;;  %v2857_v36 = vpop.permute.xlu0 %2856 }
0x1662   :  { %v2943_v16 = vpop.permute.xlu1 %2942  ;;  %v2945_v40 = vpop.permute.xlu0 %2944 }
0x1666   :  { %v2793_v19 = vpop.permute.xlu1 %2792  ;;  %v2823_v10 = vpop.permute.xlu0 %2822 }
0x1667   :  { %v2804_v31 = vsel %vm378_vm0, %v2793_v19, %v2799_v51  ;;  %v2833_v9 = vsel %vm378_vm0, %v2823_v10, %v2829_v27 }
0x1668   :  { %v2808_v25 = vmul.f32 %v2804_v31, %v7273_v48  ;;  %v2837_v53 = vmul.f32 %v2833_v9, %v7273_v48 }
0x166a   :  { %v2821_v26 = vpop.permute.xlu1 %2820  ;;  %2812 = vrot.lane.b32.xlu1 %v2808_v25, %s8580_s18  ;;  %v2851_v30 = vpop.permute.xlu0 %2850 }
0x166b   :  { %v2832_v28 = vsel %vm378_vm0, %v2821_v26, %v2827_v14  ;;  %v2861_v18 = vsel %vm378_vm0, %v2851_v30, %v2857_v36 }
0x166c   :  { %v2836_v24 = vmul.f32 %v2832_v28, %v7273_v48  ;;  %v2865_v58 = vmul.f32 %v2861_v18, %v7273_v48 }
0x166e   :  { %v2849_v0 = vpop.permute.xlu1 %2848  ;;  %2840 = vrot.lane.b32.xlu1 %v2836_v24, %s8581_s27  ;;  %v2939_v54 = vpop.permute.xlu0 %2938 }
0x166f   :  { %v2860_v34 = vsel %vm378_vm0, %v2849_v0, %v2855_v15 }
0x1670   :  { %v2864_v35 = vmul.f32 %v2860_v34, %v7273_v48 }
0x1672   :  { %v2909_v20 = vpop.permute.xlu1 %2908  ;;  %2868 = vrot.lane.b32.xlu1 %v2864_v35, %s8582_s24  ;;  %v2967_v17 = vpop.permute.xlu0 %2966 }
0x1673   :  { %v2920_v45 = vsel %vm378_vm0, %v2909_v20, %v2915_v21 }
0x1674   :  { %v2924_v56 = vmul.f32 %v2920_v45, %v7273_v48 }
0x1676   :  { %v2937_v37 = vpop.permute.xlu1 %2936  ;;  %2928 = vrot.lane.b32.xlu1 %v2924_v56, %s8580_s18 }
0x1677   :  { %v2948_v39 = vsel %vm378_vm0, %v2937_v37, %v2943_v16 }
0x1678   :  { %v2952_v41 = vmul.f32 %v2948_v39, %v7273_v48 }
0x167a   :  { %v2965_v59 = vpop.permute.xlu1 %2964  ;;  %2956 = vrot.lane.b32.xlu1 %v2952_v41, %s8581_s27 }
0x167e   :  { %v2801_v42 = vpop.permute.xlu1 %2800 }
0x1682   :  { %v2917_v44 = vpop.permute.xlu1 %2916 }
0x1686   :  { %v2795_v49 = vpop.permute.xlu1 %2794 }
0x1687   :  { %v2805_v50 = vsel %vm378_vm0, %v2795_v49, %v2801_v42 }
0x1688   :  { %v2809_v46 = vmul.f32 %v2805_v50, %v7273_v48 }
0x168a   :  { %2814 = vrot.lane.b32.xlu0 %v2809_v46, %s8580_s18  ;;  %v2911_v52 = vpop.permute.xlu1 %2910 }
0x168b   :  { %v2921_v33 = vsel %vm378_vm0, %v2911_v52, %v2917_v44 }
0x168e   :  { %2842 = vrot.lane.b32.xlu0 %v2837_v53, %s8581_s27  ;;  %v2971_v55 = vpop.permute.xlu1 %2970 }
0x168f   :  { %v2976_v57 = vsel %vm378_vm0, %v2965_v59, %v2971_v55 }
0x1690   :  { %v2980_v61 = vmul.f32 %v2976_v57, %v7273_v48 }
0x1692   :  { %2870 = vrot.lane.b32.xlu0 %v2865_v58, %s8582_s24  ;;  %2984 = vrot.lane.b32.xlu1 %v2980_v61, %s8582_s24 }
0x1693   :  { %6858 = shalt.err (!%p6855_p12)  }
0x1694   :  { %p8584_p0 = pnand %p7344_p6, %p7335_p3 }
0x1696   :  { %6870 = shalt.err (!%p8584_p0)  }
0x1697   :  { %2534 = dma.hbm_to_vmem [thread:$0]  %s2529_s26, 256, %s7313_s8, [#allocation4], %s8574_s9, %s8575_s10, %s8573_s23  ;;  %v2925_v62 = vmul.f32 %v2921_v33, %v7273_v48  ;;  %v2949_v8 = vsel %vm378_vm0, %v2939_v54, %v2945_v40 }
0x1698   :  { %s2535_s1 = scalar_lea.hbm %s8509_s13, 1024  ;;  %s6896_s25 = scalar_lea.hbm %s8509_s13, 1280 }
0x1699   :  { %p6873_p7 = scmp.ne.s32.totalorder %s2535_s1, %s6896_s25  ;;  %p6875_p3 = scmp.lt.u32.totalorder %s2535_s1, %s8509_s13 }
0x169a   :  { %s8585_s8 = scalar_lea.hbm %s8509_s13, 2048  ;;  %p6878_p4 = scmp.lt.u32.totalorder %s6896_s25, %s2535_s1 }
0x169b   :  { %p6876_p6 = scmp.lt.u32.totalorder %s8585_s8, %s6896_s25 }
0x169d   :  { %p6877_p0 = por %p6876_p6, %p6875_p3 }
0x169f   :  { %p6879_p1 = por %p6878_p4, %p6877_p0 }
0x16a1   :  { %p6880_p8 = pnand %p6879_p1, %p6873_p7 }
0x16a3   :  { %6883 = shalt.err (!%p6880_p8)  }
0x16a4   :  { %p8586_p9 = pnand %p7408_p2, %p7399_p13 }
0x16a6   :  { %6895 = shalt.err (!%p8586_p9)  }
0x16a7   :  { %2540 = dma.hbm_to_vmem [thread:$0]  %s2535_s1, 256, %s7375_s30, [#allocation4 + $0x1], %s8574_s9, %s8575_s10, %s8573_s23  ;;  %v2953_v11 = vmul.f32 %v2949_v8, %v7273_v48  ;;  %v2973_v12 = vpop.permute.xlu0 %2972  ;;  %v2771_v15 = vpop.permute.xlu1 %2770  ;;  %v2806_v26 = vmul.f32 %v7912_v60, %v7445_v4  ;;  %v2834_v28 = vmul.f32 %v7912_v60, %v7308_v22  ;;  %v2786_v27 = vmul.f32 %v7912_v60, %v7249_v38 }
0x16a8   :  { %2930 = vrot.lane.b32.xlu0 %v2925_v62, %s8580_s18  ;;  %v2977_v13 = vsel %vm378_vm0, %v2967_v17, %v2973_v12  ;;  %v2862_v20 = vmul.f32 %v7912_v60, %v7447_v5  ;;  %v2922_v46 = vmul.f32 %v7918_v32, %v7445_v4  ;;  %v2807_v52 = vmul.f32 %v7920_v2, %v7445_v4 }
0x16a9   :  { %v2981_v14 = vmul.f32 %v2977_v13, %v7273_v48  ;;  %v2950_v53 = vmul.f32 %v7918_v32, %v7308_v22  ;;  %v2835_v54 = vmul.f32 %v7920_v2, %v7308_v22  ;;  %v2787_v55 = vmul.f32 %v7920_v2, %v7249_v38 }
0x16aa   :  { %v2902_v57 = vmul.f32 %v7918_v32, %v7249_v38  ;;  %v2978_v12 = vmul.f32 %v7918_v32, %v7447_v5 }
0x16ab   :  { %v2779_v21 = vpop.permute.xlu1 %2778  ;;  %v2773_v37 = vpop.permute.xlu0 %2772 }
0x16ac   :  { %2958 = vrot.lane.b32.xlu0 %v2953_v11, %s8581_s27  ;;  %v2784_v19 = vsel %vm378_vm0, %v2771_v15, %v2779_v21  ;;  %v2863_v11 = vmul.f32 %v7920_v2, %v7447_v5 }
0x16ad   :  { %v2788_v25 = vmul.f32 %v2784_v19, %v7273_v48 }
0x16af   :  { %v2887_v16 = vpop.permute.xlu1 %2886  ;;  %v2790_v35 = vadd.f32 %v2788_v25, %v2786_v27  ;;  %v2781_v40 = vpop.permute.xlu0 %2780  ;;  %v2951_v27 = vmul.f32 %v7928_v6, %v7308_v22 }
0x16b0   :  { %2986 = vrot.lane.b32.xlu0 %v2981_v14, %s8582_s24  ;;  %v2785_v44 = vsel %vm378_vm0, %v2773_v37, %v2781_v40 }
0x16b1   :  { %v2789_v60 = vmul.f32 %v2785_v44, %v7273_v48 }
0x16b3   :  { %v2895_v51 = vpop.permute.xlu1 %2894  ;;  %v2897_v59 = vpop.permute.xlu0 %2896  ;;  %v2791_v62 = vadd.f32 %v2789_v60, %v2787_v55 }
0x16b4   :  { %v2900_v30 = vsel %vm378_vm0, %v2887_v16, %v2895_v51 }
0x16b5   :  { %v2904_v50 = vmul.f32 %v2900_v30, %v7273_v48 }
0x16b7   :  { %v2889_v42 = vpop.permute.xlu0 %2888  ;;  %v2906_v8 = vadd.f32 %v2904_v50, %v2902_v57 }
0x16dc   :  { %v2813_v31 = vpop.permute.xlu1 %2812 }
0x16dd   :  { %v2818_v0 = vadd.f32 %v2813_v31, %v2806_v26  ;;  %v2901_v26 = vsel %vm378_vm0, %v2889_v42, %v2897_v59 }
0x16df   :  { %v2876_v36 = vsel %vm481_vm2, %v2790_v35, %v2818_v0 }
0x16e0   :  { %v2841_v24 = vpop.permute.xlu1 %2840 }
0x16e1   :  { %v2846_v34 = vadd.f32 %v2841_v24, %v2834_v28  ;;  %v2905_v28 = vmul.f32 %v2901_v26, %v7273_v48  ;;  %v2923_v24 = vmul.f32 %v7928_v6, %v7445_v4 }
0x16e3   :  { %v2878_v39 = vsel %vm484_vm3, %v2876_v36, %v2846_v34  ;;  %v2903_v34 = vmul.f32 %v7928_v6, %v7249_v38  ;;  %v2979_v36 = vmul.f32 %v7928_v6, %v7447_v5 }
0x16e4   :  { %v2869_v45 = vpop.permute.xlu1 %2868 }
0x16e5   :  { %v2874_v56 = vadd.f32 %v2869_v45, %v2862_v20  ;;  %v2907_v45 = vadd.f32 %v2905_v28, %v2903_v34 }
0x16e7   :  { %v8069_v41 = vsel %vm487_vm4, %v2878_v39, %v2874_v56 }
0x16e8   :  { %v2929_v10 = vpop.permute.xlu1 %2928 }
0x16e9   :  { %v2934_v58 = vadd.f32 %v2929_v10, %v2922_v46 }
0x16eb   :  { %v2992_v15 = vsel %vm481_vm2, %v2906_v8, %v2934_v58 }
0x16ec   :  { %v2957_v9 = vpop.permute.xlu1 %2956 }
0x16ed   :  { %v2962_v33 = vadd.f32 %v2957_v9, %v2950_v53 }
0x16ef   :  { %v2994_v19 = vsel %vm484_vm3, %v2992_v15, %v2962_v33 }
0x16fc   :  { %v2815_v49 = vpop.permute.xlu0 %2814 }
0x16fd   :  { %v2819_v61 = vadd.f32 %v2815_v49, %v2807_v52 }
0x16ff   :  { %v2877_v21 = vsel %vm481_vm2, %v2791_v62, %v2819_v61 }
0x1700   :  { %v2843_v18 = vpop.permute.xlu0 %2842 }
0x1701   :  { %v2847_v17 = vadd.f32 %v2843_v18, %v2835_v54 }
0x1703   :  { %v2879_v31 = vsel %vm484_vm3, %v2877_v21, %v2847_v17 }
0x1704   :  { %v2871_v13 = vpop.permute.xlu0 %2870  ;;  %v2985_v14 = vpop.permute.xlu1 %2984 }
0x1705   :  { %v2875_v16 = vadd.f32 %v2871_v13, %v2863_v11  ;;  %v2990_v51 = vadd.f32 %v2985_v14, %v2978_v12 }
0x1707   :  { %v8096_v25 = vsel %vm487_vm4, %v2879_v31, %v2875_v16  ;;  %v2996_v2 = vsel %vm487_vm4, %v2994_v19, %v2990_v51 }
0x171a   :  { %v2931_v32 = vpop.permute.xlu0 %2930 }
0x171b   :  { %v2935_v35 = vadd.f32 %v2931_v32, %v2923_v24 }
0x171d   :  { %v2993_v37 = vsel %vm481_vm2, %v2907_v45, %v2935_v35 }
0x171e   :  { %v2959_v0 = vpop.permute.xlu0 %2958 }
0x171f   :  { %v2963_v20 = vadd.f32 %v2959_v0, %v2951_v27 }
0x1721   :  { %v2995_v39 = vsel %vm484_vm3, %v2993_v37, %v2963_v20 }
0x1722   :  { %v2987_v56 = vpop.permute.xlu0 %2986 }
0x1723   :  { %v2991_v48 = vadd.f32 %v2987_v56, %v2979_v36 }
0x1725   :  { %v8112_v4 = vsel %vm487_vm4, %v2995_v39, %v2991_v48 }
0x1726   :  { %6983 = dma.done.wait [#allocation4], 256 }
0x1727   :  { %6984 = vsyncadd [#allocation4], 4294967040 }
0x1728   :  { %6985 = dma.done.wait [#allocation4 + $0x1], 256 }
0x1729   :  { %6986 = vsyncadd [#allocation4 + $0x1], 4294967040  ;;  %6135 = vmatprep.subr.bf16.mxu0 %v7014_v29  ;;  %5680 = vmatprep.mubr.msk.f32.mxu0 %vm7015_vm5, %v7004_v47  ;;  %3002 = vst [vmem:[#allocation2 + $0x8] sm:$0xff] %v2996_v2  ;;  %v3018_v38 = vld [vmem:[#allocation2] sm:$0xff]  ;;  %s3006_s13 = scalar_lea.hbm %s8511_s15, 1152  ;;  %p8587_p13 = pnand %p7820_p10, %p7812_p5 }
0x172a   :  { %3003 = vst [vmem:[#allocation2 + $0x18] sm:$0xff] %v8112_v4  ;;  %3004 = vst [vmem:[#allocation3 + $0x8] sm:$0xff] %v7930_v7  ;;  %6139 = vmatprep.subr.bf16.mxu1 %v7014_v29  ;;  %5687 = vmatprep.mubr.msk.f32.mxu1 %vm7015_vm5, %v7004_v47  ;;  %v6136_v22 = vpack.c.bf16 %v2996_v2, %v3018_v38  ;;  %v8133_v10 = vpack.i.bf16 %v2996_v2, %v3018_v38  ;;  %v3020_v46 = vld [vmem:[#allocation3] sm:$0xff] }
0x172b   :  { %3005 = vst [vmem:[#allocation3 + $0x18] sm:$0xff] %v7922_v3  ;;  %v6140_v9 = vpack.c.bf16 %v7930_v7, %v3020_v46  ;;  %v8157_v14 = vpack.i.bf16 %v7930_v7, %v3020_v46 }
0x172c   :  { %6138 = vmatpush3.bf16.xpose.msk.msra.mxu0 %vm7504_vm6, %v6136_v22  ;;  %6513 = vrot.lane.b32.xlu1 %v8133_v10, %s8582_s24 }
0x172d   :  { %6146 = vmatprep.subr.bf16.mxu0 %v7014_v29  ;;  %6141 = vmatpush3.bf16.msra.mxu1 %v6140_v9 }
0x172e   :  { %6142 = vmatprep.subr.bf16.mxu1 %v7014_v29 }
0x1730   :  { %3187 = vrot.lane.b32.xlu1 %v8069_v41, %s8582_s24 }
0x1733   :  { %5681 = vmatmul.mubr.msk.f32.vlgmr.msra.gmra.mrb[26].mxu0 %vm481_vm2, %v8069_v41 }
0x1734   :  { %5701 = vmatprep.mubr.msk.f32.mxu0 %vm7015_vm5, %v7004_v47 }
0x179e   :  { %v6514_v53 = vpop.permute.xlu1 %6513 }
0x179f   :  { %v6516_v54 = vunpack.i.h.bf16 %v6514_v53  ;;  %v6515_v18 = vunpack.i.l.bf16 %v6514_v53 }
0x17a1   :  { %v6143_v57 = vpack.c.bf16 %v6516_v54, %v6515_v18 }
0x17a2   :  { %v3188_v61 = vpop.permute.xlu1 %3187 }
0x1806   :  { %v3097_v5 = vpop.f32.mrb[26].mxu0 }
0x1807   :  { %v3101_v6 = vmul.f32 0.17677669, %v3097_v5  ;;  %v5682_v40 = vpop.f32.mrb[27].mxu0 }
0x1809   :  { %v3102_v59 = vsel %vm7368_vm1, %v3101_v6, -1e+30 }
0x180a   :  { %v3103_v42 = vsel %vm378_vm0, %v3102_v59, -inf }
0x180b   :  { %3104 = vmax.xlane.f32.xlu0 %v3103_v42 }
0x1898   :  { %v3105_v44 = vpop.xlane.xlu0 %3104 }
0x1899   :  { %v3106_v30 = vsub.f32 %v3102_v59, %v3105_v44 }
0x189b   :  { %v3107_v49 = vmul.f32 1.442695, %v3106_v30 }
0x189d   :  { %6587 = vpow2.f32 %v3107_v49 }
0x18a7   :  { %v6588_v60 = vpop.eup %6587 }
0x18a8   :  { %v3109_v50 = vsel %vm378_vm0, %v6588_v60, 0.0 }
0x18a9   :  { %3110 = vadd.xlane.f32.xlu0 %v3109_v50 }
0x1936   :  { %v3111_v52 = vpop.xlane.xlu0 %3110 }
0x1937   :  { %6589 = vrcp.f32 %v3111_v52 }
0x1941   :  { %v6590_v55 = vpop.eup %6589 }
0x1942   :  { %v3113_v58 = vmul.f32 %v6590_v55, %v6588_v60 }
0x1944   :  { %5688 = vmatmul.mubr.msk.f32.vlgmr.msra.gmra.mrb[32].mxu1 %vm378_vm0, %v3113_v58 }
0x1945   :  { %6145 = vmatpush3.bf16.xpose.msk.msra.mxu1 %vm7504_vm6, %v6143_v57  ;;  %5694 = vmatprep.mubr.msk.f32.mxu1 %vm7015_vm5, %v7004_v47 }
0x1946   :  { %6153 = vmatprep.subr.bf16.mxu1 %v7014_v29 }
0x194c   :  { %5695 = vmatmul.mubr.msk.f32.vlgmr.msra.gmra.mrb[34].mxu1 %vm481_vm2, %v3188_v61 }
0x194d   :  { %5715 = vmatprep.mubr.msk.f32.mxu1 %vm7015_vm5, %v7004_v47 }
0x1a17   :  { %v8151_v33 = vpop.f32.mrb[32].mxu1 }
0x1a18   :  { %v5689_v17 = vpop.f32.mrb[33].mxu1 }
0x1a1f   :  { %v3265_v62 = vpop.f32.mrb[34].mxu1 }
0x1a20   :  { %v3269_v8 = vmul.f32 0.17677669, %v3265_v62  ;;  %v5696_v11 = vpop.f32.mrb[35].mxu1 }
0x1a22   :  { %v3270_v12 = vsel %vm7368_vm1, %v3269_v8, -1e+30 }
0x1a23   :  { %v3271_v13 = vsel %vm378_vm0, %v3270_v12, -inf }
0x1a24   :  { %3272 = vmax.xlane.f32.xlu0 %v3271_v13 }
0x1a3a   :  { %6518 = vrot.lane.b32.xlu0 %v8157_v14, %s8582_s24 }
0x1a3e   :  { %6523 = vrot.lane.b32.xlu0 %v8133_v10, %s8581_s27 }
0x1a42   :  { %3363 = vrot.lane.b32.xlu0 %v8069_v41, %s8581_s27 }
0x1ab1   :  { %v3273_v15 = vpop.xlane.xlu0 %3272 }
0x1ab2   :  { %v3274_v21 = vsub.f32 %v3270_v12, %v3273_v15 }
0x1ab4   :  { %v3275_v16 = vmul.f32 1.442695, %v3274_v21 }
0x1ab5   :  { %v6519_v31 = vpop.permute.xlu0 %6518 }
0x1ab6   :  { %6591 = vpow2.f32 %v3275_v16  ;;  %v6521_v7 = vunpack.i.h.bf16 %v6519_v31  ;;  %v6520_v2 = vunpack.i.l.bf16 %v6519_v31  ;;  %v3726_v31 = vld [vmem:[#allocation2 + $0x10] sm:$0xff] }
0x1ab8   :  { %v6147_v26 = vpack.c.bf16 %v6521_v7, %v6520_v2 }
0x1ab9   :  { %v6524_v28 = vpop.permute.xlu0 %6523 }
0x1aba   :  { %6148 = vmatpush3.bf16.msra.mxu0 %v6147_v26  ;;  %v6526_v24 = vunpack.i.h.bf16 %v6524_v28  ;;  %v6525_v27 = vunpack.i.l.bf16 %v6524_v28 }
0x1abb   :  { %6149 = vmatprep.subr.bf16.mxu0 %v7014_v29 }
0x1abc   :  { %v6150_v34 = vpack.c.bf16 %v6526_v24, %v6525_v27 }
0x1abd   :  { %v3364_v20 = vpop.permute.xlu0 %3363 }
0x1ac0   :  { %v6592_v51 = vpop.eup %6591 }
0x1ac1   :  { %v3277_v19 = vsel %vm378_vm0, %v6592_v51, 0.0 }
0x1ac2   :  { %3278 = vadd.xlane.f32.xlu1 %v3277_v19 }
0x1ad3   :  { %6528 = vrot.lane.b32.xlu1 %v8157_v14, %s8581_s27 }
0x1ad7   :  { %6533 = vrot.lane.b32.xlu1 %v8133_v10, %s8580_s18 }
0x1b4f   :  { %v3279_v32 = vpop.xlane.xlu1 %3278 }
0x1b50   :  { %6593 = vrcp.f32 %v3279_v32 }
0x1b53   :  { %v6529_v22 = vpop.permute.xlu1 %6528 }
0x1b54   :  { %v6531_v5 = vunpack.i.h.bf16 %v6529_v22  ;;  %v6530_v6 = vunpack.i.l.bf16 %v6529_v22 }
0x1b56   :  { %v6154_v40 = vpack.c.bf16 %v6531_v5, %v6530_v6 }
0x1b57   :  { %v6534_v49 = vpop.permute.xlu1 %6533 }
0x1b58   :  { %6155 = vmatpush3.bf16.msra.mxu1 %v6154_v40  ;;  %v6536_v50 = vunpack.i.h.bf16 %v6534_v49  ;;  %v6535_v46 = vunpack.i.l.bf16 %v6534_v49 }
0x1b59   :  { %6156 = vmatprep.subr.bf16.mxu1 %v7014_v29 }
0x1b5a   :  { %v6594_v0 = vpop.eup %6593  ;;  %v6157_v53 = vpack.c.bf16 %v6536_v50, %v6535_v46 }
0x1b5b   :  { %v3281_v35 = vmul.f32 %v6594_v0, %v6592_v51 }
0x1b5d   :  { %5702 = vmatmul.mubr.msk.f32.vlgmr.msra.gmra.mrb[28].mxu0 %vm378_vm0, %v3281_v35 }
0x1b5e   :  { %6152 = vmatpush3.bf16.xpose.msk.msra.mxu0 %vm7504_vm6, %v6150_v34  ;;  %5708 = vmatprep.mubr.msk.f32.mxu0 %vm7015_vm5, %v7004_v47 }
0x1b5f   :  { %6160 = vmatprep.subr.bf16.mxu0 %v7014_v29 }
0x1b65   :  { %5709 = vmatmul.mubr.msk.f32.vlgmr.msra.gmra.mrb[30].mxu0 %vm481_vm2, %v3364_v20 }
0x1b66   :  { %5729 = vmatprep.mubr.msk.f32.mxu0 %vm7015_vm5, %v7004_v47 }
0x1c30   :  { %v8180_v45 = vpop.f32.mrb[28].mxu0 }
0x1c31   :  { %v5703_v36 = vpop.f32.mrb[29].mxu0 }
0x1c38   :  { %v3441_v56 = vpop.f32.mrb[30].mxu0 }
0x1c39   :  { %v3445_v37 = vmul.f32 0.17677669, %v3441_v56  ;;  %v5710_v48 = vpop.f32.mrb[31].mxu0 }
0x1c3a   :  { %v8227_v48 = vpack.i.bf16 %v8112_v4, %v3726_v31 }
0x1c3b   :  { %v3446_v39 = vsel %vm7368_vm1, %v3445_v37, -1e+30 }
0x1c3c   :  { %v3447_v38 = vsel %vm378_vm0, %v3446_v39, -inf }
0x1c3d   :  { %3448 = vmax.xlane.f32.xlu0 %v3447_v38 }
0x1cca   :  { %v3449_v59 = vpop.xlane.xlu0 %3448 }
0x1ccb   :  { %v3450_v42 = vsub.f32 %v3446_v39, %v3449_v59  ;;  %v3728_v39 = vld [vmem:[#allocation3 + $0x10] sm:$0xff] }
0x1ccc   :  { %v6168_v38 = vpack.c.bf16 %v7922_v3, %v3728_v39 }
0x1ccd   :  { %v3451_v10 = vmul.f32 1.442695, %v3450_v42 }
0x1ccf   :  { %6595 = vpow2.f32 %v3451_v10 }
0x1cd9   :  { %v6596_v44 = vpop.eup %6595 }
0x1cda   :  { %v3453_v30 = vsel %vm378_vm0, %v6596_v44, 0.0 }
0x1cdb   :  { %3454 = vadd.xlane.f32.xlu1 %v3453_v30 }
0x1cec   :  { %3537 = vrot.lane.b32.xlu1 %v8069_v41, %s8580_s18 }
0x1d68   :  { %v3455_v60 = vpop.xlane.xlu1 %3454 }
0x1d69   :  { %6597 = vrcp.f32 %v3455_v60 }
0x1d6c   :  { %v3538_v54 = vpop.permute.xlu1 %3537 }
0x1d73   :  { %v6598_v9 = vpop.eup %6597 }
0x1d74   :  { %v3457_v52 = vmul.f32 %v6598_v9, %v6596_v44 }
0x1d76   :  { %5716 = vmatmul.mubr.msk.f32.vlgmr.msra.gmra.mrb[36].mxu1 %vm378_vm0, %v3457_v52  ;;  %v8248_v52 = vpack.i.bf16 %v7922_v3, %v3728_v39 }
0x1d77   :  { %6159 = vmatpush3.bf16.xpose.msk.msra.mxu1 %vm7504_vm6, %v6157_v53  ;;  %5722 = vmatprep.mubr.msk.f32.mxu1 %vm7015_vm5, %v7004_v47 }
0x1d78   :  { %6167 = vmatprep.subr.bf16.mxu1 %v7014_v29 }
0x1d7e   :  { %5723 = vmatmul.mubr.msk.f32.vlgmr.msra.gmra.mrb[38].mxu1 %vm481_vm2, %v3538_v54 }
0x1d7f   :  { %5743 = vmatprep.mubr.msk.f32.mxu1 %vm7015_vm5, %v7004_v47  ;;  %6169 = vmatpush3.bf16.msra.mxu1 %v6168_v38 }
0x1d80   :  { %6170 = vmatprep.subr.bf16.mxu1 %v7014_v29 }
0x1e49   :  { %v8198_v41 = vpop.f32.mrb[36].mxu1 }
0x1e4a   :  { %v5717_v18 = vpop.f32.mrb[37].mxu1 }
0x1e51   :  { %v3615_v55 = vpop.f32.mrb[38].mxu1 }
0x1e52   :  { %v3619_v57 = vmul.f32 0.17677669, %v3615_v55  ;;  %v5724_v58 = vpop.f32.mrb[39].mxu1 }
0x1e54   :  { %v3620_v61 = vsel %vm7368_vm1, %v3619_v57, -1e+30 }
0x1e55   :  { %v3621_v17 = vsel %vm378_vm0, %v3620_v61, -inf }
0x1e56   :  { %3622 = vmax.xlane.f32.xlu0 %v3621_v17 }
0x1e6c   :  { %6538 = vrot.lane.b32.xlu0 %v8157_v14, %s8580_s18  ;;  %v6164_v14 = vpack.c.bf16 %v8112_v4, %v3726_v31 }
0x1ee3   :  { %v3623_v62 = vpop.xlane.xlu0 %3622 }
0x1ee4   :  { %v3624_v8 = vsub.f32 %v3620_v61, %v3623_v62 }
0x1ee6   :  { %v3625_v11 = vmul.f32 1.442695, %v3624_v8 }
0x1ee7   :  { %v6539_v15 = vpop.permute.xlu0 %6538 }
0x1ee8   :  { %6599 = vpow2.f32 %v3625_v11  ;;  %v6541_v21 = vunpack.i.h.bf16 %v6539_v15  ;;  %v6540_v16 = vunpack.i.l.bf16 %v6539_v15 }
0x1eea   :  { %v6161_v51 = vpack.c.bf16 %v6541_v21, %v6540_v16 }
0x1eec   :  { %6162 = vmatpush3.bf16.msra.mxu0 %v6161_v51 }
0x1eed   :  { %6163 = vmatprep.subr.bf16.mxu0 %v7014_v29 }
0x1ef2   :  { %v6600_v12 = vpop.eup %6599 }
0x1ef3   :  { %v3627_v13 = vsel %vm378_vm0, %v6600_v12, 0.0 }
0x1ef4   :  { %3628 = vadd.xlane.f32.xlu1 %v3627_v13 }
0x1f81   :  { %v3629_v19 = vpop.xlane.xlu1 %3628 }
0x1f82   :  { %6601 = vrcp.f32 %v3629_v19 }
0x1f8c   :  { %v6602_v7 = vpop.eup %6601 }
0x1f8d   :  { %v3631_v2 = vmul.f32 %v6602_v7, %v6600_v12 }
0x1f8f   :  { %5730 = vmatmul.mubr.msk.f32.vlgmr.msra.gmra.mrb[32].mxu0 %vm378_vm0, %v3631_v2 }
0x1f90   :  { %6166 = vmatpush3.bf16.xpose.msk.msra.mxu0 %vm7504_vm6, %v6164_v14  ;;  %5736 = vmatprep.mubr.msk.f32.mxu0 %vm7015_vm5, %v7004_v47 }
0x1f91   :  { %6174 = vmatprep.subr.bf16.mxu0 %v7014_v29 }
0x1f97   :  { %5737 = vmatmul.mubr.msk.f32.vlgmr.msra.gmra.mrb[34].mxu0 %vm481_vm2, %v8096_v25 }
0x1f98   :  { %5757 = vmatprep.mubr.msk.f32.mxu0 %vm7015_vm5, %v7004_v47 }
0x2062   :  { %v8218_v26 = vpop.f32.mrb[32].mxu0 }
0x2063   :  { %v5731_v32 = vpop.f32.mrb[33].mxu0 }
0x206a   :  { %v3805_v28 = vpop.f32.mrb[34].mxu0 }
0x206b   :  { %v3809_v24 = vmul.f32 0.17677669, %v3805_v28  ;;  %v5738_v27 = vpop.f32.mrb[35].mxu0 }
0x206d   :  { %v3810_v0 = vsel %vm7368_vm1, %v3809_v24, -1e+30 }
0x206e   :  { %v3811_v34 = vsel %vm378_vm0, %v3810_v0, -inf }
0x206f   :  { %3812 = vmax.xlane.f32.xlu0 %v3811_v34 }
0x2085   :  { %3895 = vrot.lane.b32.xlu0 %v8096_v25, %s8582_s24 }
0x20fc   :  { %v3813_v35 = vpop.xlane.xlu0 %3812 }
0x20fd   :  { %v3814_v20 = vsub.f32 %v3810_v0, %v3813_v35 }
0x20ff   :  { %v3815_v36 = vmul.f32 1.442695, %v3814_v20 }
0x2100   :  { %v3896_v4 = vpop.permute.xlu0 %3895 }
0x2101   :  { %6603 = vpow2.f32 %v3815_v36 }
0x210b   :  { %v6604_v56 = vpop.eup %6603 }
0x210c   :  { %v3817_v37 = vsel %vm378_vm0, %v6604_v56, 0.0 }
0x210d   :  { %3818 = vadd.xlane.f32.xlu1 %v3817_v37 }
0x211e   :  { %6543 = vrot.lane.b32.xlu1 %v8227_v48, %s8582_s24 }
0x219a   :  { %v3819_v22 = vpop.xlane.xlu1 %3818 }
0x219b   :  { %6605 = vrcp.f32 %v3819_v22 }
0x219e   :  { %v6544_v5 = vpop.permute.xlu1 %6543 }
0x219f   :  { %v6546_v6 = vunpack.i.h.bf16 %v6544_v5  ;;  %v6545_v40 = vunpack.i.l.bf16 %v6544_v5 }
0x21a1   :  { %v6171_v42 = vpack.c.bf16 %v6546_v6, %v6545_v40 }
0x21a5   :  { %v6606_v59 = vpop.eup %6605 }
0x21a6   :  { %v3821_v10 = vmul.f32 %v6606_v59, %v6604_v56 }
0x21a8   :  { %5744 = vmatmul.mubr.msk.f32.vlgmr.msra.gmra.mrb[40].mxu1 %vm378_vm0, %v3821_v10 }
0x21a9   :  { %6173 = vmatpush3.bf16.xpose.msk.msra.mxu1 %vm7504_vm6, %v6171_v42  ;;  %5750 = vmatprep.mubr.msk.f32.mxu1 %vm7015_vm5, %v7004_v47 }
0x21aa   :  { %6181 = vmatprep.subr.bf16.mxu1 %v7014_v29 }
0x21b0   :  { %5751 = vmatmul.mubr.msk.f32.vlgmr.msra.gmra.mrb[42].mxu1 %vm481_vm2, %v3896_v4 }
0x21b1   :  { %5771 = vmatprep.mubr.msk.f32.mxu1 %vm7015_vm5, %v7004_v47 }
0x227b   :  { %v8242_v44 = vpop.f32.mrb[40].mxu1 }
0x227c   :  { %v5745_v30 = vpop.f32.mrb[41].mxu1 }
0x2283   :  { %v3973_v49 = vpop.f32.mrb[42].mxu1 }
0x2284   :  { %v3977_v60 = vmul.f32 0.17677669, %v3973_v49  ;;  %v5752_v50 = vpop.f32.mrb[43].mxu1 }
0x2286   :  { %v3978_v46 = vsel %vm7368_vm1, %v3977_v60, -1e+30 }
0x2287   :  { %v3979_v9 = vsel %vm378_vm0, %v3978_v46, -inf }
0x2288   :  { %3980 = vmax.xlane.f32.xlu1 %v3979_v9 }
0x2299   :  { %6548 = vrot.lane.b32.xlu1 %v8248_v52, %s8582_s24 }
0x229d   :  { %4071 = vrot.lane.b32.xlu1 %v8096_v25, %s8581_s27 }
0x2315   :  { %v3981_v53 = vpop.xlane.xlu1 %3980 }
0x2316   :  { %v3982_v54 = vsub.f32 %v3978_v46, %v3981_v53 }
0x2318   :  { %v3983_v18 = vmul.f32 1.442695, %v3982_v54 }
0x2319   :  { %v6549_v58 = vpop.permute.xlu1 %6548 }
0x231a   :  { %6607 = vpow2.f32 %v3983_v18  ;;  %v6551_v61 = vunpack.i.h.bf16 %v6549_v58  ;;  %v6550_v17 = vunpack.i.l.bf16 %v6549_v58  ;;  %v4436_v58 = vld [vmem:[#allocation8 + $0x88] sm:$0xff] }
0x231c   :  { %v6175_v62 = vpack.c.bf16 %v6551_v61, %v6550_v17  ;;  %v4437_v61 = vld [vmem:[#allocation8 + $0x90] sm:$0xff] }
0x231d   :  { %v4072_v16 = vpop.permute.xlu1 %4071 }
0x231e   :  { %6176 = vmatpush3.bf16.msra.mxu0 %v6175_v62  ;;  %v4438_v62 = vld [vmem:[#allocation8 + $0x98] sm:$0xff] }
0x231f   :  { %6177 = vmatprep.subr.bf16.mxu0 %v7014_v29 }
0x2324   :  { %v6608_v55 = vpop.eup %6607 }
0x2325   :  { %v3985_v57 = vsel %vm378_vm0, %v6608_v55, 0.0 }
0x2326   :  { %3986 = vadd.xlane.f32.xlu0 %v3985_v57  ;;  %v4435_v57 = vld [vmem:[#allocation8 + $0x80] sm:$0xff] }
0x2327   :  { %v6191_v17 = vpack.c.bf16 %v4436_v58, %v4435_v57  ;;  %v5180_v57 = vld [vmem:[%s8503_s7 + $0x130] sm:$0xff]  ;;  %v4667_v58 = vld [vmem:[#allocation10 + $0x120] sm:$0xff] }
0x233c   :  { %6553 = vrot.lane.b32.xlu0 %v8227_v48, %s8581_s27 }
0x23b3   :  { %v3987_v3 = vpop.xlane.xlu0 %3986 }
0x23b4   :  { %6609 = vrcp.f32 %v3987_v3  ;;  %v6195_v3 = vpack.c.bf16 %v4438_v62, %v4437_v61  ;;  %v5183_v62 = vld [vmem:[%s8503_s7 + $0x148] sm:$0xff] }
0x23b7   :  { %v6554_v8 = vpop.permute.xlu0 %6553 }
0x23b8   :  { %v6556_v11 = vunpack.i.h.bf16 %v6554_v8  ;;  %v6555_v12 = vunpack.i.l.bf16 %v6554_v8  ;;  %v4439_v8 = vld [vmem:[#allocation8 + $0xa0] sm:$0xff] }
0x23ba   :  { %v6178_v15 = vpack.c.bf16 %v6556_v11, %v6555_v12  ;;  %v4440_v11 = vld [vmem:[#allocation8 + $0xa8] sm:$0xff] }
0x23bb   :  { %v6199_v12 = vpack.c.bf16 %v4440_v11, %v4439_v8 }
0x23be   :  { %v6610_v13 = vpop.eup %6609 }
0x23bf   :  { %v3989_v21 = vmul.f32 %v6610_v13, %v6608_v55  ;;  %v4441_v13 = vld [vmem:[#allocation8 + $0xb0] sm:$0xff] }
0x23c1   :  { %5758 = vmatmul.mubr.msk.f32.vlgmr.msra.gmra.mrb[36].mxu0 %vm378_vm0, %v3989_v21 }
0x23c2   :  { %6180 = vmatpush3.bf16.xpose.msk.msra.mxu0 %vm7504_vm6, %v6178_v15  ;;  %5764 = vmatprep.mubr.msk.f32.mxu0 %vm7015_vm5, %v7004_v47  ;;  %v4442_v15 = vld [vmem:[#allocation8 + $0xb8] sm:$0xff] }
0x23c3   :  { %6188 = vmatprep.subr.bf16.mxu0 %v7014_v29  ;;  %v6203_v21 = vpack.c.bf16 %v4442_v15, %v4441_v13  ;;  %v4674_v13 = vld [vmem:[#allocation10 + $0x158] sm:$0xff]  ;;  %v5182_v15 = vld [vmem:[%s8503_s7 + $0x140] sm:$0xff] }
0x23c9   :  { %5765 = vmatmul.mubr.msk.f32.vlgmr.msra.gmra.mrb[38].mxu0 %vm481_vm2, %v4072_v16  ;;  %v4443_v16 = vld [vmem:[#allocation8 + $0xc0] sm:$0xff] }
0x23ca   :  { %5785 = vmatprep.mubr.msk.f32.mxu0 %vm7015_vm5, %v7004_v47 }
0x2494   :  { %v4067_v51 = vpop.f32.mrb[36].mxu0 }
0x2495   :  { %v6572_v19 = vpack.i.bf16 %v4067_v51, %v8180_v45  ;;  %v5759_v31 = vpop.f32.mrb[37].mxu0  ;;  %v4444_v51 = vld [vmem:[#allocation8 + $0xc8] sm:$0xff] }
0x2496   :  { %v4445_v31 = vld [vmem:[#allocation8 + $0xd0] sm:$0xff] }
0x249c   :  { %v4149_v7 = vpop.f32.mrb[38].mxu0 }
0x249d   :  { %v4153_v14 = vmul.f32 0.17677669, %v4149_v7  ;;  %v5766_v2 = vpop.f32.mrb[39].mxu0  ;;  %v4446_v7 = vld [vmem:[#allocation8 + $0xd8] sm:$0xff] }
0x249e   :  { %v4447_v2 = vld [vmem:[#allocation8 + $0xe0] sm:$0xff] }
0x249f   :  { %v4154_v32 = vsel %vm7368_vm1, %v4153_v14, -1e+30  ;;  %v6211_v14 = vpack.c.bf16 %v4446_v7, %v4445_v31 }
0x24a0   :  { %v4155_v28 = vsel %vm378_vm0, %v4154_v32, -inf }
0x24a1   :  { %4156 = vmax.xlane.f32.xlu1 %v4155_v28 }
0x24b2   :  { %6558 = vrot.lane.b32.xlu1 %v8248_v52, %s8581_s27 }
0x24b6   :  { %4245 = vrot.lane.b32.xlu1 %v8096_v25, %s8580_s18 }
0x252e   :  { %v4157_v24 = vpop.xlane.xlu1 %4156 }
0x252f   :  { %v4158_v27 = vsub.f32 %v4154_v32, %v4157_v24  ;;  %v4448_v32 = vld [vmem:[#allocation8 + $0xe8] sm:$0xff]  ;;  %v4449_v24 = vld [vmem:[#allocation8 + $0xf0] sm:$0xff] }
0x2530   :  { %v6215_v28 = vpack.c.bf16 %v4448_v32, %v4447_v2 }
0x2531   :  { %v4159_v0 = vmul.f32 1.442695, %v4158_v27  ;;  %v4450_v27 = vld [vmem:[#allocation8 + $0xf8] sm:$0xff] }
0x2532   :  { %v6559_v35 = vpop.permute.xlu1 %6558 }
0x2533   :  { %6611 = vpow2.f32 %v4159_v0  ;;  %v6561_v20 = vunpack.i.h.bf16 %v6559_v35  ;;  %v6560_v36 = vunpack.i.l.bf16 %v6559_v35  ;;  %v6219_v0 = vpack.c.bf16 %v4450_v27, %v4449_v24 }
0x2535   :  { %v6182_v56 = vpack.c.bf16 %v6561_v20, %v6560_v36 }
0x2537   :  { %6183 = vmatpush3.bf16.msra.mxu1 %v6182_v56 }
0x2538   :  { %6184 = vmatprep.subr.bf16.mxu1 %v7014_v29  ;;  %v4246_v29 = vpop.permute.xlu1 %4245 }
0x253d   :  { %v6612_v45 = vpop.eup %6611 }
0x253e   :  { %v4161_v34 = vsel %vm378_vm0, %v6612_v45, 0.0 }
0x253f   :  { %4162 = vadd.xlane.f32.xlu0 %v4161_v34 }
0x2555   :  { %6563 = vrot.lane.b32.xlu0 %v8227_v48, %s8580_s18 }
0x25cc   :  { %v4163_v37 = vpop.xlane.xlu0 %4162 }
0x25cd   :  { %6613 = vrcp.f32 %v4163_v37 }
0x25d0   :  { %v6564_v25 = vpop.permute.xlu0 %6563 }
0x25d1   :  { %v6566_v39 = vunpack.i.h.bf16 %v6564_v25  ;;  %v6565_v38 = vunpack.i.l.bf16 %v6564_v25 }
0x25d3   :  { %v6185_v5 = vpack.c.bf16 %v6566_v39, %v6565_v38 }
0x25d7   :  { %v6614_v22 = vpop.eup %6613 }
0x25d8   :  { %v4165_v6 = vmul.f32 %v6614_v22, %v6612_v45 }
0x25da   :  { %5772 = vmatmul.mubr.msk.f32.vlgmr.msra.gmra.mrb[44].mxu1 %vm378_vm0, %v4165_v6 }
0x25db   :  { %6187 = vmatpush3.bf16.xpose.msk.msra.mxu1 %vm7504_vm6, %v6185_v5  ;;  %5778 = vmatprep.mubr.msk.f32.mxu1 %vm7015_vm5, %v7004_v47 }
0x25e2   :  { %5779 = vmatmul.mubr.msk.f32.vlgmr.msra.gmra.mrb[46].mxu1 %vm481_vm2, %v4246_v29 }
0x25e3   :  { %4649 = vmatprep.mubr.f32.mxu1 %v7004_v47 }
0x26ad   :  { %v4241_v48 = vpop.f32.mrb[44].mxu1 }
0x26ae   :  { %v6577_v40 = vpack.i.bf16 %v4241_v48, %v8198_v41  ;;  %v5773_v59 = vpop.f32.mrb[45].mxu1 }
0x26b5   :  { %v4323_v42 = vpop.f32.mrb[46].mxu1 }
0x26b6   :  { %v4327_v10 = vmul.f32 0.17677669, %v4323_v42  ;;  %v5780_v4 = vpop.f32.mrb[47].mxu1  ;;  %v4664_v42 = vld [vmem:[#allocation10 + $0x108] sm:$0xff] }
0x26b7   :  { %v4666_v4 = vld [vmem:[#allocation10 + $0x118] sm:$0xff] }
0x26b8   :  { %v4328_v30 = vsel %vm7368_vm1, %v4327_v10, -1e+30 }
0x26b9   :  { %v4329_v63 = vsel %vm378_vm0, %v4328_v30, -inf }
0x26ba   :  { %4330 = vmax.xlane.f32.xlu1 %v4329_v63  ;;  %v5176_v63 = vld [vmem:[%s8503_s7 + $0x110] sm:$0xff] }
0x26cb   :  { %6568 = vrot.lane.b32.xlu1 %v8248_v52, %s8580_s18 }
0x26cf   :  { %6578 = vrot.lane.b32.xlu1 %v6577_v40, %s8581_s27 }
0x2747   :  { %v4331_v49 = vpop.xlane.xlu1 %4330 }
0x2748   :  { %v4332_v60 = vsub.f32 %v4328_v30, %v4331_v49  ;;  %v5174_v30 = vld [vmem:[%s8503_s7 + $0x100] sm:$0xff]  ;;  %v6255_v49 = vpack.c.bf16 %v4666_v4, %v4664_v42  ;;  %v5197_v4 = vld [vmem:[%s8503_s7 + $0x1b8] sm:$0xff] }
0x274a   :  { %v4333_v50 = vmul.f32 1.442695, %v4332_v60  ;;  %v6225_v60 = vpack.c.bf16 %v5176_v63, %v5174_v30  ;;  %v4684_v30 = vld [vmem:[#allocation10 + $0x1a8] sm:$0xff] }
0x274b   :  { %v6569_v46 = vpop.permute.xlu1 %6568 }
0x274c   :  { %6615 = vpow2.f32 %v4333_v50  ;;  %v6571_v41 = vunpack.i.h.bf16 %v6569_v46  ;;  %v6570_v9 = vunpack.i.l.bf16 %v6569_v46  ;;  %v4663_v50 = vld [vmem:[#allocation10 + $0x100] sm:$0xff]  ;;  %v4665_v46 = vld [vmem:[#allocation10 + $0x110] sm:$0xff] }
0x274e   :  { %v6189_v53 = vpack.c.bf16 %v6571_v41, %v6570_v9  ;;  %v5179_v41 = vld [vmem:[%s8503_s7 + $0x128] sm:$0xff]  ;;  %v6257_v9 = vpack.c.bf16 %v4665_v46, %v4663_v50  ;;  %v5196_v50 = vld [vmem:[%s8503_s7 + $0x1b0] sm:$0xff] }
0x274f   :  { %v6579_v37 = vpop.permute.xlu1 %6578 }
0x2750   :  { %6190 = vmatpush3.bf16.msra.mxu0 %v6189_v53  ;;  %v6581_v38 = vunpack.i.h.bf16 %v6579_v37  ;;  %v6580_v22 = vunpack.i.l.bf16 %v6579_v37  ;;  %v5181_v53 = vld [vmem:[%s8503_s7 + $0x138] sm:$0xff]  ;;  %v4675_v37 = vld [vmem:[#allocation10 + $0x160] sm:$0xff] }
0x2751   :  { %6192 = vmatprep.subr.bf16.mxu0 %v6191_v17 }
0x2756   :  { %v6616_v54 = vpop.eup %6615 }
0x2757   :  { %v4335_v43 = vsel %vm378_vm0, %v6616_v54, 0.0 }
0x2758   :  { %4336 = vadd.xlane.f32.xlu0 %v4335_v43  ;;  %v4670_v43 = vld [vmem:[#allocation10 + $0x138] sm:$0xff] }
0x276e   :  { %6573 = vrot.lane.b32.xlu0 %v6572_v19, %s8580_s18  ;;  %v6207_v19 = vpack.c.bf16 %v4444_v51, %v4443_v16  ;;  %v5184_v16 = vld [vmem:[%s8503_s7 + $0x150] sm:$0xff]  ;;  %v4671_v51 = vld [vmem:[#allocation10 + $0x140] sm:$0xff] }
0x276f   :  { %v6233_v31 = vpack.c.bf16 %v5184_v16, %v5182_v15  ;;  %v4694_v16 = vld [vmem:[#allocation10 + $0x1f8] sm:$0xff] }
0x27e5   :  { %v4337_v18 = vpop.xlane.xlu0 %4336 }
0x27e6   :  { %6617 = vrcp.f32 %v4337_v18  ;;  %v6227_v18 = vpack.c.bf16 %v5181_v53, %v5179_v41  ;;  %v4685_v53 = vld [vmem:[#allocation10 + $0x1b0] sm:$0xff] }
0x27e9   :  { %v6574_v20 = vpop.permute.xlu0 %6573 }
0x27ea   :  { %v6576_v36 = vunpack.i.h.bf16 %v6574_v20  ;;  %v6575_v56 = vunpack.i.l.bf16 %v6574_v20  ;;  %v5188_v20 = vld [vmem:[%s8503_s7 + $0x170] sm:$0xff] }
0x27ec   :  { %v4431_v25 = vsel %vm481_vm2, %v8242_v44, %v6576_v36  ;;  %v3723_v39 = vsel %vm481_vm2, %v8151_v33, %v6575_v56  ;;  %v5175_v33 = vld [vmem:[%s8503_s7 + $0x108] sm:$0xff]  ;;  %v5177_v44 = vld [vmem:[%s8503_s7 + $0x118] sm:$0xff] }
0x27ed   :  { %v4432_v48 = vsel %vm484_vm3, %v4431_v25, %v6581_v38  ;;  %v6223_v10 = vpack.c.bf16 %v5177_v44, %v5175_v33  ;;  %v4677_v25 = vld [vmem:[#allocation10 + $0x170] sm:$0xff]  ;;  %v5191_v38 = vld [vmem:[%s8503_s7 + $0x188] sm:$0xff]  ;;  %v4679_v33 = vld [vmem:[#allocation10 + $0x180] sm:$0xff] }
0x27ee   :  { %v4681_v44 = vld [vmem:[#allocation10 + $0x190] sm:$0xff] }
0x27ef   :  { %6224 = vmatprep.subr.bf16.mxu1 %v6223_v10  ;;  %v6273_v42 = vpack.c.bf16 %v4681_v44, %v4679_v33  ;;  %v5195_v10 = vld [vmem:[%s8503_s7 + $0x1a8] sm:$0xff]  ;;  %v4807_v33 = vld [vmem:[#allocation11 + $0x110] sm:$0xff]  ;;  %v4808_v44 = vld [vmem:[#allocation11 + $0x118] sm:$0xff] }
0x27f0   :  { %v6618_v52 = vpop.eup %6617  ;;  %6226 = vmatpush1.bf16.msra.mxu1 %v6225_v60  ;;  %v6243_v63 = vpack.c.bf16 %v5197_v4, %v5195_v10  ;;  %v5194_v60 = vld [vmem:[%s8503_s7 + $0x1a0] sm:$0xff]  ;;  %v4826_v4 = vld [vmem:[#allocation11 + $0x1a8] sm:$0xff] }
0x27f1   :  { %v4339_v55 = vmul.f32 %v6618_v52, %v6616_v54  ;;  %v4668_v54 = vld [vmem:[#allocation10 + $0x128] sm:$0xff]  ;;  %6228 = vmatprep.subr.bf16.mxu1 %v6227_v18  ;;  %v6245_v41 = vpack.c.bf16 %v5196_v50, %v5194_v60  ;;  %v5201_v18 = vld [vmem:[%s8503_s7 + $0x1d8] sm:$0xff]  ;;  %v4825_v10 = vld [vmem:[#allocation11 + $0x1a0] sm:$0xff] }
0x27f2   :  { %v6259_v52 = vpack.c.bf16 %v4670_v43, %v4668_v54  ;;  %v5199_v54 = vld [vmem:[%s8503_s7 + $0x1c8] sm:$0xff]  ;;  %v4827_v50 = vld [vmem:[#allocation11 + $0x1b0] sm:$0xff] }
0x27f3   :  { %5786 = vmatmul.mubr.msk.f32.vlgmr.msra.gmra.mrb[40].mxu0 %vm378_vm0, %v4339_v55  ;;  %v5178_v55 = vld [vmem:[%s8503_s7 + $0x120] sm:$0xff] }
0x27f4   :  { %6194 = vmatpush3.bf16.msra.mxu0 %v6191_v17  ;;  %v6229_v61 = vpack.c.bf16 %v5180_v57, %v5178_v55  ;;  %v4669_v17 = vld [vmem:[#allocation10 + $0x130] sm:$0xff]  ;;  %v4690_v55 = vld [vmem:[#allocation10 + $0x1d8] sm:$0xff]  ;;  %v6247_v57 = vpack.c.bf16 %v5201_v18, %v5199_v54  ;;  %v4830_v18 = vld [vmem:[#allocation11 + $0x1c8] sm:$0xff] }
0x27f5   :  { %6196 = vmatprep.subr.bf16.mxu0 %v6195_v3  ;;  %v6261_v8 = vpack.c.bf16 %v4669_v17, %v4667_v58  ;;  %v5200_v17 = vld [vmem:[%s8503_s7 + $0x1d0] sm:$0xff] }
0x27f6   :  { %6230 = vmatpush1.bf16.msra.mxu1 %v6229_v61  ;;  %v5198_v61 = vld [vmem:[%s8503_s7 + $0x1c0] sm:$0xff] }
0x27f8   :  { %6198 = vmatpush3.bf16.msra.mxu0 %v6195_v3  ;;  %v5185_v3 = vld [vmem:[%s8503_s7 + $0x158] sm:$0xff] }
0x27f9   :  { %6200 = vmatprep.subr.bf16.mxu0 %v6199_v12  ;;  %v6231_v11 = vpack.c.bf16 %v5185_v3, %v5183_v62  ;;  %v4687_v62 = vld [vmem:[#allocation10 + $0x1c0] sm:$0xff]  ;;  %v6249_v3 = vpack.c.bf16 %v5200_v17, %v5198_v61  ;;  %v4831_v61 = vld [vmem:[#allocation11 + $0x1d0] sm:$0xff]  ;;  %v4832_v17 = vld [vmem:[#allocation11 + $0x1d8] sm:$0xff] }
0x27fb   :  { %6232 = vmatprep.subr.bf16.mxu1 %v6231_v11  ;;  %v5203_v11 = vld [vmem:[%s8503_s7 + $0x1e8] sm:$0xff] }
0x27fc   :  { %6202 = vmatpush3.bf16.msra.mxu0 %v6199_v12  ;;  %v4672_v12 = vld [vmem:[#allocation10 + $0x148] sm:$0xff]  ;;  %6234 = vmatpush1.bf16.msra.mxu1 %v6233_v31  ;;  %v5204_v31 = vld [vmem:[%s8503_s7 + $0x1f0] sm:$0xff] }
0x27fd   :  { %6204 = vmatprep.subr.bf16.mxu0 %v6203_v21 }
0x2800   :  { %6206 = vmatpush3.bf16.msra.mxu0 %v6203_v21  ;;  %v6263_v21 = vpack.c.bf16 %v4674_v13, %v4672_v12  ;;  %v5205_v12 = vld [vmem:[%s8503_s7 + $0x1f8] sm:$0xff] }
0x2801   :  { %6208 = vmatprep.subr.bf16.mxu0 %v6207_v19  ;;  %v6251_v15 = vpack.c.bf16 %v5205_v12, %v5203_v11  ;;  %v4833_v12 = vld [vmem:[#allocation11 + $0x1e0] sm:$0xff] }
0x2804   :  { %6210 = vmatpush3.bf16.msra.mxu0 %v6207_v19  ;;  %v4673_v19 = vld [vmem:[#allocation10 + $0x150] sm:$0xff] }
0x2805   :  { %6212 = vmatprep.subr.bf16.mxu0 %v6211_v14  ;;  %v6265_v7 = vpack.c.bf16 %v4673_v19, %v4671_v51  ;;  %v5202_v51 = vld [vmem:[%s8503_s7 + $0x1e0] sm:$0xff] }
0x2808   :  { %6214 = vmatpush3.bf16.msra.mxu0 %v6211_v14 }
0x2809   :  { %6216 = vmatprep.subr.bf16.mxu0 %v6215_v28 }
0x280c   :  { %6218 = vmatpush3.bf16.msra.mxu0 %v6215_v28 }
0x280d   :  { %6220 = vmatprep.subr.bf16.mxu0 %v6219_v0 }
0x2810   :  { %6222 = vmatpush3.bf16.msra.mxu0 %v6219_v0  ;;  %v5187_v0 = vld [vmem:[%s8503_s7 + $0x168] sm:$0xff] }
0x2811   :  { %6256 = vmatprep.subr.bf16.mxu0 %v6255_v49  ;;  %v4686_v49 = vld [vmem:[#allocation10 + $0x1b8] sm:$0xff] }
0x2812   :  { %v6275_v46 = vpack.c.bf16 %v4686_v49, %v4684_v30  ;;  %v6295_v30 = vpack.c.bf16 %v4826_v4, %v4825_v10  ;;  %v4810_v49 = vld [vmem:[#allocation11 + $0x128] sm:$0xff] }
0x28c6   :  { %v4415_v45 = vpop.f32.mrb[40].mxu0 }
0x28c7   :  { %v6582_v34 = vpack.i.bf16 %v4415_v45, %v8218_v26  ;;  %v5787_v35 = vpop.f32.mrb[41].mxu0  ;;  %v3724_v26 = vsel %vm484_vm3, %v3723_v39, %v6580_v22  ;;  %v4676_v45 = vld [vmem:[#allocation10 + $0x168] sm:$0xff]  ;;  %v6269_v39 = vpack.c.bf16 %v4677_v25, %v4675_v37  ;;  %v5193_v22 = vld [vmem:[%s8503_s7 + $0x198] sm:$0xff] }
0x28c8   :  { %v5186_v35 = vld [vmem:[%s8503_s7 + $0x160] sm:$0xff] }
0x28c9   :  { %6583 = vrot.lane.b32.xlu1 %v6582_v34, %s8582_s24  ;;  %v6237_v56 = vpack.c.bf16 %v5188_v20, %v5186_v35 }
0x293b   :  { %v6584_v5 = vpop.permute.xlu1 %6583 }
0x293c   :  { %v6586_v6 = vunpack.i.h.bf16 %v6584_v5  ;;  %v6585_v29 = vunpack.i.l.bf16 %v6584_v5  ;;  %v4680_v5 = vld [vmem:[#allocation10 + $0x188] sm:$0xff] }
0x293e   :  { %v3725_v40 = vsel %vm487_vm4, %v3724_v26, %v6585_v29  ;;  %v4433_v59 = vsel %vm487_vm4, %v4432_v48, %v6586_v6  ;;  %v6239_v6 = vpack.c.bf16 %v5193_v22, %v5191_v38  ;;  %v4682_v29 = vld [vmem:[#allocation10 + $0x198] sm:$0xff]  ;;  %v5190_v26 = vld [vmem:[%s8503_s7 + $0x180] sm:$0xff]  ;;  %v5192_v48 = vld [vmem:[%s8503_s7 + $0x190] sm:$0xff] }
0x293f   :  { %5820 = vmatprep.mubr.f32.mxu0 %v3725_v40  ;;  %v6271_v40 = vpack.c.bf16 %v4682_v29, %v4680_v5  ;;  %v4821_v38 = vld [vmem:[#allocation11 + $0x180] sm:$0xff]  ;;  %v4822_v22 = vld [vmem:[#allocation11 + $0x188] sm:$0xff] }
0x2940   :  { %5821 = vmatmul.mubr.f32.vlgmr.msra.gmra.mrb[42].mxu0 %v4433_v59  ;;  %v6241_v59 = vpack.c.bf16 %v5192_v48, %v5190_v26  ;;  %v6287_v5 = vpack.c.bf16 %v4822_v22, %v4821_v38  ;;  %v4806_v29 = vld [vmem:[#allocation11 + $0x108] sm:$0xff]  ;;  %v4823_v48 = vld [vmem:[#allocation11 + $0x190] sm:$0xff] }
0x2941   :  { %4759 = vmatprep.mubr.f32.mxu0 %v7004_v47  ;;  %6258 = vmatpush1.bf16.msra.mxu0 %v6257_v9  ;;  %v4683_v9 = vld [vmem:[#allocation10 + $0x1a0] sm:$0xff] }
0x2942   :  { %6260 = vmatprep.subr.bf16.mxu0 %v6259_v52  ;;  %v6277_v43 = vpack.c.bf16 %v4685_v53, %v4683_v9  ;;  %v4688_v52 = vld [vmem:[#allocation10 + $0x1c8] sm:$0xff]  ;;  %v4811_v9 = vld [vmem:[#allocation11 + $0x130] sm:$0xff]  ;;  %v4812_v53 = vld [vmem:[#allocation11 + $0x138] sm:$0xff] }
0x2943   :  { %v6279_v58 = vpack.c.bf16 %v4690_v55, %v4688_v52  ;;  %v6301_v54 = vpack.c.bf16 %v4812_v53, %v4811_v9  ;;  %v4813_v55 = vld [vmem:[#allocation11 + $0x140] sm:$0xff] }
0x2945   :  { %6262 = vmatpush1.bf16.msra.mxu0 %v6261_v8  ;;  %v4689_v8 = vld [vmem:[#allocation10 + $0x1d0] sm:$0xff] }
0x2946   :  { %6264 = vmatprep.subr.bf16.mxu0 %v6263_v21  ;;  %v6281_v13 = vpack.c.bf16 %v4689_v8, %v4687_v62  ;;  %v4692_v21 = vld [vmem:[#allocation10 + $0x1e8] sm:$0xff]  ;;  %v6307_v62 = vpack.c.bf16 %v4832_v17, %v4831_v61  ;;  %v4816_v8 = vld [vmem:[#allocation11 + $0x158] sm:$0xff] }
0x2947   :  { %v6283_v19 = vpack.c.bf16 %v4694_v16, %v4692_v21  ;;  %v4817_v21 = vld [vmem:[#allocation11 + $0x160] sm:$0xff]  ;;  %v4818_v16 = vld [vmem:[#allocation11 + $0x168] sm:$0xff] }
0x2949   :  { %6266 = vmatpush1.bf16.msra.mxu0 %v6265_v7  ;;  %v4691_v7 = vld [vmem:[#allocation10 + $0x1e0] sm:$0xff] }
0x2a13   :  { %v5822_v14 = vpop.f32.mrb[42].mxu0 }
0x2a14   :  { %v8344_v2 = vadd.f32 %v5822_v14, %v7899_v1  ;;  %v4517_v32 = vpop.f32.mrb[43].mxu0  ;;  %v5189_v1 = vld [vmem:[%s8503_s7 + $0x178] sm:$0xff]  ;;  %v4693_v14 = vld [vmem:[#allocation10 + $0x1f0] sm:$0xff] }
0x2a15   :  { %v8347_v28 = vadd.f32 %v4517_v32, %v7896_v23  ;;  %v6235_v34 = vpack.c.bf16 %v5189_v1, %v5187_v0  ;;  %v4678_v23 = vld [vmem:[#allocation10 + $0x178] sm:$0xff]  ;;  %v6253_v32 = vpack.c.bf16 %v5204_v31, %v5202_v51  ;;  %v6313_v51 = vpack.c.bf16 %v4818_v16, %v4817_v21 }
0x2a16   :  { %v4531_v24 = vmul.f32 %v8344_v2, %v8344_v2  ;;  %v6267_v36 = vpack.c.bf16 %v4678_v23, %v4676_v45  ;;  %v4836_v31 = vld [vmem:[#allocation11 + $0x1f8] sm:$0xff] }
0x2a17   :  { %v4530_v27 = vmul.f32 %v8347_v28, %v8347_v28  ;;  %6236 = vmatprep.subr.bf16.mxu1 %v6235_v34 }
0x2a18   :  { %4534 = vadd.xlane.f32.xlu0 %v4531_v24  ;;  %6268 = vmatprep.subr.bf16.mxu0 %v6267_v36  ;;  %v6285_v24 = vpack.c.bf16 %v4693_v14, %v4691_v7  ;;  %v5173_v36 = vld [vmem:[%s8502_s6 + $0x1] ss:$0 sm:$0xff]  ;;  %v4819_v14 = vld [vmem:[#allocation11 + $0x170] sm:$0xff] }
0x2a19   :  { %4532 = vadd.xlane.f32.xlu1 %v4530_v27  ;;  %6238 = vmatpush1.bf16.msra.mxu1 %v6237_v56 }
0x2a1a   :  { %6270 = vmatpush1.bf16.msra.mxu0 %v6269_v39  ;;  %6240 = vmatprep.subr.bf16.mxu1 %v6239_v6  ;;  %v4805_v6 = vld [vmem:[#allocation11 + $0x100] sm:$0xff] }
0x2a1b   :  { %6272 = vmatprep.subr.bf16.mxu0 %v6271_v40  ;;  %v6289_v26 = vpack.c.bf16 %v4806_v29, %v4805_v6  ;;  %v4824_v40 = vld [vmem:[#allocation11 + $0x198] sm:$0xff] }
0x2a1d   :  { %6242 = vmatpush1.bf16.msra.mxu1 %v6241_v59  ;;  %v6291_v59 = vpack.c.bf16 %v4824_v40, %v4823_v48 }
0x2a1e   :  { %6274 = vmatpush1.bf16.msra.mxu0 %v6273_v42  ;;  %6244 = vmatprep.subr.bf16.mxu1 %v6243_v63  ;;  %v6293_v42 = vpack.c.bf16 %v4808_v44, %v4807_v33  ;;  %v4809_v63 = vld [vmem:[#allocation11 + $0x120] sm:$0xff] }
0x2a1f   :  { %6276 = vmatprep.subr.bf16.mxu0 %v6275_v46  ;;  %v6297_v60 = vpack.c.bf16 %v4810_v49, %v4809_v63  ;;  %v4828_v46 = vld [vmem:[#allocation11 + $0x1b8] sm:$0xff] }
0x2a21   :  { %6246 = vmatpush1.bf16.msra.mxu1 %v6245_v41  ;;  %v6299_v41 = vpack.c.bf16 %v4828_v46, %v4827_v50 }
0x2a22   :  { %6278 = vmatpush1.bf16.msra.mxu0 %v6277_v43  ;;  %6248 = vmatprep.subr.bf16.mxu1 %v6247_v57  ;;  %v4829_v43 = vld [vmem:[#allocation11 + $0x1c0] sm:$0xff]  ;;  %v4814_v57 = vld [vmem:[#allocation11 + $0x148] sm:$0xff] }
0x2a23   :  { %6280 = vmatprep.subr.bf16.mxu0 %v6279_v58  ;;  %v6303_v52 = vpack.c.bf16 %v4830_v18, %v4829_v43  ;;  %v6305_v58 = vpack.c.bf16 %v4814_v57, %v4813_v55 }
0x2a25   :  { %6250 = vmatpush1.bf16.msra.mxu1 %v6249_v3  ;;  %v4815_v3 = vld [vmem:[#allocation11 + $0x150] sm:$0xff] }
0x2a26   :  { %6282 = vmatpush1.bf16.msra.mxu0 %v6281_v13  ;;  %6252 = vmatprep.subr.bf16.mxu1 %v6251_v15  ;;  %v6309_v11 = vpack.c.bf16 %v4816_v8, %v4815_v3  ;;  %v4834_v13 = vld [vmem:[#allocation11 + $0x1e8] sm:$0xff] }
0x2a27   :  { %6284 = vmatprep.subr.bf16.mxu0 %v6283_v19  ;;  %v6311_v15 = vpack.c.bf16 %v4834_v13, %v4833_v12  ;;  %v4835_v19 = vld [vmem:[#allocation11 + $0x1f0] sm:$0xff] }
0x2a28   :  { %v6315_v7 = vpack.c.bf16 %v4836_v31, %v4835_v19 }
0x2a29   :  { %6254 = vmatpush1.bf16.msra.mxu1 %v6253_v32  ;;  %v4820_v32 = vld [vmem:[#allocation11 + $0x178] sm:$0xff] }
0x2a2a   :  { %6286 = vmatpush1.bf16.msra.mxu0 %v6285_v24  ;;  %6288 = vmatprep.subr.bf16.mxu1 %v6287_v5  ;;  %v6317_v24 = vpack.c.bf16 %v4820_v32, %v4819_v14 }
0x2aa5   :  { %v4535_v27 = vpop.xlane.xlu0 %4534 }
0x2aa6   :  { %v4537_v0 = vmul.f32 0.0078125, %v4535_v27  ;;  %v4533_v1 = vpop.xlane.xlu1 %4532 }
0x2aa7   :  { %v4536_v45 = vmul.f32 0.0078125, %v4533_v1 }
0x2aa8   :  { %v4539_v34 = vadd.f32 1e-06, %v4537_v0 }
0x2aa9   :  { %v4538_v23 = vadd.f32 1e-06, %v4536_v45 }
0x2aaa   :  { %6619 = vrsqrt.f32 %v4539_v34 }
0x2aab   :  { %6621 = vrsqrt.f32 %v4538_v23 }
0x2ab4   :  { %v6620_v35 = vpop.eup %6619 }
0x2ab5   :  { %v6622_v20 = vpop.eup %6621  ;;  %v4543_v25 = vmul.f32 %v6620_v35, %v8344_v2 }
0x2ab6   :  { %v4542_v56 = vmul.f32 %v6622_v20, %v8347_v28 }
0x2ab7   :  { %v4551_v39 = vmul.f32 %v5173_v36, %v4543_v25 }
0x2ab8   :  { %v4550_v37 = vmul.f32 %v5173_v36, %v4542_v56 }
0x2aba   :  { %4650 = vmatmul.mubr.f32.vlgmr.msra.gmra.mrb[48].mxu1 %v4550_v37  ;;  %4760 = vmatmul.mubr.f32.vlgmr.msra.gmra.mrb[44].mxu0 %v4550_v37 }
0x2abb   :  { %4655 = vmatprep.mubr.f32.mxu1 %v7004_v47  ;;  %4765 = vmatprep.mubr.f32.mxu0 %v7004_v47 }
0x2abc   :  { %6290 = vmatpush3.bf16.msra.mxu1 %v6289_v26 }
0x2abd   :  { %6292 = vmatprep.subr.bf16.mxu1 %v6291_v59 }
0x2abe   :  { %4656 = vmatmul.mubr.f32.gmra.mrb[50].mxu1 %v4551_v39  ;;  %4766 = vmatmul.mubr.f32.gmra.mrb[46].mxu0 %v4551_v39 }
0x2ac0   :  { %6294 = vmatpush3.bf16.msra.mxu1 %v6293_v42 }
0x2ac1   :  { %6296 = vmatprep.subr.bf16.mxu1 %v6295_v30 }
0x2ac4   :  { %6298 = vmatpush3.bf16.msra.mxu1 %v6297_v60 }
0x2ac5   :  { %6300 = vmatprep.subr.bf16.mxu1 %v6299_v41 }
0x2ac8   :  { %6302 = vmatpush3.bf16.msra.mxu1 %v6301_v54 }
0x2ac9   :  { %6304 = vmatprep.subr.bf16.mxu1 %v6303_v52 }
0x2acc   :  { %6306 = vmatpush3.bf16.msra.mxu1 %v6305_v58 }
0x2acd   :  { %6308 = vmatprep.subr.bf16.mxu1 %v6307_v62 }
0x2ad0   :  { %6310 = vmatpush3.bf16.msra.mxu1 %v6309_v11 }
0x2ad1   :  { %6312 = vmatprep.subr.bf16.mxu1 %v6311_v15 }
0x2ad4   :  { %6314 = vmatpush3.bf16.msra.mxu1 %v6313_v51 }
0x2ad5   :  { %6316 = vmatprep.subr.bf16.mxu1 %v6315_v7 }
0x2ad8   :  { %6318 = vmatpush3.bf16.msra.mxu1 %v6317_v24 }
0x2b8d   :  { %v4651_v27 = vpop.f32.mrb[48].mxu1  ;;  %v4761_v0 = vpop.f32.mrb[44].mxu0 }
0x2b8e   :  { %v5206_v1 = vmul.f32 -1.442695, %v4651_v27  ;;  %v4653_v45 = vpop.f32.mrb[49].mxu1  ;;  %v4763_v34 = vpop.f32.mrb[45].mxu0 }
0x2b8f   :  { %v5207_v23 = vmul.f32 -1.442695, %v4653_v45 }
0x2b90   :  { %6623 = vpow2.f32 %v5206_v1 }
0x2b91   :  { %6625 = vpow2.f32 %v5207_v23  ;;  %v4657_v35 = vpop.f32.mrb[50].mxu1  ;;  %v4767_v20 = vpop.f32.mrb[46].mxu0 }
0x2b92   :  { %v5208_v36 = vmul.f32 -1.442695, %v4657_v35  ;;  %v4659_v56 = vpop.f32.mrb[51].mxu1  ;;  %v4769_v37 = vpop.f32.mrb[47].mxu0 }
0x2b93   :  { %v5209_v25 = vmul.f32 -1.442695, %v4659_v56 }
0x2b94   :  { %6627 = vpow2.f32 %v5208_v36 }
0x2b95   :  { %6629 = vpow2.f32 %v5209_v25 }
0x2b9a   :  { %v6624_v39 = vpop.eup %6623 }
0x2b9b   :  { %v6626_v38 = vpop.eup %6625  ;;  %v4784_v22 = vadd.f32 1.0, %v6624_v39 }
0x2b9c   :  { %v4785_v5 = vadd.f32 1.0, %v6626_v38 }
0x2b9d   :  { %6631 = vrcp.f32 %v4784_v22 }
0x2b9e   :  { %v6628_v6 = vpop.eup %6627  ;;  %6633 = vrcp.f32 %v4785_v5 }
0x2b9f   :  { %v6630_v29 = vpop.eup %6629  ;;  %v4786_v26 = vadd.f32 1.0, %v6628_v6 }
0x2ba0   :  { %v4787_v48 = vadd.f32 1.0, %v6630_v29 }
0x2ba1   :  { %6635 = vrcp.f32 %v4786_v26 }
0x2ba2   :  { %6637 = vrcp.f32 %v4787_v48 }
0x2ba7   :  { %v6632_v40 = vpop.eup %6631 }
0x2ba8   :  { %v6634_v59 = vpop.eup %6633  ;;  %v4796_v33 = vmul.f32 %v6632_v40, %v4651_v27 }
0x2ba9   :  { %v4797_v44 = vmul.f32 %v6634_v59, %v4653_v45 }
0x2baa   :  { %v4800_v42 = vmul.f32 %v4796_v33, %v4761_v0 }
0x2bab   :  { %v6636_v10 = vpop.eup %6635  ;;  %v4801_v4 = vmul.f32 %v4797_v44, %v4763_v34 }
0x2bac   :  { %v6638_v30 = vpop.eup %6637  ;;  %v4798_v63 = vmul.f32 %v6636_v10, %v4657_v35 }
0x2bad   :  { %v4799_v49 = vmul.f32 %v6638_v30, %v4659_v56  ;;  %4901 = vmatprep.mubr.f32.mxu1 %v4801_v4 }
0x2bae   :  { %v4802_v60 = vmul.f32 %v4798_v63, %v4767_v20  ;;  %4902 = vmatmul.mubr.f32.vlgmr.msra.gmra.mrb[52].mxu1 %v4800_v42 }
0x2baf   :  { %v4803_v50 = vmul.f32 %v4799_v49, %v4769_v37 }
0x2bb1   :  { %4906 = vmatprep.mubr.f32.mxu1 %v4803_v50 }
0x2bb2   :  { %4907 = vmatmul.mubr.f32.gmra.mrb[54].mxu1 %v4802_v60 }
0x2bb3   :  { %6908 = shalt.err (!%p8587_p13)  }
0x2bb4   :  { %s6921_s0 = scalar_lea.hbm %s8511_s15, 1408  ;;  %p6912_p11 = scmp.lt.u32.totalorder %s3006_s13, %s8511_s15 }
0x2bb5   :  { %p6910_p2 = scmp.ne.s32.totalorder %s3006_s13, %s6921_s0  ;;  %s8588_s26 = scalar_lea.hbm %s8511_s15, 2048 }
0x2bb6   :  { %p6913_p12 = scmp.lt.u32.totalorder %s8588_s26, %s6921_s0  ;;  %p6915_p3 = scmp.lt.u32.totalorder %s6921_s0, %s3006_s13 }
0x2bb8   :  { %p6914_p7 = por %p6913_p12, %p6912_p11 }
0x2bba   :  { %p6916_p6 = por %p6915_p3, %p6914_p7 }
0x2bbc   :  { %p6917_p0 = pnand %p6916_p6, %p6910_p2 }
0x2bbe   :  { %6920 = shalt.err (!%p6917_p0)  }
0x2bbf   :  { %s8589_s14 = sld [smem:[#allocation37_spill]]  ;;  %s8590_s2 = sld [smem:[#allocation36_spill]] }
0x2bc0   :  { %3011 = dma.vmem_to_hbm [thread:$0]  %s7808_s28, 256, %s3006_s13, [#allocation4 + $0x2], %s8575_s10, %s8574_s9, %s8573_s23 }
0x2bc1   :  { %s8591_s12 = sld [smem:[#allocation41_spill]] }
0x2bc5   :  { %p8592_p5 = scmp.ne.s32.totalorder %s8589_s14, 0  ;;  %p8593_p10 = scmp.ne.s32.totalorder %s8590_s2, 0 }
0x2bc7   :  { %s3012_s16 = scalar_lea.hbm %s8591_s12, 1152  ;;  %p8594_p4 = pnand %p8592_p5, %p8593_p10 }
0x2bc9   :  { %6933 = shalt.err (!%p8594_p4)  }
0x2bca   :  { %s6946_s11 = scalar_lea.hbm %s8591_s12, 1408  ;;  %p6937_p8 = scmp.lt.u32.totalorder %s3012_s16, %s8591_s12 }
0x2bcb   :  { %p6935_p1 = scmp.ne.s32.totalorder %s3012_s16, %s6946_s11  ;;  %s8595_s28 = scalar_lea.hbm %s8591_s12, 2048 }
0x2bcc   :  { %p6938_p9 = scmp.lt.u32.totalorder %s8595_s28, %s6946_s11  ;;  %p6940_p2 = scmp.lt.u32.totalorder %s6946_s11, %s3012_s16 }
0x2bce   :  { %p6939_p13 = por %p6938_p9, %p6937_p8 }
0x2bd0   :  { %p6941_p11 = por %p6940_p2, %p6939_p13 }
0x2bd2   :  { %p6942_p12 = pnand %p6941_p11, %p6935_p1 }
0x2bd4   :  { %6945 = shalt.err (!%p6942_p12)  }
0x2bd5   :  { %s8596_s19 = sld [smem:[#allocation35_spill]] }
0x2bdb   :  { %3017 = dma.vmem_to_hbm [thread:$0]  %s8596_s19, 256, %s3012_s16, [#allocation4 + $0x3], %s8575_s10, %s8574_s9, %s8573_s23 }
0x2c81   :  { %v5453_v46 = vpop.f32.mrb[52].mxu1 }
0x2c82   :  { %v5454_v41 = vpop.f32.mrb[53].mxu1 }
0x2c83   :  { %v5455_v9 = vadd.f32 %v5454_v41, %v5453_v46 }
0x2c85   :  { %v8465_v53 = vadd.f32 %v5455_v9, %v8347_v28  ;;  %v5456_v54 = vpop.f32.mrb[54].mxu1 }
0x2c86   :  { %v5457_v43 = vpop.f32.mrb[55].mxu1 }
0x2c87   :  { %v5458_v18 = vadd.f32 %v5457_v43, %v5456_v54 }
0x2c89   :  { %v8468_v52 = vadd.f32 %v5458_v18, %v8344_v2 }
0x2c8a   :  { %6987 = dma.done.wait [#allocation4 + $0x2], 256 }
0x2c8b   :  { %6988 = vsyncadd [#allocation4 + $0x2], 4294967040  ;;  %v4919_v55 = vmul.f32 %v8465_v53, %v8465_v53 }
0x2c8c   :  { %6989 = dma.done.wait [#allocation4 + $0x3], 256 }
0x2c8d   :  { %6990 = vsyncadd [#allocation4 + $0x3], 4294967040  ;;  %5037 = vmatprep.mubr.f32.mxu0 %v7004_v47  ;;  %4921 = vadd.xlane.f32.xlu0 %v4919_v55  ;;  %v4920_v28 = vmul.f32 %v8468_v52, %v8468_v52  ;;  %v4942_v57 = vld [vmem:[#allocation13 + $0x8] sm:$0xff]  ;;  %v4944_v58 = vld [vmem:[#allocation13 + $0x18] sm:$0xff]  ;;  %s8597_s7 = sld [smem:[#allocation39_spill]]  ;;  %s7018_s17 = smov [#allocation14]  }
0x2c8e   :  { %v4941_v61 = vld [vmem:[#allocation13] sm:$0xff]  ;;  %v6319_v17 = vpack.c.bf16 %v4944_v58, %v4942_v57  ;;  %v4943_v2 = vld [vmem:[#allocation13 + $0x10] sm:$0xff]  ;;  %v4946_v62 = vld [vmem:[#allocation13 + $0x28] sm:$0xff]  ;;  %s5059_s6 = sshll.u32 %s7018_s17, 4  ;;  %s5060_s6 = int_to_ptr.vmem [resolvable:$true] %s5059_s6 }
0x2c8f   :  { %v4948_v3 = vld [vmem:[#allocation13 + $0x38] sm:$0xff]  ;;  %v6321_v8 = vpack.c.bf16 %v4943_v2, %v4941_v61  ;;  %v4945_v12 = vld [vmem:[#allocation13 + $0x20] sm:$0xff]  ;;  %v4947_v13 = vld [vmem:[#allocation13 + $0x30] sm:$0xff]  ;;  %s6947_s8 = scalar_lea.vmem %s5060_s6, 512  ;;  %p6952_p3 = scmp.lt.s32.totalorder %s5060_s6, %s5060_s6 }
0x2c90   :  { %v6323_v11 = vpack.c.bf16 %v4948_v3, %v4946_v62  ;;  %v4950_v15 = vld [vmem:[#allocation13 + $0x48] sm:$0xff]  ;;  %6320 = vmatprep.subr.bf16.mxu0 %v6319_v17  ;;  %v4952_v21 = vld [vmem:[#allocation13 + $0x58] sm:$0xff]  ;;  %v6325_v16 = vpack.c.bf16 %v4947_v13, %v4945_v12  ;;  %v4949_v19 = vld [vmem:[#allocation13 + $0x40] sm:$0xff]  ;;  %p6948_p7 = scmp.ne.s32.totalorder %s5060_s6, %s6947_s8  ;;  %p6953_p6 = scmp.lt.s32.totalorder %s6947_s8, %s6947_s8 }
0x2c91   :  { %4923 = vadd.xlane.f32.xlu0 %v4920_v28  ;;  %6322 = vmatpush1.bf16.msra.mxu0 %v6321_v8  ;;  %v6327_v51 = vpack.c.bf16 %v4952_v21, %v4950_v15  ;;  %v4951_v31 = vld [vmem:[#allocation13 + $0x50] sm:$0xff]  ;;  %v4954_v7 = vld [vmem:[#allocation13 + $0x68] sm:$0xff]  ;;  %v4956_v14 = vld [vmem:[#allocation13 + $0x78] sm:$0xff] }
0x2c92   :  { %6324 = vmatprep.subr.bf16.mxu0 %v6323_v11  ;;  %v6329_v32 = vpack.c.bf16 %v4951_v31, %v4949_v19  ;;  %v6331_v24 = vpack.c.bf16 %v4956_v14, %v4954_v7  ;;  %v4953_v27 = vld [vmem:[#allocation13 + $0x60] sm:$0xff]  ;;  %v4955_v0 = vld [vmem:[#allocation13 + $0x70] sm:$0xff]  ;;  %v4958_v1 = vld [vmem:[#allocation13 + $0x88] sm:$0xff]  ;;  %p6954_p0 = por %p6953_p6, %p6952_p3 }
0x2c93   :  { %v4960_v45 = vld [vmem:[#allocation13 + $0x98] sm:$0xff]  ;;  %v6333_v34 = vpack.c.bf16 %v4955_v0, %v4953_v27  ;;  %v4957_v35 = vld [vmem:[#allocation13 + $0x80] sm:$0xff]  ;;  %v4959_v20 = vld [vmem:[#allocation13 + $0x90] sm:$0xff] }
0x2c94   :  { %v6335_v23 = vpack.c.bf16 %v4960_v45, %v4958_v1  ;;  %v4962_v36 = vld [vmem:[#allocation13 + $0xa8] sm:$0xff]  ;;  %v4964_v56 = vld [vmem:[#allocation13 + $0xb8] sm:$0xff]  ;;  %v6337_v37 = vpack.c.bf16 %v4959_v20, %v4957_v35  ;;  %v4961_v39 = vld [vmem:[#allocation13 + $0xa0] sm:$0xff]  ;;  %p6955_p5 = pnand %p6954_p0, %p6948_p7 }
0x2c95   :  { %6326 = vmatpush1.bf16.msra.mxu0 %v6325_v16  ;;  %v6339_v25 = vpack.c.bf16 %v4964_v56, %v4962_v36  ;;  %v4963_v38 = vld [vmem:[#allocation13 + $0xb0] sm:$0xff]  ;;  %v4966_v22 = vld [vmem:[#allocation13 + $0xc8] sm:$0xff]  ;;  %v4968_v5 = vld [vmem:[#allocation13 + $0xd8] sm:$0xff] }
0x2c96   :  { %6328 = vmatprep.subr.bf16.mxu0 %v6327_v51  ;;  %v6341_v6 = vpack.c.bf16 %v4963_v38, %v4961_v39  ;;  %v6343_v29 = vpack.c.bf16 %v4968_v5, %v4966_v22  ;;  %v4965_v26 = vld [vmem:[#allocation13 + $0xc0] sm:$0xff]  ;;  %v4967_v48 = vld [vmem:[#allocation13 + $0xd0] sm:$0xff]  ;;  %v4970_v40 = vld [vmem:[#allocation13 + $0xe8] sm:$0xff] }
0x2c97   :  { %v4972_v59 = vld [vmem:[#allocation13 + $0xf8] sm:$0xff]  ;;  %v6345_v33 = vpack.c.bf16 %v4967_v48, %v4965_v26  ;;  %v4969_v42 = vld [vmem:[#allocation13 + $0xe0] sm:$0xff]  ;;  %v4971_v10 = vld [vmem:[#allocation13 + $0xf0] sm:$0xff] }
0x2c98   :  { %v6347_v44 = vpack.c.bf16 %v4972_v59, %v4970_v40  ;;  %v6349_v4 = vpack.c.bf16 %v4971_v10, %v4969_v42  ;;  %v5210_v9 = vld [vmem:[%s8597_s7] ss:$0 sm:$0xff] }
0x2c99   :  { %6330 = vmatpush1.bf16.msra.mxu0 %v6329_v32 }
0x2c9a   :  { %6332 = vmatprep.subr.bf16.mxu0 %v6331_v24 }
0x2c9d   :  { %6334 = vmatpush1.bf16.msra.mxu0 %v6333_v34 }
0x2c9e   :  { %6336 = vmatprep.subr.bf16.mxu0 %v6335_v23 }
0x2ca1   :  { %6338 = vmatpush1.bf16.msra.mxu0 %v6337_v37 }
0x2ca2   :  { %6340 = vmatprep.subr.bf16.mxu0 %v6339_v25 }
0x2ca5   :  { %6342 = vmatpush1.bf16.msra.mxu0 %v6341_v6 }
0x2ca6   :  { %6344 = vmatprep.subr.bf16.mxu0 %v6343_v29 }
0x2ca9   :  { %6346 = vmatpush1.bf16.msra.mxu0 %v6345_v33 }
0x2caa   :  { %6348 = vmatprep.subr.bf16.mxu0 %v6347_v44 }
0x2cad   :  { %6350 = vmatpush1.bf16.msra.mxu0 %v6349_v4 }
0x2d1a   :  { %v4922_v30 = vpop.xlane.xlu0 %4921 }
0x2d1b   :  { %v4925_v63 = vmul.f32 0.0078125, %v4922_v30 }
0x2d1d   :  { %v4927_v49 = vadd.f32 1e-06, %v4925_v63 }
0x2d1e   :  { %v4924_v60 = vpop.xlane.xlu0 %4923 }
0x2d1f   :  { %6639 = vrsqrt.f32 %v4927_v49  ;;  %v4926_v50 = vmul.f32 0.0078125, %v4924_v60 }
0x2d21   :  { %v4928_v46 = vadd.f32 1e-06, %v4926_v50 }
0x2d23   :  { %6641 = vrsqrt.f32 %v4928_v46 }
0x2d29   :  { %v6640_v41 = vpop.eup %6639 }
0x2d2a   :  { %v4931_v54 = vmul.f32 %v6640_v41, %v8465_v53 }
0x2d2c   :  { %v4939_v43 = vmul.f32 %v5210_v9, %v4931_v54 }
0x2d2d   :  { %v6642_v18 = vpop.eup %6641 }
0x2d2e   :  { %v4932_v55 = vmul.f32 %v6642_v18, %v8468_v52  ;;  %5038 = vmatmul.mubr.f32.vlgmr.msra.gmra.mrb[48].mxu0 %v4939_v43 }
0x2d2f   :  { %5043 = vmatprep.mubr.f32.mxu0 %v7004_v47 }
0x2d30   :  { %v4940_v28 = vmul.f32 %v5210_v9, %v4932_v55 }
0x2d32   :  { %5044 = vmatmul.mubr.f32.gmra.mrb[50].mxu0 %v4940_v28 }
0x2e01   :  { %v5039_v57 = vpop.f32.mrb[48].mxu0 }
0x2e02   :  { %5050 = vst [vmem:[#allocation14] sm:$0xff] %v5039_v57  ;;  %v5041_v58 = vpop.f32.mrb[49].mxu0 }
0x2e03   :  { %5051 = vst [vmem:[#allocation14 + $0x8] sm:$0xff] %v5041_v58 }
0x2e05   :  { %v5045_v61 = vpop.f32.mrb[50].mxu0 }
0x2e06   :  { %5052 = vst [vmem:[#allocation14 + $0x10] sm:$0xff] %v5045_v61  ;;  %v5047_v17 = vpop.f32.mrb[51].mxu0 }
0x2e07   :  { %5053 = vst [vmem:[#allocation14 + $0x18] sm:$0xff] %v5047_v17 }
0x2e08   :  { %6958 = shalt.err (!%p6955_p5)
}
0x2e09   :  { %s8598_s20 = sld [smem:[#allocation40_spill]] }
0x2e0f   :  { %s6959_s0 = scalar_lea.hbm %s8598_s20, 512 }
0x2e10   :  { %p6960_p10 = scmp.ne.s32.totalorder %s8598_s20, %s6959_s0  ;;  %p6963_p4 = scmp.lt.u32.totalorder %s6959_s0, %s8598_s20 }
0x2e12   :  { %p6965_p1 = pnand %p6963_p4, %p6960_p10 }
0x2e14   :  { %6968 = shalt.err (!%p6965_p1)
}
0x2e15   :  { %s8599_s26 = smov 16  }
0x2e16   :  { %5065 = dma.vmem_to_hbm [thread:$0]  %s5060_s6, 512, %s8598_s20, [#allocation7], %s8575_s10, %s8575_s10, %s8599_s26  }
0x2e17   :  { %6991 = dma.done.wait [#allocation7], 512  }
0x2e18   :  { %6992 = vsyncadd [#allocation7], 4294966784 }
0x2e19   :  { %5069 = vsyncpa [#allocation6], 1 }
0x2e1a   :  { %5070 = vsyncpa [#allocation9], 1 }
0x2e1b   :  { %5071 = vsyncpa [#allocation12], 1 }
0x2e1c   :  { %5072 = vsyncpa [#allocation7], 1 }
0x2e1d   :  { %5073 = vsyncmov [#allocation4] }
0x2e20   :  { %s5074_s29 = vpop.sfrf %5073 }
0x2e21   :  { %p5211_p8 = scmp.ne.s32.totalorder %s5074_s29, 0 }
0x2e23   :  { %5078 = shalt.err (%p5211_p8)  }
0x2e24   :  { %5080 = vsyncmov [#allocation4 + $0x1] }
0x2e27   :  { %s5081_s3 = vpop.sfrf %5080 }
0x2e28   :  { %p5212_p9 = scmp.ne.s32.totalorder %s5081_s3, 0 }
0x2e2a   :  { %5085 = shalt.err (%p5212_p9)  }
0x2e2b   :  { %5087 = vsyncmov [#allocation4 + $0x2] }
0x2e2e   :  { %s5088_s12 = vpop.sfrf %5087 }
0x2e2f   :  { %p5213_p13 = scmp.ne.s32.totalorder %s5088_s12, 0 }
0x2e31   :  { %5092 = shalt.err (%p5213_p13)  }
0x2e32   :  { %5094 = vsyncmov [#allocation4 + $0x3] }
0x2e35   :  { %s5095_s10 = vpop.sfrf %5094 }
0x2e36   :  { %p5214_p2 = scmp.ne.s32.totalorder %s5095_s10, 0 }
0x2e38   :  { %5099 = shalt.err (%p5214_p2)  }

</bundles_post_ra>
